<compile_context>
chip_gen: v7x
topology: tpu7x:2x2x1
jax: 0.10.0
libtpu: 0.0.40
codegen_flags: <defaults>
</compile_context>

<pallas_src>
import jax
import jax.numpy as jnp
from jax import lax
from jax.experimental import pallas as pl
from jax.experimental.pallas import tpu as pltpu

KSIZE = 7
PAD = 3  # padding for kernel_size=7


def _spatial_attention_kernel(x_ref, wsp_ref, o_ref, pad_ref):
    # x_ref:   (NB, C, H, W)        VMEM input block
    # wsp_ref: (2*7*7,)             SMEM flattened conv weights (f32)
    # o_ref:   (NB, H, W)           VMEM output block
    # pad_ref: (2, NB, H+6, W+6)    VMEM scratch, persistent across grid steps
    NB, H, W = o_ref.shape

    # Zero the padded scratch once; the zero border survives all later steps
    # because only the [PAD:PAD+H, PAD:PAD+W] window is ever rewritten.
    @pl.when(pl.program_id(0) == 0)
    def _init():
        pad_ref[...] = jnp.zeros_like(pad_ref)

    x = x_ref[...].astype(jnp.float32)        # f32 stats (safe on v5e too)
    avg_c = jnp.mean(x, axis=1)               # (NB, H, W) channel mean
    max_c = jnp.max(x, axis=1)                # (NB, H, W) channel max

    # Fill the centers of the fused padded buffer (static sub-window stores).
    pad_ref[0, :, PAD:PAD + H, PAD:PAD + W] = avg_c
    pad_ref[1, :, PAD:PAD + H, PAD:PAD + W] = max_c

    # 7x7 cross-correlation (like nn.Conv2d), 2 in-channels -> 1 out, no bias.
    # 49 taps, each tap is one fused (2, NB, H, W) read of a static Ref view
    # plus two scalar-broadcast MACs on the VPU.
    acc = jnp.zeros((NB, H, W), jnp.float32)
    for dh in range(KSIZE):
        for dw in range(KSIZE):
            tap = pad_ref[:, :, dh:dh + H, dw:dw + W]       # (2, NB, H, W)
            w_avg = wsp_ref[dh * KSIZE + dw]                # in-channel 0 (avg)
            w_max = wsp_ref[KSIZE * KSIZE + dh * KSIZE + dw]  # in-channel 1 (max)
            acc = acc + w_avg * tap[0] + w_max * tap[1]

    # sigmoid via EUP exp + EUP approx reciprocal (no f32 divide on the VALU).
    sa = pl.reciprocal(1.0 + jnp.exp(-acc), approx=True)
    o_ref[...] = sa.astype(o_ref.dtype)


def _pick_batch_block(N, C, H, W, itemsize, vmem_budget_bytes=4 * 1024 * 1024):
    """Largest divisor of N whose input block stays within a few MiB of VMEM."""
    per_batch = max(1, C * H * W * itemsize)
    nb = max(1, min(N, vmem_budget_bytes // per_batch))
    while N % nb:
        nb -= 1
    return nb


def spatial_attention_pallas(x, wsp, *, batch_block=None):
    """x: (N, C, H, W); wsp: (1, 2, 7, 7) conv1 weight (bias=False).

    Returns the (N, 1, H, W) spatial-attention map, matching the PyTorch module.
    """
    N, C, H, W = x.shape
    nb = batch_block or _pick_batch_block(N, C, H, W, x.dtype.itemsize)
    assert N % nb == 0, "batch block must divide N"
    wsp_flat = wsp.reshape(-1).astype(jnp.float32)            # (98,) scalars -> SMEM

    out = pl.pallas_call(
        _spatial_attention_kernel,
        out_shape=jax.ShapeDtypeStruct((N, H, W), x.dtype),
        grid_spec=pltpu.PrefetchScalarGridSpec(
            num_scalar_prefetch=0,
            grid=(N // nb,),
            in_specs=[
                pl.BlockSpec((nb, C, H, W), lambda n: (n, 0, 0, 0)),
                pl.BlockSpec(memory_space=pltpu.MemorySpace.SMEM),
            ],
            out_specs=pl.BlockSpec((nb, H, W), lambda n: (n, 0, 0)),
            scratch_shapes=[
                pltpu.VMEM((2, nb, H + 2 * PAD, W + 2 * PAD), jnp.float32),
            ],
        ),
        compiler_params=pltpu.CompilerParams(
            dimension_semantics=("parallel",),
            vmem_limit_bytes=32 * 1024 * 1024,   # explicit: safe on v5e/v6e/v7x
        ),
    )(x, wsp_flat)

    return out.reshape(N, 1, H, W)


def spatial_attention_reference(x, wsp):
    """Pure-JAX reference matching the PyTorch SpatialAttention forward."""
    avg_c = jnp.mean(x, axis=1, keepdims=True)                  # (N, 1, H, W)
    max_c = jnp.max(x, axis=1, keepdims=True)                   # (N, 1, H, W)
    cat = jnp.concatenate([avg_c, max_c], axis=1)               # (N, 2, H, W)
    y = lax.conv_general_dilated(
        cat, wsp, window_strides=(1, 1),
        padding=((PAD, PAD), (PAD, PAD)),
        dimension_numbers=("NCHW", "OIHW", "NCHW"),
        precision=lax.Precision.HIGHEST)
    return jax.nn.sigmoid(y)                                    # (N, 1, H, W)


if __name__ == "__main__":
    N, C, H, W = 2, 4, 16, 16

    key = jax.random.PRNGKey(0)
    kx, kw = jax.random.split(key)
    x = jax.random.normal(kx, (N, C, H, W), dtype=jnp.float32)
    # conv1: nn.Conv2d(2, 1, kernel_size=7, padding=3, bias=False)
    wsp = 0.1 * jax.random.normal(kw, (1, 2, KSIZE, KSIZE), dtype=jnp.float32)

    out = spatial_attention_pallas(x, wsp)
    out = jax.block_until_ready(out)

    ref = spatial_attention_reference(x, wsp)
    ref = jax.block_until_ready(ref)

    assert out.shape == (N, 1, H, W)
    # approx-reciprocal sigmoid -> slightly looser tolerance than exact f32.
    assert jnp.allclose(out, ref, atol=2e-3, rtol=2e-3), \
        f"max abs err {jnp.max(jnp.abs(out - ref))}"

    print("KERNEL_OK")
</pallas_src>

<mosaic_0001>
module attributes {stable_mosaic.version = 11 : i64} {
  func.func @_spatial_attention_kernel(%arg0: i32, %arg1: memref<2x4x16x16xf32, #tpu.memory_space<vmem>>, %arg2: memref<98xf32, #tpu.memory_space<smem>>, %arg3: memref<2x16x16xf32, #tpu.memory_space<vmem>>, %arg4: memref<2x2x22x22xf32, #tpu.memory_space<vmem>>) attributes {dimension_semantics = [#tpu.dimension_semantics<parallel>], iteration_bounds = array<i64: 1>, scalar_prefetch = 0 : i64, scratch_operands = 1 : i64, tpu.core_type = #tpu.core_type<tc>, window_params = [{transform_indices = @transform_0, window_bounds = array<i64: 2, 4, 16, 16>}, {transform_indices = @transform_1, window_bounds = array<i64: 98>}, {transform_indices = @transform_2, window_bounds = array<i64: 2, 16, 16>}]} {
    %c0_i32 = arith.constant 0 : i32
    %0 = arith.cmpi eq, %arg0, %c0_i32 : i32
    %1 = arith.extui %0 : i1 to i32
    %c0_i32_0 = arith.constant 0 : i32
    %2 = arith.cmpi ne, %1, %c0_i32_0 : i32
    scf.if %2 {
      %cst_217 = arith.constant 0.000000e+00 : f32
      %659 = vector.broadcast %cst_217 : f32 to vector<2x2x22x22xf32>
      %c0_218 = arith.constant 0 : index
      %c0_219 = arith.constant 0 : index
      %c0_220 = arith.constant 0 : index
      %c0_221 = arith.constant 0 : index
      %660 = vector.load %arg4[%c0_218, %c0_219, %c0_220, %c0_221] : memref<2x2x22x22xf32, #tpu.memory_space<vmem>>, vector<2x2x22x22xf32>
      tpu.vector_store %arg4[%c0_218, %c0_219, %c0_220, %c0_221], %659 {strides = array<i32>} : memref<2x2x22x22xf32, #tpu.memory_space<vmem>>, vector<2x2x22x22xf32>,
    } else {
    }
    %c0 = arith.constant 0 : index
    %c0_1 = arith.constant 0 : index
    %c0_2 = arith.constant 0 : index
    %c0_3 = arith.constant 0 : index
    %3 = vector.load %arg1[%c0, %c0_1, %c0_2, %c0_3] : memref<2x4x16x16xf32, #tpu.memory_space<vmem>>, vector<2x4x16x16xf32>
    %cst = arith.constant dense<0.000000e+00> : vector<2x16x16xf32>
    %4 = vector.multi_reduction <add>, %3, %cst [1] : vector<2x4x16x16xf32> to vector<2x16x16xf32>
    %cst_4 = arith.constant 4.000000e+00 : f32
    %5 = vector.broadcast %cst_4 : f32 to vector<2x16x16xf32>
    %6 = arith.divf %4, %5 : vector<2x16x16xf32>
    %cst_5 = arith.constant dense<0xFF800000> : vector<2x16x16xf32>
    %7 = vector.multi_reduction <maximumf>, %3, %cst_5 [1] : vector<2x4x16x16xf32> to vector<2x16x16xf32>
    %c0_6 = arith.constant 0 : index
    %c0_7 = arith.constant 0 : index
    %c3 = arith.constant 3 : index
    %c3_8 = arith.constant 3 : index
    %8 = vector.load %arg4[%c0_6, %c0_7, %c3, %c3_8] : memref<2x2x22x22xf32, #tpu.memory_space<vmem>>, vector<1x2x16x16xf32>
    %9 = vector.shape_cast %8 : vector<1x2x16x16xf32> to vector<2x16x16xf32>
    %10 = vector.shape_cast %6 : vector<2x16x16xf32> to vector<1x2x16x16xf32>
    tpu.vector_store %arg4[%c0_6, %c0_7, %c3, %c3_8], %10 {strides = array<i32>} : memref<2x2x22x22xf32, #tpu.memory_space<vmem>>, vector<1x2x16x16xf32>,
    %c1 = arith.constant 1 : index
    %c0_9 = arith.constant 0 : index
    %c3_10 = arith.constant 3 : index
    %c3_11 = arith.constant 3 : index
    %11 = vector.load %arg4[%c1, %c0_9, %c3_10, %c3_11] : memref<2x2x22x22xf32, #tpu.memory_space<vmem>>, vector<1x2x16x16xf32>
    %12 = vector.shape_cast %11 : vector<1x2x16x16xf32> to vector<2x16x16xf32>
    %13 = vector.shape_cast %7 : vector<2x16x16xf32> to vector<1x2x16x16xf32>
    tpu.vector_store %arg4[%c1, %c0_9, %c3_10, %c3_11], %13 {strides = array<i32>} : memref<2x2x22x22xf32, #tpu.memory_space<vmem>>, vector<1x2x16x16xf32>,
    %cst_12 = arith.constant 0.000000e+00 : f32
    %14 = vector.broadcast %cst_12 : f32 to vector<2x16x16xf32>
    %c0_13 = arith.constant 0 : index
    %c0_14 = arith.constant 0 : index
    %c0_15 = arith.constant 0 : index
    %c0_16 = arith.constant 0 : index
    %15 = vector.load %arg4[%c0_13, %c0_14, %c0_15, %c0_16] : memref<2x2x22x22xf32, #tpu.memory_space<vmem>>, vector<2x2x16x16xf32>
    %c0_17 = arith.constant 0 : index
    %16 = memref.load %arg2[%c0_17] : memref<98xf32, #tpu.memory_space<smem>>
    %c49 = arith.constant 49 : index
    %17 = memref.load %arg2[%c49] : memref<98xf32, #tpu.memory_space<smem>>
    %18 = vector.extract_strided_slice %15 {offsets = [0, 0, 0, 0], sizes = [1, 2, 16, 16], strides = [1, 1, 1, 1]} : vector<2x2x16x16xf32> to vector<1x2x16x16xf32>
    %19 = vector.shape_cast %18 : vector<1x2x16x16xf32> to vector<2x16x16xf32>
    %20 = vector.broadcast %16 : f32 to vector<2x16x16xf32>
    %21 = arith.mulf %20, %19 : vector<2x16x16xf32>
    %22 = arith.addf %14, %21 : vector<2x16x16xf32>
    %23 = vector.extract_strided_slice %15 {offsets = [1, 0, 0, 0], sizes = [1, 2, 16, 16], strides = [1, 1, 1, 1]} : vector<2x2x16x16xf32> to vector<1x2x16x16xf32>
    %24 = vector.shape_cast %23 : vector<1x2x16x16xf32> to vector<2x16x16xf32>
    %25 = vector.broadcast %17 : f32 to vector<2x16x16xf32>
    %26 = arith.mulf %25, %24 : vector<2x16x16xf32>
    %27 = arith.addf %22, %26 : vector<2x16x16xf32>
    %c0_18 = arith.constant 0 : index
    %c0_19 = arith.constant 0 : index
    %c0_20 = arith.constant 0 : index
    %c1_21 = arith.constant 1 : index
    %28 = vector.load %arg4[%c0_18, %c0_19, %c0_20, %c1_21] : memref<2x2x22x22xf32, #tpu.memory_space<vmem>>, vector<2x2x16x16xf32>
    %c1_22 = arith.constant 1 : index
    %29 = memref.load %arg2[%c1_22] : memref<98xf32, #tpu.memory_space<smem>>
    %c50 = arith.constant 50 : index
    %30 = memref.load %arg2[%c50] : memref<98xf32, #tpu.memory_space<smem>>
    %31 = vector.extract_strided_slice %28 {offsets = [0, 0, 0, 0], sizes = [1, 2, 16, 16], strides = [1, 1, 1, 1]} : vector<2x2x16x16xf32> to vector<1x2x16x16xf32>
    %32 = vector.shape_cast %31 : vector<1x2x16x16xf32> to vector<2x16x16xf32>
    %33 = vector.broadcast %29 : f32 to vector<2x16x16xf32>
    %34 = arith.mulf %33, %32 : vector<2x16x16xf32>
    %35 = arith.addf %27, %34 : vector<2x16x16xf32>
    %36 = vector.extract_strided_slice %28 {offsets = [1, 0, 0, 0], sizes = [1, 2, 16, 16], strides = [1, 1, 1, 1]} : vector<2x2x16x16xf32> to vector<1x2x16x16xf32>
    %37 = vector.shape_cast %36 : vector<1x2x16x16xf32> to vector<2x16x16xf32>
    %38 = vector.broadcast %30 : f32 to vector<2x16x16xf32>
    %39 = arith.mulf %38, %37 : vector<2x16x16xf32>
    %40 = arith.addf %35, %39 : vector<2x16x16xf32>
    %c0_23 = arith.constant 0 : index
    %c0_24 = arith.constant 0 : index
    %c0_25 = arith.constant 0 : index
    %c2 = arith.constant 2 : index
    %41 = vector.load %arg4[%c0_23, %c0_24, %c0_25, %c2] : memref<2x2x22x22xf32, #tpu.memory_space<vmem>>, vector<2x2x16x16xf32>
    %c2_26 = arith.constant 2 : index
    %42 = memref.load %arg2[%c2_26] : memref<98xf32, #tpu.memory_space<smem>>
    %c51 = arith.constant 51 : index
    %43 = memref.load %arg2[%c51] : memref<98xf32, #tpu.memory_space<smem>>
    %44 = vector.extract_strided_slice %41 {offsets = [0, 0, 0, 0], sizes = [1, 2, 16, 16], strides = [1, 1, 1, 1]} : vector<2x2x16x16xf32> to vector<1x2x16x16xf32>
    %45 = vector.shape_cast %44 : vector<1x2x16x16xf32> to vector<2x16x16xf32>
    %46 = vector.broadcast %42 : f32 to vector<2x16x16xf32>
    %47 = arith.mulf %46, %45 : vector<2x16x16xf32>
    %48 = arith.addf %40, %47 : vector<2x16x16xf32>
    %49 = vector.extract_strided_slice %41 {offsets = [1, 0, 0, 0], sizes = [1, 2, 16, 16], strides = [1, 1, 1, 1]} : vector<2x2x16x16xf32> to vector<1x2x16x16xf32>
    %50 = vector.shape_cast %49 : vector<1x2x16x16xf32> to vector<2x16x16xf32>
    %51 = vector.broadcast %43 : f32 to vector<2x16x16xf32>
    %52 = arith.mulf %51, %50 : vector<2x16x16xf32>
    %53 = arith.addf %48, %52 : vector<2x16x16xf32>
    %c0_27 = arith.constant 0 : index
    %c0_28 = arith.constant 0 : index
    %c0_29 = arith.constant 0 : index
    %c3_30 = arith.constant 3 : index
    %54 = vector.load %arg4[%c0_27, %c0_28, %c0_29, %c3_30] : memref<2x2x22x22xf32, #tpu.memory_space<vmem>>, vector<2x2x16x16xf32>
    %c3_31 = arith.constant 3 : index
    %55 = memref.load %arg2[%c3_31] : memref<98xf32, #tpu.memory_space<smem>>
    %c52 = arith.constant 52 : index
    %56 = memref.load %arg2[%c52] : memref<98xf32, #tpu.memory_space<smem>>
    %57 = vector.extract_strided_slice %54 {offsets = [0, 0, 0, 0], sizes = [1, 2, 16, 16], strides = [1, 1, 1, 1]} : vector<2x2x16x16xf32> to vector<1x2x16x16xf32>
    %58 = vector.shape_cast %57 : vector<1x2x16x16xf32> to vector<2x16x16xf32>
    %59 = vector.broadcast %55 : f32 to vector<2x16x16xf32>
    %60 = arith.mulf %59, %58 : vector<2x16x16xf32>
    %61 = arith.addf %53, %60 : vector<2x16x16xf32>
    %62 = vector.extract_strided_slice %54 {offsets = [1, 0, 0, 0], sizes = [1, 2, 16, 16], strides = [1, 1, 1, 1]} : vector<2x2x16x16xf32> to vector<1x2x16x16xf32>
    %63 = vector.shape_cast %62 : vector<1x2x16x16xf32> to vector<2x16x16xf32>
    %64 = vector.broadcast %56 : f32 to vector<2x16x16xf32>
    %65 = arith.mulf %64, %63 : vector<2x16x16xf32>
    %66 = arith.addf %61, %65 : vector<2x16x16xf32>
    %c0_32 = arith.constant 0 : index
    %c0_33 = arith.constant 0 : index
    %c0_34 = arith.constant 0 : index
    %c4 = arith.constant 4 : index
    %67 = vector.load %arg4[%c0_32, %c0_33, %c0_34, %c4] : memref<2x2x22x22xf32, #tpu.memory_space<vmem>>, vector<2x2x16x16xf32>
    %c4_35 = arith.constant 4 : index
    %68 = memref.load %arg2[%c4_35] : memref<98xf32, #tpu.memory_space<smem>>
    %c53 = arith.constant 53 : index
    %69 = memref.load %arg2[%c53] : memref<98xf32, #tpu.memory_space<smem>>
    %70 = vector.extract_strided_slice %67 {offsets = [0, 0, 0, 0], sizes = [1, 2, 16, 16], strides = [1, 1, 1, 1]} : vector<2x2x16x16xf32> to vector<1x2x16x16xf32>
    %71 = vector.shape_cast %70 : vector<1x2x16x16xf32> to vector<2x16x16xf32>
    %72 = vector.broadcast %68 : f32 to vector<2x16x16xf32>
    %73 = arith.mulf %72, %71 : vector<2x16x16xf32>
    %74 = arith.addf %66, %73 : vector<2x16x16xf32>
    %75 = vector.extract_strided_slice %67 {offsets = [1, 0, 0, 0], sizes = [1, 2, 16, 16], strides = [1, 1, 1, 1]} : vector<2x2x16x16xf32> to vector<1x2x16x16xf32>
    %76 = vector.shape_cast %75 : vector<1x2x16x16xf32> to vector<2x16x16xf32>
    %77 = vector.broadcast %69 : f32 to vector<2x16x16xf32>
    %78 = arith.mulf %77, %76 : vector<2x16x16xf32>
    %79 = arith.addf %74, %78 : vector<2x16x16xf32>
    %c0_36 = arith.constant 0 : index
    %c0_37 = arith.constant 0 : index
    %c0_38 = arith.constant 0 : index
    %c5 = arith.constant 5 : index
    %80 = vector.load %arg4[%c0_36, %c0_37, %c0_38, %c5] : memref<2x2x22x22xf32, #tpu.memory_space<vmem>>, vector<2x2x16x16xf32>
    %c5_39 = arith.constant 5 : index
    %81 = memref.load %arg2[%c5_39] : memref<98xf32, #tpu.memory_space<smem>>
    %c54 = arith.constant 54 : index
    %82 = memref.load %arg2[%c54] : memref<98xf32, #tpu.memory_space<smem>>
    %83 = vector.extract_strided_slice %80 {offsets = [0, 0, 0, 0], sizes = [1, 2, 16, 16], strides = [1, 1, 1, 1]} : vector<2x2x16x16xf32> to vector<1x2x16x16xf32>
    %84 = vector.shape_cast %83 : vector<1x2x16x16xf32> to vector<2x16x16xf32>
    %85 = vector.broadcast %81 : f32 to vector<2x16x16xf32>
    %86 = arith.mulf %85, %84 : vector<2x16x16xf32>
    %87 = arith.addf %79, %86 : vector<2x16x16xf32>
    %88 = vector.extract_strided_slice %80 {offsets = [1, 0, 0, 0], sizes = [1, 2, 16, 16], strides = [1, 1, 1, 1]} : vector<2x2x16x16xf32> to vector<1x2x16x16xf32>
    %89 = vector.shape_cast %88 : vector<1x2x16x16xf32> to vector<2x16x16xf32>
    %90 = vector.broadcast %82 : f32 to vector<2x16x16xf32>
    %91 = arith.mulf %90, %89 : vector<2x16x16xf32>
    %92 = arith.addf %87, %91 : vector<2x16x16xf32>
    %c0_40 = arith.constant 0 : index
    %c0_41 = arith.constant 0 : index
    %c0_42 = arith.constant 0 : index
    %c6 = arith.constant 6 : index
    %93 = vector.load %arg4[%c0_40, %c0_41, %c0_42, %c6] : memref<2x2x22x22xf32, #tpu.memory_space<vmem>>, vector<2x2x16x16xf32>
    %c6_43 = arith.constant 6 : index
    %94 = memref.load %arg2[%c6_43] : memref<98xf32, #tpu.memory_space<smem>>
    %c55 = arith.constant 55 : index
    %95 = memref.load %arg2[%c55] : memref<98xf32, #tpu.memory_space<smem>>
    %96 = vector.extract_strided_slice %93 {offsets = [0, 0, 0, 0], sizes = [1, 2, 16, 16], strides = [1, 1, 1, 1]} : vector<2x2x16x16xf32> to vector<1x2x16x16xf32>
    %97 = vector.shape_cast %96 : vector<1x2x16x16xf32> to vector<2x16x16xf32>
    %98 = vector.broadcast %94 : f32 to vector<2x16x16xf32>
    %99 = arith.mulf %98, %97 : vector<2x16x16xf32>
    %100 = arith.addf %92, %99 : vector<2x16x16xf32>
    %101 = vector.extract_strided_slice %93 {offsets = [1, 0, 0, 0], sizes = [1, 2, 16, 16], strides = [1, 1, 1, 1]} : vector<2x2x16x16xf32> to vector<1x2x16x16xf32>
    %102 = vector.shape_cast %101 : vector<1x2x16x16xf32> to vector<2x16x16xf32>
    %103 = vector.broadcast %95 : f32 to vector<2x16x16xf32>
    %104 = arith.mulf %103, %102 : vector<2x16x16xf32>
    %105 = arith.addf %100, %104 : vector<2x16x16xf32>
    %c0_44 = arith.constant 0 : index
    %c0_45 = arith.constant 0 : index
    %c1_46 = arith.constant 1 : index
    %c0_47 = arith.constant 0 : index
    %106 = vector.load %arg4[%c0_44, %c0_45, %c1_46, %c0_47] : memref<2x2x22x22xf32, #tpu.memory_space<vmem>>, vector<2x2x16x16xf32>
    %c7 = arith.constant 7 : index
    %107 = memref.load %arg2[%c7] : memref<98xf32, #tpu.memory_space<smem>>
    %c56 = arith.constant 56 : index
    %108 = memref.load %arg2[%c56] : memref<98xf32, #tpu.memory_space<smem>>
    %109 = vector.extract_strided_slice %106 {offsets = [0, 0, 0, 0], sizes = [1, 2, 16, 16], strides = [1, 1, 1, 1]} : vector<2x2x16x16xf32> to vector<1x2x16x16xf32>
    %110 = vector.shape_cast %109 : vector<1x2x16x16xf32> to vector<2x16x16xf32>
    %111 = vector.broadcast %107 : f32 to vector<2x16x16xf32>
    %112 = arith.mulf %111, %110 : vector<2x16x16xf32>
    %113 = arith.addf %105, %112 : vector<2x16x16xf32>
    %114 = vector.extract_strided_slice %106 {offsets = [1, 0, 0, 0], sizes = [1, 2, 16, 16], strides = [1, 1, 1, 1]} : vector<2x2x16x16xf32> to vector<1x2x16x16xf32>
    %115 = vector.shape_cast %114 : vector<1x2x16x16xf32> to vector<2x16x16xf32>
    %116 = vector.broadcast %108 : f32 to vector<2x16x16xf32>
    %117 = arith.mulf %116, %115 : vector<2x16x16xf32>
    %118 = arith.addf %113, %117 : vector<2x16x16xf32>
    %c0_48 = arith.constant 0 : index
    %c0_49 = arith.constant 0 : index
    %c1_50 = arith.constant 1 : index
    %c1_51 = arith.constant 1 : index
    %119 = vector.load %arg4[%c0_48, %c0_49, %c1_50, %c1_51] : memref<2x2x22x22xf32, #tpu.memory_space<vmem>>, vector<2x2x16x16xf32>
    %c8 = arith.constant 8 : index
    %120 = memref.load %arg2[%c8] : memref<98xf32, #tpu.memory_space<smem>>
    %c57 = arith.constant 57 : index
    %121 = memref.load %arg2[%c57] : memref<98xf32, #tpu.memory_space<smem>>
    %122 = vector.extract_strided_slice %119 {offsets = [0, 0, 0, 0], sizes = [1, 2, 16, 16], strides = [1, 1, 1, 1]} : vector<2x2x16x16xf32> to vector<1x2x16x16xf32>
    %123 = vector.shape_cast %122 : vector<1x2x16x16xf32> to vector<2x16x16xf32>
    %124 = vector.broadcast %120 : f32 to vector<2x16x16xf32>
    %125 = arith.mulf %124, %123 : vector<2x16x16xf32>
    %126 = arith.addf %118, %125 : vector<2x16x16xf32>
    %127 = vector.extract_strided_slice %119 {offsets = [1, 0, 0, 0], sizes = [1, 2, 16, 16], strides = [1, 1, 1, 1]} : vector<2x2x16x16xf32> to vector<1x2x16x16xf32>
    %128 = vector.shape_cast %127 : vector<1x2x16x16xf32> to vector<2x16x16xf32>
    %129 = vector.broadcast %121 : f32 to vector<2x16x16xf32>
    %130 = arith.mulf %129, %128 : vector<2x16x16xf32>
    %131 = arith.addf %126, %130 : vector<2x16x16xf32>
    %c0_52 = arith.constant 0 : index
    %c0_53 = arith.constant 0 : index
    %c1_54 = arith.constant 1 : index
    %c2_55 = arith.constant 2 : index
    %132 = vector.load %arg4[%c0_52, %c0_53, %c1_54, %c2_55] : memref<2x2x22x22xf32, #tpu.memory_space<vmem>>, vector<2x2x16x16xf32>
    %c9 = arith.constant 9 : index
    %133 = memref.load %arg2[%c9] : memref<98xf32, #tpu.memory_space<smem>>
    %c58 = arith.constant 58 : index
    %134 = memref.load %arg2[%c58] : memref<98xf32, #tpu.memory_space<smem>>
    %135 = vector.extract_strided_slice %132 {offsets = [0, 0, 0, 0], sizes = [1, 2, 16, 16], strides = [1, 1, 1, 1]} : vector<2x2x16x16xf32> to vector<1x2x16x16xf32>
    %136 = vector.shape_cast %135 : vector<1x2x16x16xf32> to vector<2x16x16xf32>
    %137 = vector.broadcast %133 : f32 to vector<2x16x16xf32>
    %138 = arith.mulf %137, %136 : vector<2x16x16xf32>
    %139 = arith.addf %131, %138 : vector<2x16x16xf32>
    %140 = vector.extract_strided_slice %132 {offsets = [1, 0, 0, 0], sizes = [1, 2, 16, 16], strides = [1, 1, 1, 1]} : vector<2x2x16x16xf32> to vector<1x2x16x16xf32>
    %141 = vector.shape_cast %140 : vector<1x2x16x16xf32> to vector<2x16x16xf32>
    %142 = vector.broadcast %134 : f32 to vector<2x16x16xf32>
    %143 = arith.mulf %142, %141 : vector<2x16x16xf32>
    %144 = arith.addf %139, %143 : vector<2x16x16xf32>
    %c0_56 = arith.constant 0 : index
    %c0_57 = arith.constant 0 : index
    %c1_58 = arith.constant 1 : index
    %c3_59 = arith.constant 3 : index
    %145 = vector.load %arg4[%c0_56, %c0_57, %c1_58, %c3_59] : memref<2x2x22x22xf32, #tpu.memory_space<vmem>>, vector<2x2x16x16xf32>
    %c10 = arith.constant 10 : index
    %146 = memref.load %arg2[%c10] : memref<98xf32, #tpu.memory_space<smem>>
    %c59 = arith.constant 59 : index
    %147 = memref.load %arg2[%c59] : memref<98xf32, #tpu.memory_space<smem>>
    %148 = vector.extract_strided_slice %145 {offsets = [0, 0, 0, 0], sizes = [1, 2, 16, 16], strides = [1, 1, 1, 1]} : vector<2x2x16x16xf32> to vector<1x2x16x16xf32>
    %149 = vector.shape_cast %148 : vector<1x2x16x16xf32> to vector<2x16x16xf32>
    %150 = vector.broadcast %146 : f32 to vector<2x16x16xf32>
    %151 = arith.mulf %150, %149 : vector<2x16x16xf32>
    %152 = arith.addf %144, %151 : vector<2x16x16xf32>
    %153 = vector.extract_strided_slice %145 {offsets = [1, 0, 0, 0], sizes = [1, 2, 16, 16], strides = [1, 1, 1, 1]} : vector<2x2x16x16xf32> to vector<1x2x16x16xf32>
    %154 = vector.shape_cast %153 : vector<1x2x16x16xf32> to vector<2x16x16xf32>
    %155 = vector.broadcast %147 : f32 to vector<2x16x16xf32>
    %156 = arith.mulf %155, %154 : vector<2x16x16xf32>
    %157 = arith.addf %152, %156 : vector<2x16x16xf32>
    %c0_60 = arith.constant 0 : index
    %c0_61 = arith.constant 0 : index
    %c1_62 = arith.constant 1 : index
    %c4_63 = arith.constant 4 : index
    %158 = vector.load %arg4[%c0_60, %c0_61, %c1_62, %c4_63] : memref<2x2x22x22xf32, #tpu.memory_space<vmem>>, vector<2x2x16x16xf32>
    %c11 = arith.constant 11 : index
    %159 = memref.load %arg2[%c11] : memref<98xf32, #tpu.memory_space<smem>>
    %c60 = arith.constant 60 : index
    %160 = memref.load %arg2[%c60] : memref<98xf32, #tpu.memory_space<smem>>
    %161 = vector.extract_strided_slice %158 {offsets = [0, 0, 0, 0], sizes = [1, 2, 16, 16], strides = [1, 1, 1, 1]} : vector<2x2x16x16xf32> to vector<1x2x16x16xf32>
    %162 = vector.shape_cast %161 : vector<1x2x16x16xf32> to vector<2x16x16xf32>
    %163 = vector.broadcast %159 : f32 to vector<2x16x16xf32>
    %164 = arith.mulf %163, %162 : vector<2x16x16xf32>
    %165 = arith.addf %157, %164 : vector<2x16x16xf32>
    %166 = vector.extract_strided_slice %158 {offsets = [1, 0, 0, 0], sizes = [1, 2, 16, 16], strides = [1, 1, 1, 1]} : vector<2x2x16x16xf32> to vector<1x2x16x16xf32>
    %167 = vector.shape_cast %166 : vector<1x2x16x16xf32> to vector<2x16x16xf32>
    %168 = vector.broadcast %160 : f32 to vector<2x16x16xf32>
    %169 = arith.mulf %168, %167 : vector<2x16x16xf32>
    %170 = arith.addf %165, %169 : vector<2x16x16xf32>
    %c0_64 = arith.constant 0 : index
    %c0_65 = arith.constant 0 : index
    %c1_66 = arith.constant 1 : index
    %c5_67 = arith.constant 5 : index
    %171 = vector.load %arg4[%c0_64, %c0_65, %c1_66, %c5_67] : memref<2x2x22x22xf32, #tpu.memory_space<vmem>>, vector<2x2x16x16xf32>
    %c12 = arith.constant 12 : index
    %172 = memref.load %arg2[%c12] : memref<98xf32, #tpu.memory_space<smem>>
    %c61 = arith.constant 61 : index
    %173 = memref.load %arg2[%c61] : memref<98xf32, #tpu.memory_space<smem>>
    %174 = vector.extract_strided_slice %171 {offsets = [0, 0, 0, 0], sizes = [1, 2, 16, 16], strides = [1, 1, 1, 1]} : vector<2x2x16x16xf32> to vector<1x2x16x16xf32>
    %175 = vector.shape_cast %174 : vector<1x2x16x16xf32> to vector<2x16x16xf32>
    %176 = vector.broadcast %172 : f32 to vector<2x16x16xf32>
    %177 = arith.mulf %176, %175 : vector<2x16x16xf32>
    %178 = arith.addf %170, %177 : vector<2x16x16xf32>
    %179 = vector.extract_strided_slice %171 {offsets = [1, 0, 0, 0], sizes = [1, 2, 16, 16], strides = [1, 1, 1, 1]} : vector<2x2x16x16xf32> to vector<1x2x16x16xf32>
    %180 = vector.shape_cast %179 : vector<1x2x16x16xf32> to vector<2x16x16xf32>
    %181 = vector.broadcast %173 : f32 to vector<2x16x16xf32>
    %182 = arith.mulf %181, %180 : vector<2x16x16xf32>
    %183 = arith.addf %178, %182 : vector<2x16x16xf32>
    %c0_68 = arith.constant 0 : index
    %c0_69 = arith.constant 0 : index
    %c1_70 = arith.constant 1 : index
    %c6_71 = arith.constant 6 : index
    %184 = vector.load %arg4[%c0_68, %c0_69, %c1_70, %c6_71] : memref<2x2x22x22xf32, #tpu.memory_space<vmem>>, vector<2x2x16x16xf32>
    %c13 = arith.constant 13 : index
    %185 = memref.load %arg2[%c13] : memref<98xf32, #tpu.memory_space<smem>>
    %c62 = arith.constant 62 : index
    %186 = memref.load %arg2[%c62] : memref<98xf32, #tpu.memory_space<smem>>
    %187 = vector.extract_strided_slice %184 {offsets = [0, 0, 0, 0], sizes = [1, 2, 16, 16], strides = [1, 1, 1, 1]} : vector<2x2x16x16xf32> to vector<1x2x16x16xf32>
    %188 = vector.shape_cast %187 : vector<1x2x16x16xf32> to vector<2x16x16xf32>
    %189 = vector.broadcast %185 : f32 to vector<2x16x16xf32>
    %190 = arith.mulf %189, %188 : vector<2x16x16xf32>
    %191 = arith.addf %183, %190 : vector<2x16x16xf32>
    %192 = vector.extract_strided_slice %184 {offsets = [1, 0, 0, 0], sizes = [1, 2, 16, 16], strides = [1, 1, 1, 1]} : vector<2x2x16x16xf32> to vector<1x2x16x16xf32>
    %193 = vector.shape_cast %192 : vector<1x2x16x16xf32> to vector<2x16x16xf32>
    %194 = vector.broadcast %186 : f32 to vector<2x16x16xf32>
    %195 = arith.mulf %194, %193 : vector<2x16x16xf32>
    %196 = arith.addf %191, %195 : vector<2x16x16xf32>
    %c0_72 = arith.constant 0 : index
    %c0_73 = arith.constant 0 : index
    %c2_74 = arith.constant 2 : index
    %c0_75 = arith.constant 0 : index
    %197 = vector.load %arg4[%c0_72, %c0_73, %c2_74, %c0_75] : memref<2x2x22x22xf32, #tpu.memory_space<vmem>>, vector<2x2x16x16xf32>
    %c14 = arith.constant 14 : index
    %198 = memref.load %arg2[%c14] : memref<98xf32, #tpu.memory_space<smem>>
    %c63 = arith.constant 63 : index
    %199 = memref.load %arg2[%c63] : memref<98xf32, #tpu.memory_space<smem>>
    %200 = vector.extract_strided_slice %197 {offsets = [0, 0, 0, 0], sizes = [1, 2, 16, 16], strides = [1, 1, 1, 1]} : vector<2x2x16x16xf32> to vector<1x2x16x16xf32>
    %201 = vector.shape_cast %200 : vector<1x2x16x16xf32> to vector<2x16x16xf32>
    %202 = vector.broadcast %198 : f32 to vector<2x16x16xf32>
    %203 = arith.mulf %202, %201 : vector<2x16x16xf32>
    %204 = arith.addf %196, %203 : vector<2x16x16xf32>
    %205 = vector.extract_strided_slice %197 {offsets = [1, 0, 0, 0], sizes = [1, 2, 16, 16], strides = [1, 1, 1, 1]} : vector<2x2x16x16xf32> to vector<1x2x16x16xf32>
    %206 = vector.shape_cast %205 : vector<1x2x16x16xf32> to vector<2x16x16xf32>
    %207 = vector.broadcast %199 : f32 to vector<2x16x16xf32>
    %208 = arith.mulf %207, %206 : vector<2x16x16xf32>
    %209 = arith.addf %204, %208 : vector<2x16x16xf32>
    %c0_76 = arith.constant 0 : index
    %c0_77 = arith.constant 0 : index
    %c2_78 = arith.constant 2 : index
    %c1_79 = arith.constant 1 : index
    %210 = vector.load %arg4[%c0_76, %c0_77, %c2_78, %c1_79] : memref<2x2x22x22xf32, #tpu.memory_space<vmem>>, vector<2x2x16x16xf32>
    %c15 = arith.constant 15 : index
    %211 = memref.load %arg2[%c15] : memref<98xf32, #tpu.memory_space<smem>>
    %c64 = arith.constant 64 : index
    %212 = memref.load %arg2[%c64] : memref<98xf32, #tpu.memory_space<smem>>
    %213 = vector.extract_strided_slice %210 {offsets = [0, 0, 0, 0], sizes = [1, 2, 16, 16], strides = [1, 1, 1, 1]} : vector<2x2x16x16xf32> to vector<1x2x16x16xf32>
    %214 = vector.shape_cast %213 : vector<1x2x16x16xf32> to vector<2x16x16xf32>
    %215 = vector.broadcast %211 : f32 to vector<2x16x16xf32>
    %216 = arith.mulf %215, %214 : vector<2x16x16xf32>
    %217 = arith.addf %209, %216 : vector<2x16x16xf32>
    %218 = vector.extract_strided_slice %210 {offsets = [1, 0, 0, 0], sizes = [1, 2, 16, 16], strides = [1, 1, 1, 1]} : vector<2x2x16x16xf32> to vector<1x2x16x16xf32>
    %219 = vector.shape_cast %218 : vector<1x2x16x16xf32> to vector<2x16x16xf32>
    %220 = vector.broadcast %212 : f32 to vector<2x16x16xf32>
    %221 = arith.mulf %220, %219 : vector<2x16x16xf32>
    %222 = arith.addf %217, %221 : vector<2x16x16xf32>
    %c0_80 = arith.constant 0 : index
    %c0_81 = arith.constant 0 : index
    %c2_82 = arith.constant 2 : index
    %c2_83 = arith.constant 2 : index
    %223 = vector.load %arg4[%c0_80, %c0_81, %c2_82, %c2_83] : memref<2x2x22x22xf32, #tpu.memory_space<vmem>>, vector<2x2x16x16xf32>
    %c16 = arith.constant 16 : index
    %224 = memref.load %arg2[%c16] : memref<98xf32, #tpu.memory_space<smem>>
    %c65 = arith.constant 65 : index
    %225 = memref.load %arg2[%c65] : memref<98xf32, #tpu.memory_space<smem>>
    %226 = vector.extract_strided_slice %223 {offsets = [0, 0, 0, 0], sizes = [1, 2, 16, 16], strides = [1, 1, 1, 1]} : vector<2x2x16x16xf32> to vector<1x2x16x16xf32>
    %227 = vector.shape_cast %226 : vector<1x2x16x16xf32> to vector<2x16x16xf32>
    %228 = vector.broadcast %224 : f32 to vector<2x16x16xf32>
    %229 = arith.mulf %228, %227 : vector<2x16x16xf32>
    %230 = arith.addf %222, %229 : vector<2x16x16xf32>
    %231 = vector.extract_strided_slice %223 {offsets = [1, 0, 0, 0], sizes = [1, 2, 16, 16], strides = [1, 1, 1, 1]} : vector<2x2x16x16xf32> to vector<1x2x16x16xf32>
    %232 = vector.shape_cast %231 : vector<1x2x16x16xf32> to vector<2x16x16xf32>
    %233 = vector.broadcast %225 : f32 to vector<2x16x16xf32>
    %234 = arith.mulf %233, %232 : vector<2x16x16xf32>
    %235 = arith.addf %230, %234 : vector<2x16x16xf32>
    %c0_84 = arith.constant 0 : index
    %c0_85 = arith.constant 0 : index
    %c2_86 = arith.constant 2 : index
    %c3_87 = arith.constant 3 : index
    %236 = vector.load %arg4[%c0_84, %c0_85, %c2_86, %c3_87] : memref<2x2x22x22xf32, #tpu.memory_space<vmem>>, vector<2x2x16x16xf32>
    %c17 = arith.constant 17 : index
    %237 = memref.load %arg2[%c17] : memref<98xf32, #tpu.memory_space<smem>>
    %c66 = arith.constant 66 : index
    %238 = memref.load %arg2[%c66] : memref<98xf32, #tpu.memory_space<smem>>
    %239 = vector.extract_strided_slice %236 {offsets = [0, 0, 0, 0], sizes = [1, 2, 16, 16], strides = [1, 1, 1, 1]} : vector<2x2x16x16xf32> to vector<1x2x16x16xf32>
    %240 = vector.shape_cast %239 : vector<1x2x16x16xf32> to vector<2x16x16xf32>
    %241 = vector.broadcast %237 : f32 to vector<2x16x16xf32>
    %242 = arith.mulf %241, %240 : vector<2x16x16xf32>
    %243 = arith.addf %235, %242 : vector<2x16x16xf32>
    %244 = vector.extract_strided_slice %236 {offsets = [1, 0, 0, 0], sizes = [1, 2, 16, 16], strides = [1, 1, 1, 1]} : vector<2x2x16x16xf32> to vector<1x2x16x16xf32>
    %245 = vector.shape_cast %244 : vector<1x2x16x16xf32> to vector<2x16x16xf32>
    %246 = vector.broadcast %238 : f32 to vector<2x16x16xf32>
    %247 = arith.mulf %246, %245 : vector<2x16x16xf32>
    %248 = arith.addf %243, %247 : vector<2x16x16xf32>
    %c0_88 = arith.constant 0 : index
    %c0_89 = arith.constant 0 : index
    %c2_90 = arith.constant 2 : index
    %c4_91 = arith.constant 4 : index
    %249 = vector.load %arg4[%c0_88, %c0_89, %c2_90, %c4_91] : memref<2x2x22x22xf32, #tpu.memory_space<vmem>>, vector<2x2x16x16xf32>
    %c18 = arith.constant 18 : index
    %250 = memref.load %arg2[%c18] : memref<98xf32, #tpu.memory_space<smem>>
    %c67 = arith.constant 67 : index
    %251 = memref.load %arg2[%c67] : memref<98xf32, #tpu.memory_space<smem>>
    %252 = vector.extract_strided_slice %249 {offsets = [0, 0, 0, 0], sizes = [1, 2, 16, 16], strides = [1, 1, 1, 1]} : vector<2x2x16x16xf32> to vector<1x2x16x16xf32>
    %253 = vector.shape_cast %252 : vector<1x2x16x16xf32> to vector<2x16x16xf32>
    %254 = vector.broadcast %250 : f32 to vector<2x16x16xf32>
    %255 = arith.mulf %254, %253 : vector<2x16x16xf32>
    %256 = arith.addf %248, %255 : vector<2x16x16xf32>
    %257 = vector.extract_strided_slice %249 {offsets = [1, 0, 0, 0], sizes = [1, 2, 16, 16], strides = [1, 1, 1, 1]} : vector<2x2x16x16xf32> to vector<1x2x16x16xf32>
    %258 = vector.shape_cast %257 : vector<1x2x16x16xf32> to vector<2x16x16xf32>
    %259 = vector.broadcast %251 : f32 to vector<2x16x16xf32>
    %260 = arith.mulf %259, %258 : vector<2x16x16xf32>
    %261 = arith.addf %256, %260 : vector<2x16x16xf32>
    %c0_92 = arith.constant 0 : index
    %c0_93 = arith.constant 0 : index
    %c2_94 = arith.constant 2 : index
    %c5_95 = arith.constant 5 : index
    %262 = vector.load %arg4[%c0_92, %c0_93, %c2_94, %c5_95] : memref<2x2x22x22xf32, #tpu.memory_space<vmem>>, vector<2x2x16x16xf32>
    %c19 = arith.constant 19 : index
    %263 = memref.load %arg2[%c19] : memref<98xf32, #tpu.memory_space<smem>>
    %c68 = arith.constant 68 : index
    %264 = memref.load %arg2[%c68] : memref<98xf32, #tpu.memory_space<smem>>
    %265 = vector.extract_strided_slice %262 {offsets = [0, 0, 0, 0], sizes = [1, 2, 16, 16], strides = [1, 1, 1, 1]} : vector<2x2x16x16xf32> to vector<1x2x16x16xf32>
    %266 = vector.shape_cast %265 : vector<1x2x16x16xf32> to vector<2x16x16xf32>
    %267 = vector.broadcast %263 : f32 to vector<2x16x16xf32>
    %268 = arith.mulf %267, %266 : vector<2x16x16xf32>
    %269 = arith.addf %261, %268 : vector<2x16x16xf32>
    %270 = vector.extract_strided_slice %262 {offsets = [1, 0, 0, 0], sizes = [1, 2, 16, 16], strides = [1, 1, 1, 1]} : vector<2x2x16x16xf32> to vector<1x2x16x16xf32>
    %271 = vector.shape_cast %270 : vector<1x2x16x16xf32> to vector<2x16x16xf32>
    %272 = vector.broadcast %264 : f32 to vector<2x16x16xf32>
    %273 = arith.mulf %272, %271 : vector<2x16x16xf32>
    %274 = arith.addf %269, %273 : vector<2x16x16xf32>
    %c0_96 = arith.constant 0 : index
    %c0_97 = arith.constant 0 : index
    %c2_98 = arith.constant 2 : index
    %c6_99 = arith.constant 6 : index
    %275 = vector.load %arg4[%c0_96, %c0_97, %c2_98, %c6_99] : memref<2x2x22x22xf32, #tpu.memory_space<vmem>>, vector<2x2x16x16xf32>
    %c20 = arith.constant 20 : index
    %276 = memref.load %arg2[%c20] : memref<98xf32, #tpu.memory_space<smem>>
    %c69 = arith.constant 69 : index
    %277 = memref.load %arg2[%c69] : memref<98xf32, #tpu.memory_space<smem>>
    %278 = vector.extract_strided_slice %275 {offsets = [0, 0, 0, 0], sizes = [1, 2, 16, 16], strides = [1, 1, 1, 1]} : vector<2x2x16x16xf32> to vector<1x2x16x16xf32>
    %279 = vector.shape_cast %278 : vector<1x2x16x16xf32> to vector<2x16x16xf32>
    %280 = vector.broadcast %276 : f32 to vector<2x16x16xf32>
    %281 = arith.mulf %280, %279 : vector<2x16x16xf32>
    %282 = arith.addf %274, %281 : vector<2x16x16xf32>
    %283 = vector.extract_strided_slice %275 {offsets = [1, 0, 0, 0], sizes = [1, 2, 16, 16], strides = [1, 1, 1, 1]} : vector<2x2x16x16xf32> to vector<1x2x16x16xf32>
    %284 = vector.shape_cast %283 : vector<1x2x16x16xf32> to vector<2x16x16xf32>
    %285 = vector.broadcast %277 : f32 to vector<2x16x16xf32>
    %286 = arith.mulf %285, %284 : vector<2x16x16xf32>
    %287 = arith.addf %282, %286 : vector<2x16x16xf32>
    %c0_100 = arith.constant 0 : index
    %c0_101 = arith.constant 0 : index
    %c3_102 = arith.constant 3 : index
    %c0_103 = arith.constant 0 : index
    %288 = vector.load %arg4[%c0_100, %c0_101, %c3_102, %c0_103] : memref<2x2x22x22xf32, #tpu.memory_space<vmem>>, vector<2x2x16x16xf32>
    %c21 = arith.constant 21 : index
    %289 = memref.load %arg2[%c21] : memref<98xf32, #tpu.memory_space<smem>>
    %c70 = arith.constant 70 : index
    %290 = memref.load %arg2[%c70] : memref<98xf32, #tpu.memory_space<smem>>
    %291 = vector.extract_strided_slice %288 {offsets = [0, 0, 0, 0], sizes = [1, 2, 16, 16], strides = [1, 1, 1, 1]} : vector<2x2x16x16xf32> to vector<1x2x16x16xf32>
    %292 = vector.shape_cast %291 : vector<1x2x16x16xf32> to vector<2x16x16xf32>
    %293 = vector.broadcast %289 : f32 to vector<2x16x16xf32>
    %294 = arith.mulf %293, %292 : vector<2x16x16xf32>
    %295 = arith.addf %287, %294 : vector<2x16x16xf32>
    %296 = vector.extract_strided_slice %288 {offsets = [1, 0, 0, 0], sizes = [1, 2, 16, 16], strides = [1, 1, 1, 1]} : vector<2x2x16x16xf32> to vector<1x2x16x16xf32>
    %297 = vector.shape_cast %296 : vector<1x2x16x16xf32> to vector<2x16x16xf32>
    %298 = vector.broadcast %290 : f32 to vector<2x16x16xf32>
    %299 = arith.mulf %298, %297 : vector<2x16x16xf32>
    %300 = arith.addf %295, %299 : vector<2x16x16xf32>
    %c0_104 = arith.constant 0 : index
    %c0_105 = arith.constant 0 : index
    %c3_106 = arith.constant 3 : index
    %c1_107 = arith.constant 1 : index
    %301 = vector.load %arg4[%c0_104, %c0_105, %c3_106, %c1_107] : memref<2x2x22x22xf32, #tpu.memory_space<vmem>>, vector<2x2x16x16xf32>
    %c22 = arith.constant 22 : index
    %302 = memref.load %arg2[%c22] : memref<98xf32, #tpu.memory_space<smem>>
    %c71 = arith.constant 71 : index
    %303 = memref.load %arg2[%c71] : memref<98xf32, #tpu.memory_space<smem>>
    %304 = vector.extract_strided_slice %301 {offsets = [0, 0, 0, 0], sizes = [1, 2, 16, 16], strides = [1, 1, 1, 1]} : vector<2x2x16x16xf32> to vector<1x2x16x16xf32>
    %305 = vector.shape_cast %304 : vector<1x2x16x16xf32> to vector<2x16x16xf32>
    %306 = vector.broadcast %302 : f32 to vector<2x16x16xf32>
    %307 = arith.mulf %306, %305 : vector<2x16x16xf32>
    %308 = arith.addf %300, %307 : vector<2x16x16xf32>
    %309 = vector.extract_strided_slice %301 {offsets = [1, 0, 0, 0], sizes = [1, 2, 16, 16], strides = [1, 1, 1, 1]} : vector<2x2x16x16xf32> to vector<1x2x16x16xf32>
    %310 = vector.shape_cast %309 : vector<1x2x16x16xf32> to vector<2x16x16xf32>
    %311 = vector.broadcast %303 : f32 to vector<2x16x16xf32>
    %312 = arith.mulf %311, %310 : vector<2x16x16xf32>
    %313 = arith.addf %308, %312 : vector<2x16x16xf32>
    %c0_108 = arith.constant 0 : index
    %c0_109 = arith.constant 0 : index
    %c3_110 = arith.constant 3 : index
    %c2_111 = arith.constant 2 : index
    %314 = vector.load %arg4[%c0_108, %c0_109, %c3_110, %c2_111] : memref<2x2x22x22xf32, #tpu.memory_space<vmem>>, vector<2x2x16x16xf32>
    %c23 = arith.constant 23 : index
    %315 = memref.load %arg2[%c23] : memref<98xf32, #tpu.memory_space<smem>>
    %c72 = arith.constant 72 : index
    %316 = memref.load %arg2[%c72] : memref<98xf32, #tpu.memory_space<smem>>
    %317 = vector.extract_strided_slice %314 {offsets = [0, 0, 0, 0], sizes = [1, 2, 16, 16], strides = [1, 1, 1, 1]} : vector<2x2x16x16xf32> to vector<1x2x16x16xf32>
    %318 = vector.shape_cast %317 : vector<1x2x16x16xf32> to vector<2x16x16xf32>
    %319 = vector.broadcast %315 : f32 to vector<2x16x16xf32>
    %320 = arith.mulf %319, %318 : vector<2x16x16xf32>
    %321 = arith.addf %313, %320 : vector<2x16x16xf32>
    %322 = vector.extract_strided_slice %314 {offsets = [1, 0, 0, 0], sizes = [1, 2, 16, 16], strides = [1, 1, 1, 1]} : vector<2x2x16x16xf32> to vector<1x2x16x16xf32>
    %323 = vector.shape_cast %322 : vector<1x2x16x16xf32> to vector<2x16x16xf32>
    %324 = vector.broadcast %316 : f32 to vector<2x16x16xf32>
    %325 = arith.mulf %324, %323 : vector<2x16x16xf32>
    %326 = arith.addf %321, %325 : vector<2x16x16xf32>
    %c0_112 = arith.constant 0 : index
    %c0_113 = arith.constant 0 : index
    %c3_114 = arith.constant 3 : index
    %c3_115 = arith.constant 3 : index
    %327 = vector.load %arg4[%c0_112, %c0_113, %c3_114, %c3_115] : memref<2x2x22x22xf32, #tpu.memory_space<vmem>>, vector<2x2x16x16xf32>
    %c24 = arith.constant 24 : index
    %328 = memref.load %arg2[%c24] : memref<98xf32, #tpu.memory_space<smem>>
    %c73 = arith.constant 73 : index
    %329 = memref.load %arg2[%c73] : memref<98xf32, #tpu.memory_space<smem>>
    %330 = vector.extract_strided_slice %327 {offsets = [0, 0, 0, 0], sizes = [1, 2, 16, 16], strides = [1, 1, 1, 1]} : vector<2x2x16x16xf32> to vector<1x2x16x16xf32>
    %331 = vector.shape_cast %330 : vector<1x2x16x16xf32> to vector<2x16x16xf32>
    %332 = vector.broadcast %328 : f32 to vector<2x16x16xf32>
    %333 = arith.mulf %332, %331 : vector<2x16x16xf32>
    %334 = arith.addf %326, %333 : vector<2x16x16xf32>
    %335 = vector.extract_strided_slice %327 {offsets = [1, 0, 0, 0], sizes = [1, 2, 16, 16], strides = [1, 1, 1, 1]} : vector<2x2x16x16xf32> to vector<1x2x16x16xf32>
    %336 = vector.shape_cast %335 : vector<1x2x16x16xf32> to vector<2x16x16xf32>
    %337 = vector.broadcast %329 : f32 to vector<2x16x16xf32>
    %338 = arith.mulf %337, %336 : vector<2x16x16xf32>
    %339 = arith.addf %334, %338 : vector<2x16x16xf32>
    %c0_116 = arith.constant 0 : index
    %c0_117 = arith.constant 0 : index
    %c3_118 = arith.constant 3 : index
    %c4_119 = arith.constant 4 : index
    %340 = vector.load %arg4[%c0_116, %c0_117, %c3_118, %c4_119] : memref<2x2x22x22xf32, #tpu.memory_space<vmem>>, vector<2x2x16x16xf32>
    %c25 = arith.constant 25 : index
    %341 = memref.load %arg2[%c25] : memref<98xf32, #tpu.memory_space<smem>>
    %c74 = arith.constant 74 : index
    %342 = memref.load %arg2[%c74] : memref<98xf32, #tpu.memory_space<smem>>
    %343 = vector.extract_strided_slice %340 {offsets = [0, 0, 0, 0], sizes = [1, 2, 16, 16], strides = [1, 1, 1, 1]} : vector<2x2x16x16xf32> to vector<1x2x16x16xf32>
    %344 = vector.shape_cast %343 : vector<1x2x16x16xf32> to vector<2x16x16xf32>
    %345 = vector.broadcast %341 : f32 to vector<2x16x16xf32>
    %346 = arith.mulf %345, %344 : vector<2x16x16xf32>
    %347 = arith.addf %339, %346 : vector<2x16x16xf32>
    %348 = vector.extract_strided_slice %340 {offsets = [1, 0, 0, 0], sizes = [1, 2, 16, 16], strides = [1, 1, 1, 1]} : vector<2x2x16x16xf32> to vector<1x2x16x16xf32>
    %349 = vector.shape_cast %348 : vector<1x2x16x16xf32> to vector<2x16x16xf32>
    %350 = vector.broadcast %342 : f32 to vector<2x16x16xf32>
    %351 = arith.mulf %350, %349 : vector<2x16x16xf32>
    %352 = arith.addf %347, %351 : vector<2x16x16xf32>
    %c0_120 = arith.constant 0 : index
    %c0_121 = arith.constant 0 : index
    %c3_122 = arith.constant 3 : index
    %c5_123 = arith.constant 5 : index
    %353 = vector.load %arg4[%c0_120, %c0_121, %c3_122, %c5_123] : memref<2x2x22x22xf32, #tpu.memory_space<vmem>>, vector<2x2x16x16xf32>
    %c26 = arith.constant 26 : index
    %354 = memref.load %arg2[%c26] : memref<98xf32, #tpu.memory_space<smem>>
    %c75 = arith.constant 75 : index
    %355 = memref.load %arg2[%c75] : memref<98xf32, #tpu.memory_space<smem>>
    %356 = vector.extract_strided_slice %353 {offsets = [0, 0, 0, 0], sizes = [1, 2, 16, 16], strides = [1, 1, 1, 1]} : vector<2x2x16x16xf32> to vector<1x2x16x16xf32>
    %357 = vector.shape_cast %356 : vector<1x2x16x16xf32> to vector<2x16x16xf32>
    %358 = vector.broadcast %354 : f32 to vector<2x16x16xf32>
    %359 = arith.mulf %358, %357 : vector<2x16x16xf32>
    %360 = arith.addf %352, %359 : vector<2x16x16xf32>
    %361 = vector.extract_strided_slice %353 {offsets = [1, 0, 0, 0], sizes = [1, 2, 16, 16], strides = [1, 1, 1, 1]} : vector<2x2x16x16xf32> to vector<1x2x16x16xf32>
    %362 = vector.shape_cast %361 : vector<1x2x16x16xf32> to vector<2x16x16xf32>
    %363 = vector.broadcast %355 : f32 to vector<2x16x16xf32>
    %364 = arith.mulf %363, %362 : vector<2x16x16xf32>
    %365 = arith.addf %360, %364 : vector<2x16x16xf32>
    %c0_124 = arith.constant 0 : index
    %c0_125 = arith.constant 0 : index
    %c3_126 = arith.constant 3 : index
    %c6_127 = arith.constant 6 : index
    %366 = vector.load %arg4[%c0_124, %c0_125, %c3_126, %c6_127] : memref<2x2x22x22xf32, #tpu.memory_space<vmem>>, vector<2x2x16x16xf32>
    %c27 = arith.constant 27 : index
    %367 = memref.load %arg2[%c27] : memref<98xf32, #tpu.memory_space<smem>>
    %c76 = arith.constant 76 : index
    %368 = memref.load %arg2[%c76] : memref<98xf32, #tpu.memory_space<smem>>
    %369 = vector.extract_strided_slice %366 {offsets = [0, 0, 0, 0], sizes = [1, 2, 16, 16], strides = [1, 1, 1, 1]} : vector<2x2x16x16xf32> to vector<1x2x16x16xf32>
    %370 = vector.shape_cast %369 : vector<1x2x16x16xf32> to vector<2x16x16xf32>
    %371 = vector.broadcast %367 : f32 to vector<2x16x16xf32>
    %372 = arith.mulf %371, %370 : vector<2x16x16xf32>
    %373 = arith.addf %365, %372 : vector<2x16x16xf32>
    %374 = vector.extract_strided_slice %366 {offsets = [1, 0, 0, 0], sizes = [1, 2, 16, 16], strides = [1, 1, 1, 1]} : vector<2x2x16x16xf32> to vector<1x2x16x16xf32>
    %375 = vector.shape_cast %374 : vector<1x2x16x16xf32> to vector<2x16x16xf32>
    %376 = vector.broadcast %368 : f32 to vector<2x16x16xf32>
    %377 = arith.mulf %376, %375 : vector<2x16x16xf32>
    %378 = arith.addf %373, %377 : vector<2x16x16xf32>
    %c0_128 = arith.constant 0 : index
    %c0_129 = arith.constant 0 : index
    %c4_130 = arith.constant 4 : index
    %c0_131 = arith.constant 0 : index
    %379 = vector.load %arg4[%c0_128, %c0_129, %c4_130, %c0_131] : memref<2x2x22x22xf32, #tpu.memory_space<vmem>>, vector<2x2x16x16xf32>
    %c28 = arith.constant 28 : index
    %380 = memref.load %arg2[%c28] : memref<98xf32, #tpu.memory_space<smem>>
    %c77 = arith.constant 77 : index
    %381 = memref.load %arg2[%c77] : memref<98xf32, #tpu.memory_space<smem>>
    %382 = vector.extract_strided_slice %379 {offsets = [0, 0, 0, 0], sizes = [1, 2, 16, 16], strides = [1, 1, 1, 1]} : vector<2x2x16x16xf32> to vector<1x2x16x16xf32>
    %383 = vector.shape_cast %382 : vector<1x2x16x16xf32> to vector<2x16x16xf32>
    %384 = vector.broadcast %380 : f32 to vector<2x16x16xf32>
    %385 = arith.mulf %384, %383 : vector<2x16x16xf32>
    %386 = arith.addf %378, %385 : vector<2x16x16xf32>
    %387 = vector.extract_strided_slice %379 {offsets = [1, 0, 0, 0], sizes = [1, 2, 16, 16], strides = [1, 1, 1, 1]} : vector<2x2x16x16xf32> to vector<1x2x16x16xf32>
    %388 = vector.shape_cast %387 : vector<1x2x16x16xf32> to vector<2x16x16xf32>
    %389 = vector.broadcast %381 : f32 to vector<2x16x16xf32>
    %390 = arith.mulf %389, %388 : vector<2x16x16xf32>
    %391 = arith.addf %386, %390 : vector<2x16x16xf32>
    %c0_132 = arith.constant 0 : index
    %c0_133 = arith.constant 0 : index
    %c4_134 = arith.constant 4 : index
    %c1_135 = arith.constant 1 : index
    %392 = vector.load %arg4[%c0_132, %c0_133, %c4_134, %c1_135] : memref<2x2x22x22xf32, #tpu.memory_space<vmem>>, vector<2x2x16x16xf32>
    %c29 = arith.constant 29 : index
    %393 = memref.load %arg2[%c29] : memref<98xf32, #tpu.memory_space<smem>>
    %c78 = arith.constant 78 : index
    %394 = memref.load %arg2[%c78] : memref<98xf32, #tpu.memory_space<smem>>
    %395 = vector.extract_strided_slice %392 {offsets = [0, 0, 0, 0], sizes = [1, 2, 16, 16], strides = [1, 1, 1, 1]} : vector<2x2x16x16xf32> to vector<1x2x16x16xf32>
    %396 = vector.shape_cast %395 : vector<1x2x16x16xf32> to vector<2x16x16xf32>
    %397 = vector.broadcast %393 : f32 to vector<2x16x16xf32>
    %398 = arith.mulf %397, %396 : vector<2x16x16xf32>
    %399 = arith.addf %391, %398 : vector<2x16x16xf32>
    %400 = vector.extract_strided_slice %392 {offsets = [1, 0, 0, 0], sizes = [1, 2, 16, 16], strides = [1, 1, 1, 1]} : vector<2x2x16x16xf32> to vector<1x2x16x16xf32>
    %401 = vector.shape_cast %400 : vector<1x2x16x16xf32> to vector<2x16x16xf32>
    %402 = vector.broadcast %394 : f32 to vector<2x16x16xf32>
    %403 = arith.mulf %402, %401 : vector<2x16x16xf32>
    %404 = arith.addf %399, %403 : vector<2x16x16xf32>
    %c0_136 = arith.constant 0 : index
    %c0_137 = arith.constant 0 : index
    %c4_138 = arith.constant 4 : index
    %c2_139 = arith.constant 2 : index
    %405 = vector.load %arg4[%c0_136, %c0_137, %c4_138, %c2_139] : memref<2x2x22x22xf32, #tpu.memory_space<vmem>>, vector<2x2x16x16xf32>
    %c30 = arith.constant 30 : index
    %406 = memref.load %arg2[%c30] : memref<98xf32, #tpu.memory_space<smem>>
    %c79 = arith.constant 79 : index
    %407 = memref.load %arg2[%c79] : memref<98xf32, #tpu.memory_space<smem>>
    %408 = vector.extract_strided_slice %405 {offsets = [0, 0, 0, 0], sizes = [1, 2, 16, 16], strides = [1, 1, 1, 1]} : vector<2x2x16x16xf32> to vector<1x2x16x16xf32>
    %409 = vector.shape_cast %408 : vector<1x2x16x16xf32> to vector<2x16x16xf32>
    %410 = vector.broadcast %406 : f32 to vector<2x16x16xf32>
    %411 = arith.mulf %410, %409 : vector<2x16x16xf32>
    %412 = arith.addf %404, %411 : vector<2x16x16xf32>
    %413 = vector.extract_strided_slice %405 {offsets = [1, 0, 0, 0], sizes = [1, 2, 16, 16], strides = [1, 1, 1, 1]} : vector<2x2x16x16xf32> to vector<1x2x16x16xf32>
    %414 = vector.shape_cast %413 : vector<1x2x16x16xf32> to vector<2x16x16xf32>
    %415 = vector.broadcast %407 : f32 to vector<2x16x16xf32>
    %416 = arith.mulf %415, %414 : vector<2x16x16xf32>
    %417 = arith.addf %412, %416 : vector<2x16x16xf32>
    %c0_140 = arith.constant 0 : index
    %c0_141 = arith.constant 0 : index
    %c4_142 = arith.constant 4 : index
    %c3_143 = arith.constant 3 : index
    %418 = vector.load %arg4[%c0_140, %c0_141, %c4_142, %c3_143] : memref<2x2x22x22xf32, #tpu.memory_space<vmem>>, vector<2x2x16x16xf32>
    %c31 = arith.constant 31 : index
    %419 = memref.load %arg2[%c31] : memref<98xf32, #tpu.memory_space<smem>>
    %c80 = arith.constant 80 : index
    %420 = memref.load %arg2[%c80] : memref<98xf32, #tpu.memory_space<smem>>
    %421 = vector.extract_strided_slice %418 {offsets = [0, 0, 0, 0], sizes = [1, 2, 16, 16], strides = [1, 1, 1, 1]} : vector<2x2x16x16xf32> to vector<1x2x16x16xf32>
    %422 = vector.shape_cast %421 : vector<1x2x16x16xf32> to vector<2x16x16xf32>
    %423 = vector.broadcast %419 : f32 to vector<2x16x16xf32>
    %424 = arith.mulf %423, %422 : vector<2x16x16xf32>
    %425 = arith.addf %417, %424 : vector<2x16x16xf32>
    %426 = vector.extract_strided_slice %418 {offsets = [1, 0, 0, 0], sizes = [1, 2, 16, 16], strides = [1, 1, 1, 1]} : vector<2x2x16x16xf32> to vector<1x2x16x16xf32>
    %427 = vector.shape_cast %426 : vector<1x2x16x16xf32> to vector<2x16x16xf32>
    %428 = vector.broadcast %420 : f32 to vector<2x16x16xf32>
    %429 = arith.mulf %428, %427 : vector<2x16x16xf32>
    %430 = arith.addf %425, %429 : vector<2x16x16xf32>
    %c0_144 = arith.constant 0 : index
    %c0_145 = arith.constant 0 : index
    %c4_146 = arith.constant 4 : index
    %c4_147 = arith.constant 4 : index
    %431 = vector.load %arg4[%c0_144, %c0_145, %c4_146, %c4_147] : memref<2x2x22x22xf32, #tpu.memory_space<vmem>>, vector<2x2x16x16xf32>
    %c32 = arith.constant 32 : index
    %432 = memref.load %arg2[%c32] : memref<98xf32, #tpu.memory_space<smem>>
    %c81 = arith.constant 81 : index
    %433 = memref.load %arg2[%c81] : memref<98xf32, #tpu.memory_space<smem>>
    %434 = vector.extract_strided_slice %431 {offsets = [0, 0, 0, 0], sizes = [1, 2, 16, 16], strides = [1, 1, 1, 1]} : vector<2x2x16x16xf32> to vector<1x2x16x16xf32>
    %435 = vector.shape_cast %434 : vector<1x2x16x16xf32> to vector<2x16x16xf32>
    %436 = vector.broadcast %432 : f32 to vector<2x16x16xf32>
    %437 = arith.mulf %436, %435 : vector<2x16x16xf32>
    %438 = arith.addf %430, %437 : vector<2x16x16xf32>
    %439 = vector.extract_strided_slice %431 {offsets = [1, 0, 0, 0], sizes = [1, 2, 16, 16], strides = [1, 1, 1, 1]} : vector<2x2x16x16xf32> to vector<1x2x16x16xf32>
    %440 = vector.shape_cast %439 : vector<1x2x16x16xf32> to vector<2x16x16xf32>
    %441 = vector.broadcast %433 : f32 to vector<2x16x16xf32>
    %442 = arith.mulf %441, %440 : vector<2x16x16xf32>
    %443 = arith.addf %438, %442 : vector<2x16x16xf32>
    %c0_148 = arith.constant 0 : index
    %c0_149 = arith.constant 0 : index
    %c4_150 = arith.constant 4 : index
    %c5_151 = arith.constant 5 : index
    %444 = vector.load %arg4[%c0_148, %c0_149, %c4_150, %c5_151] : memref<2x2x22x22xf32, #tpu.memory_space<vmem>>, vector<2x2x16x16xf32>
    %c33 = arith.constant 33 : index
    %445 = memref.load %arg2[%c33] : memref<98xf32, #tpu.memory_space<smem>>
    %c82 = arith.constant 82 : index
    %446 = memref.load %arg2[%c82] : memref<98xf32, #tpu.memory_space<smem>>
    %447 = vector.extract_strided_slice %444 {offsets = [0, 0, 0, 0], sizes = [1, 2, 16, 16], strides = [1, 1, 1, 1]} : vector<2x2x16x16xf32> to vector<1x2x16x16xf32>
    %448 = vector.shape_cast %447 : vector<1x2x16x16xf32> to vector<2x16x16xf32>
    %449 = vector.broadcast %445 : f32 to vector<2x16x16xf32>
    %450 = arith.mulf %449, %448 : vector<2x16x16xf32>
    %451 = arith.addf %443, %450 : vector<2x16x16xf32>
    %452 = vector.extract_strided_slice %444 {offsets = [1, 0, 0, 0], sizes = [1, 2, 16, 16], strides = [1, 1, 1, 1]} : vector<2x2x16x16xf32> to vector<1x2x16x16xf32>
    %453 = vector.shape_cast %452 : vector<1x2x16x16xf32> to vector<2x16x16xf32>
    %454 = vector.broadcast %446 : f32 to vector<2x16x16xf32>
    %455 = arith.mulf %454, %453 : vector<2x16x16xf32>
    %456 = arith.addf %451, %455 : vector<2x16x16xf32>
    %c0_152 = arith.constant 0 : index
    %c0_153 = arith.constant 0 : index
    %c4_154 = arith.constant 4 : index
    %c6_155 = arith.constant 6 : index
    %457 = vector.load %arg4[%c0_152, %c0_153, %c4_154, %c6_155] : memref<2x2x22x22xf32, #tpu.memory_space<vmem>>, vector<2x2x16x16xf32>
    %c34 = arith.constant 34 : index
    %458 = memref.load %arg2[%c34] : memref<98xf32, #tpu.memory_space<smem>>
    %c83 = arith.constant 83 : index
    %459 = memref.load %arg2[%c83] : memref<98xf32, #tpu.memory_space<smem>>
    %460 = vector.extract_strided_slice %457 {offsets = [0, 0, 0, 0], sizes = [1, 2, 16, 16], strides = [1, 1, 1, 1]} : vector<2x2x16x16xf32> to vector<1x2x16x16xf32>
    %461 = vector.shape_cast %460 : vector<1x2x16x16xf32> to vector<2x16x16xf32>
    %462 = vector.broadcast %458 : f32 to vector<2x16x16xf32>
    %463 = arith.mulf %462, %461 : vector<2x16x16xf32>
    %464 = arith.addf %456, %463 : vector<2x16x16xf32>
    %465 = vector.extract_strided_slice %457 {offsets = [1, 0, 0, 0], sizes = [1, 2, 16, 16], strides = [1, 1, 1, 1]} : vector<2x2x16x16xf32> to vector<1x2x16x16xf32>
    %466 = vector.shape_cast %465 : vector<1x2x16x16xf32> to vector<2x16x16xf32>
    %467 = vector.broadcast %459 : f32 to vector<2x16x16xf32>
    %468 = arith.mulf %467, %466 : vector<2x16x16xf32>
    %469 = arith.addf %464, %468 : vector<2x16x16xf32>
    %c0_156 = arith.constant 0 : index
    %c0_157 = arith.constant 0 : index
    %c5_158 = arith.constant 5 : index
    %c0_159 = arith.constant 0 : index
    %470 = vector.load %arg4[%c0_156, %c0_157, %c5_158, %c0_159] : memref<2x2x22x22xf32, #tpu.memory_space<vmem>>, vector<2x2x16x16xf32>
    %c35 = arith.constant 35 : index
    %471 = memref.load %arg2[%c35] : memref<98xf32, #tpu.memory_space<smem>>
    %c84 = arith.constant 84 : index
    %472 = memref.load %arg2[%c84] : memref<98xf32, #tpu.memory_space<smem>>
    %473 = vector.extract_strided_slice %470 {offsets = [0, 0, 0, 0], sizes = [1, 2, 16, 16], strides = [1, 1, 1, 1]} : vector<2x2x16x16xf32> to vector<1x2x16x16xf32>
    %474 = vector.shape_cast %473 : vector<1x2x16x16xf32> to vector<2x16x16xf32>
    %475 = vector.broadcast %471 : f32 to vector<2x16x16xf32>
    %476 = arith.mulf %475, %474 : vector<2x16x16xf32>
    %477 = arith.addf %469, %476 : vector<2x16x16xf32>
    %478 = vector.extract_strided_slice %470 {offsets = [1, 0, 0, 0], sizes = [1, 2, 16, 16], strides = [1, 1, 1, 1]} : vector<2x2x16x16xf32> to vector<1x2x16x16xf32>
    %479 = vector.shape_cast %478 : vector<1x2x16x16xf32> to vector<2x16x16xf32>
    %480 = vector.broadcast %472 : f32 to vector<2x16x16xf32>
    %481 = arith.mulf %480, %479 : vector<2x16x16xf32>
    %482 = arith.addf %477, %481 : vector<2x16x16xf32>
    %c0_160 = arith.constant 0 : index
    %c0_161 = arith.constant 0 : index
    %c5_162 = arith.constant 5 : index
    %c1_163 = arith.constant 1 : index
    %483 = vector.load %arg4[%c0_160, %c0_161, %c5_162, %c1_163] : memref<2x2x22x22xf32, #tpu.memory_space<vmem>>, vector<2x2x16x16xf32>
    %c36 = arith.constant 36 : index
    %484 = memref.load %arg2[%c36] : memref<98xf32, #tpu.memory_space<smem>>
    %c85 = arith.constant 85 : index
    %485 = memref.load %arg2[%c85] : memref<98xf32, #tpu.memory_space<smem>>
    %486 = vector.extract_strided_slice %483 {offsets = [0, 0, 0, 0], sizes = [1, 2, 16, 16], strides = [1, 1, 1, 1]} : vector<2x2x16x16xf32> to vector<1x2x16x16xf32>
    %487 = vector.shape_cast %486 : vector<1x2x16x16xf32> to vector<2x16x16xf32>
    %488 = vector.broadcast %484 : f32 to vector<2x16x16xf32>
    %489 = arith.mulf %488, %487 : vector<2x16x16xf32>
    %490 = arith.addf %482, %489 : vector<2x16x16xf32>
    %491 = vector.extract_strided_slice %483 {offsets = [1, 0, 0, 0], sizes = [1, 2, 16, 16], strides = [1, 1, 1, 1]} : vector<2x2x16x16xf32> to vector<1x2x16x16xf32>
    %492 = vector.shape_cast %491 : vector<1x2x16x16xf32> to vector<2x16x16xf32>
    %493 = vector.broadcast %485 : f32 to vector<2x16x16xf32>
    %494 = arith.mulf %493, %492 : vector<2x16x16xf32>
    %495 = arith.addf %490, %494 : vector<2x16x16xf32>
    %c0_164 = arith.constant 0 : index
    %c0_165 = arith.constant 0 : index
    %c5_166 = arith.constant 5 : index
    %c2_167 = arith.constant 2 : index
    %496 = vector.load %arg4[%c0_164, %c0_165, %c5_166, %c2_167] : memref<2x2x22x22xf32, #tpu.memory_space<vmem>>, vector<2x2x16x16xf32>
    %c37 = arith.constant 37 : index
    %497 = memref.load %arg2[%c37] : memref<98xf32, #tpu.memory_space<smem>>
    %c86 = arith.constant 86 : index
    %498 = memref.load %arg2[%c86] : memref<98xf32, #tpu.memory_space<smem>>
    %499 = vector.extract_strided_slice %496 {offsets = [0, 0, 0, 0], sizes = [1, 2, 16, 16], strides = [1, 1, 1, 1]} : vector<2x2x16x16xf32> to vector<1x2x16x16xf32>
    %500 = vector.shape_cast %499 : vector<1x2x16x16xf32> to vector<2x16x16xf32>
    %501 = vector.broadcast %497 : f32 to vector<2x16x16xf32>
    %502 = arith.mulf %501, %500 : vector<2x16x16xf32>
    %503 = arith.addf %495, %502 : vector<2x16x16xf32>
    %504 = vector.extract_strided_slice %496 {offsets = [1, 0, 0, 0], sizes = [1, 2, 16, 16], strides = [1, 1, 1, 1]} : vector<2x2x16x16xf32> to vector<1x2x16x16xf32>
    %505 = vector.shape_cast %504 : vector<1x2x16x16xf32> to vector<2x16x16xf32>
    %506 = vector.broadcast %498 : f32 to vector<2x16x16xf32>
    %507 = arith.mulf %506, %505 : vector<2x16x16xf32>
    %508 = arith.addf %503, %507 : vector<2x16x16xf32>
    %c0_168 = arith.constant 0 : index
    %c0_169 = arith.constant 0 : index
    %c5_170 = arith.constant 5 : index
    %c3_171 = arith.constant 3 : index
    %509 = vector.load %arg4[%c0_168, %c0_169, %c5_170, %c3_171] : memref<2x2x22x22xf32, #tpu.memory_space<vmem>>, vector<2x2x16x16xf32>
    %c38 = arith.constant 38 : index
    %510 = memref.load %arg2[%c38] : memref<98xf32, #tpu.memory_space<smem>>
    %c87 = arith.constant 87 : index
    %511 = memref.load %arg2[%c87] : memref<98xf32, #tpu.memory_space<smem>>
    %512 = vector.extract_strided_slice %509 {offsets = [0, 0, 0, 0], sizes = [1, 2, 16, 16], strides = [1, 1, 1, 1]} : vector<2x2x16x16xf32> to vector<1x2x16x16xf32>
    %513 = vector.shape_cast %512 : vector<1x2x16x16xf32> to vector<2x16x16xf32>
    %514 = vector.broadcast %510 : f32 to vector<2x16x16xf32>
    %515 = arith.mulf %514, %513 : vector<2x16x16xf32>
    %516 = arith.addf %508, %515 : vector<2x16x16xf32>
    %517 = vector.extract_strided_slice %509 {offsets = [1, 0, 0, 0], sizes = [1, 2, 16, 16], strides = [1, 1, 1, 1]} : vector<2x2x16x16xf32> to vector<1x2x16x16xf32>
    %518 = vector.shape_cast %517 : vector<1x2x16x16xf32> to vector<2x16x16xf32>
    %519 = vector.broadcast %511 : f32 to vector<2x16x16xf32>
    %520 = arith.mulf %519, %518 : vector<2x16x16xf32>
    %521 = arith.addf %516, %520 : vector<2x16x16xf32>
    %c0_172 = arith.constant 0 : index
    %c0_173 = arith.constant 0 : index
    %c5_174 = arith.constant 5 : index
    %c4_175 = arith.constant 4 : index
    %522 = vector.load %arg4[%c0_172, %c0_173, %c5_174, %c4_175] : memref<2x2x22x22xf32, #tpu.memory_space<vmem>>, vector<2x2x16x16xf32>
    %c39 = arith.constant 39 : index
    %523 = memref.load %arg2[%c39] : memref<98xf32, #tpu.memory_space<smem>>
    %c88 = arith.constant 88 : index
    %524 = memref.load %arg2[%c88] : memref<98xf32, #tpu.memory_space<smem>>
    %525 = vector.extract_strided_slice %522 {offsets = [0, 0, 0, 0], sizes = [1, 2, 16, 16], strides = [1, 1, 1, 1]} : vector<2x2x16x16xf32> to vector<1x2x16x16xf32>
    %526 = vector.shape_cast %525 : vector<1x2x16x16xf32> to vector<2x16x16xf32>
    %527 = vector.broadcast %523 : f32 to vector<2x16x16xf32>
    %528 = arith.mulf %527, %526 : vector<2x16x16xf32>
    %529 = arith.addf %521, %528 : vector<2x16x16xf32>
    %530 = vector.extract_strided_slice %522 {offsets = [1, 0, 0, 0], sizes = [1, 2, 16, 16], strides = [1, 1, 1, 1]} : vector<2x2x16x16xf32> to vector<1x2x16x16xf32>
    %531 = vector.shape_cast %530 : vector<1x2x16x16xf32> to vector<2x16x16xf32>
    %532 = vector.broadcast %524 : f32 to vector<2x16x16xf32>
    %533 = arith.mulf %532, %531 : vector<2x16x16xf32>
    %534 = arith.addf %529, %533 : vector<2x16x16xf32>
    %c0_176 = arith.constant 0 : index
    %c0_177 = arith.constant 0 : index
    %c5_178 = arith.constant 5 : index
    %c5_179 = arith.constant 5 : index
    %535 = vector.load %arg4[%c0_176, %c0_177, %c5_178, %c5_179] : memref<2x2x22x22xf32, #tpu.memory_space<vmem>>, vector<2x2x16x16xf32>
    %c40 = arith.constant 40 : index
    %536 = memref.load %arg2[%c40] : memref<98xf32, #tpu.memory_space<smem>>
    %c89 = arith.constant 89 : index
    %537 = memref.load %arg2[%c89] : memref<98xf32, #tpu.memory_space<smem>>
    %538 = vector.extract_strided_slice %535 {offsets = [0, 0, 0, 0], sizes = [1, 2, 16, 16], strides = [1, 1, 1, 1]} : vector<2x2x16x16xf32> to vector<1x2x16x16xf32>
    %539 = vector.shape_cast %538 : vector<1x2x16x16xf32> to vector<2x16x16xf32>
    %540 = vector.broadcast %536 : f32 to vector<2x16x16xf32>
    %541 = arith.mulf %540, %539 : vector<2x16x16xf32>
    %542 = arith.addf %534, %541 : vector<2x16x16xf32>
    %543 = vector.extract_strided_slice %535 {offsets = [1, 0, 0, 0], sizes = [1, 2, 16, 16], strides = [1, 1, 1, 1]} : vector<2x2x16x16xf32> to vector<1x2x16x16xf32>
    %544 = vector.shape_cast %543 : vector<1x2x16x16xf32> to vector<2x16x16xf32>
    %545 = vector.broadcast %537 : f32 to vector<2x16x16xf32>
    %546 = arith.mulf %545, %544 : vector<2x16x16xf32>
    %547 = arith.addf %542, %546 : vector<2x16x16xf32>
    %c0_180 = arith.constant 0 : index
    %c0_181 = arith.constant 0 : index
    %c5_182 = arith.constant 5 : index
    %c6_183 = arith.constant 6 : index
    %548 = vector.load %arg4[%c0_180, %c0_181, %c5_182, %c6_183] : memref<2x2x22x22xf32, #tpu.memory_space<vmem>>, vector<2x2x16x16xf32>
    %c41 = arith.constant 41 : index
    %549 = memref.load %arg2[%c41] : memref<98xf32, #tpu.memory_space<smem>>
    %c90 = arith.constant 90 : index
    %550 = memref.load %arg2[%c90] : memref<98xf32, #tpu.memory_space<smem>>
    %551 = vector.extract_strided_slice %548 {offsets = [0, 0, 0, 0], sizes = [1, 2, 16, 16], strides = [1, 1, 1, 1]} : vector<2x2x16x16xf32> to vector<1x2x16x16xf32>
    %552 = vector.shape_cast %551 : vector<1x2x16x16xf32> to vector<2x16x16xf32>
    %553 = vector.broadcast %549 : f32 to vector<2x16x16xf32>
    %554 = arith.mulf %553, %552 : vector<2x16x16xf32>
    %555 = arith.addf %547, %554 : vector<2x16x16xf32>
    %556 = vector.extract_strided_slice %548 {offsets = [1, 0, 0, 0], sizes = [1, 2, 16, 16], strides = [1, 1, 1, 1]} : vector<2x2x16x16xf32> to vector<1x2x16x16xf32>
    %557 = vector.shape_cast %556 : vector<1x2x16x16xf32> to vector<2x16x16xf32>
    %558 = vector.broadcast %550 : f32 to vector<2x16x16xf32>
    %559 = arith.mulf %558, %557 : vector<2x16x16xf32>
    %560 = arith.addf %555, %559 : vector<2x16x16xf32>
    %c0_184 = arith.constant 0 : index
    %c0_185 = arith.constant 0 : index
    %c6_186 = arith.constant 6 : index
    %c0_187 = arith.constant 0 : index
    %561 = vector.load %arg4[%c0_184, %c0_185, %c6_186, %c0_187] : memref<2x2x22x22xf32, #tpu.memory_space<vmem>>, vector<2x2x16x16xf32>
    %c42 = arith.constant 42 : index
    %562 = memref.load %arg2[%c42] : memref<98xf32, #tpu.memory_space<smem>>
    %c91 = arith.constant 91 : index
    %563 = memref.load %arg2[%c91] : memref<98xf32, #tpu.memory_space<smem>>
    %564 = vector.extract_strided_slice %561 {offsets = [0, 0, 0, 0], sizes = [1, 2, 16, 16], strides = [1, 1, 1, 1]} : vector<2x2x16x16xf32> to vector<1x2x16x16xf32>
    %565 = vector.shape_cast %564 : vector<1x2x16x16xf32> to vector<2x16x16xf32>
    %566 = vector.broadcast %562 : f32 to vector<2x16x16xf32>
    %567 = arith.mulf %566, %565 : vector<2x16x16xf32>
    %568 = arith.addf %560, %567 : vector<2x16x16xf32>
    %569 = vector.extract_strided_slice %561 {offsets = [1, 0, 0, 0], sizes = [1, 2, 16, 16], strides = [1, 1, 1, 1]} : vector<2x2x16x16xf32> to vector<1x2x16x16xf32>
    %570 = vector.shape_cast %569 : vector<1x2x16x16xf32> to vector<2x16x16xf32>
    %571 = vector.broadcast %563 : f32 to vector<2x16x16xf32>
    %572 = arith.mulf %571, %570 : vector<2x16x16xf32>
    %573 = arith.addf %568, %572 : vector<2x16x16xf32>
    %c0_188 = arith.constant 0 : index
    %c0_189 = arith.constant 0 : index
    %c6_190 = arith.constant 6 : index
    %c1_191 = arith.constant 1 : index
    %574 = vector.load %arg4[%c0_188, %c0_189, %c6_190, %c1_191] : memref<2x2x22x22xf32, #tpu.memory_space<vmem>>, vector<2x2x16x16xf32>
    %c43 = arith.constant 43 : index
    %575 = memref.load %arg2[%c43] : memref<98xf32, #tpu.memory_space<smem>>
    %c92 = arith.constant 92 : index
    %576 = memref.load %arg2[%c92] : memref<98xf32, #tpu.memory_space<smem>>
    %577 = vector.extract_strided_slice %574 {offsets = [0, 0, 0, 0], sizes = [1, 2, 16, 16], strides = [1, 1, 1, 1]} : vector<2x2x16x16xf32> to vector<1x2x16x16xf32>
    %578 = vector.shape_cast %577 : vector<1x2x16x16xf32> to vector<2x16x16xf32>
    %579 = vector.broadcast %575 : f32 to vector<2x16x16xf32>
    %580 = arith.mulf %579, %578 : vector<2x16x16xf32>
    %581 = arith.addf %573, %580 : vector<2x16x16xf32>
    %582 = vector.extract_strided_slice %574 {offsets = [1, 0, 0, 0], sizes = [1, 2, 16, 16], strides = [1, 1, 1, 1]} : vector<2x2x16x16xf32> to vector<1x2x16x16xf32>
    %583 = vector.shape_cast %582 : vector<1x2x16x16xf32> to vector<2x16x16xf32>
    %584 = vector.broadcast %576 : f32 to vector<2x16x16xf32>
    %585 = arith.mulf %584, %583 : vector<2x16x16xf32>
    %586 = arith.addf %581, %585 : vector<2x16x16xf32>
    %c0_192 = arith.constant 0 : index
    %c0_193 = arith.constant 0 : index
    %c6_194 = arith.constant 6 : index
    %c2_195 = arith.constant 2 : index
    %587 = vector.load %arg4[%c0_192, %c0_193, %c6_194, %c2_195] : memref<2x2x22x22xf32, #tpu.memory_space<vmem>>, vector<2x2x16x16xf32>
    %c44 = arith.constant 44 : index
    %588 = memref.load %arg2[%c44] : memref<98xf32, #tpu.memory_space<smem>>
    %c93 = arith.constant 93 : index
    %589 = memref.load %arg2[%c93] : memref<98xf32, #tpu.memory_space<smem>>
    %590 = vector.extract_strided_slice %587 {offsets = [0, 0, 0, 0], sizes = [1, 2, 16, 16], strides = [1, 1, 1, 1]} : vector<2x2x16x16xf32> to vector<1x2x16x16xf32>
    %591 = vector.shape_cast %590 : vector<1x2x16x16xf32> to vector<2x16x16xf32>
    %592 = vector.broadcast %588 : f32 to vector<2x16x16xf32>
    %593 = arith.mulf %592, %591 : vector<2x16x16xf32>
    %594 = arith.addf %586, %593 : vector<2x16x16xf32>
    %595 = vector.extract_strided_slice %587 {offsets = [1, 0, 0, 0], sizes = [1, 2, 16, 16], strides = [1, 1, 1, 1]} : vector<2x2x16x16xf32> to vector<1x2x16x16xf32>
    %596 = vector.shape_cast %595 : vector<1x2x16x16xf32> to vector<2x16x16xf32>
    %597 = vector.broadcast %589 : f32 to vector<2x16x16xf32>
    %598 = arith.mulf %597, %596 : vector<2x16x16xf32>
    %599 = arith.addf %594, %598 : vector<2x16x16xf32>
    %c0_196 = arith.constant 0 : index
    %c0_197 = arith.constant 0 : index
    %c6_198 = arith.constant 6 : index
    %c3_199 = arith.constant 3 : index
    %600 = vector.load %arg4[%c0_196, %c0_197, %c6_198, %c3_199] : memref<2x2x22x22xf32, #tpu.memory_space<vmem>>, vector<2x2x16x16xf32>
    %c45 = arith.constant 45 : index
    %601 = memref.load %arg2[%c45] : memref<98xf32, #tpu.memory_space<smem>>
    %c94 = arith.constant 94 : index
    %602 = memref.load %arg2[%c94] : memref<98xf32, #tpu.memory_space<smem>>
    %603 = vector.extract_strided_slice %600 {offsets = [0, 0, 0, 0], sizes = [1, 2, 16, 16], strides = [1, 1, 1, 1]} : vector<2x2x16x16xf32> to vector<1x2x16x16xf32>
    %604 = vector.shape_cast %603 : vector<1x2x16x16xf32> to vector<2x16x16xf32>
    %605 = vector.broadcast %601 : f32 to vector<2x16x16xf32>
    %606 = arith.mulf %605, %604 : vector<2x16x16xf32>
    %607 = arith.addf %599, %606 : vector<2x16x16xf32>
    %608 = vector.extract_strided_slice %600 {offsets = [1, 0, 0, 0], sizes = [1, 2, 16, 16], strides = [1, 1, 1, 1]} : vector<2x2x16x16xf32> to vector<1x2x16x16xf32>
    %609 = vector.shape_cast %608 : vector<1x2x16x16xf32> to vector<2x16x16xf32>
    %610 = vector.broadcast %602 : f32 to vector<2x16x16xf32>
    %611 = arith.mulf %610, %609 : vector<2x16x16xf32>
    %612 = arith.addf %607, %611 : vector<2x16x16xf32>
    %c0_200 = arith.constant 0 : index
    %c0_201 = arith.constant 0 : index
    %c6_202 = arith.constant 6 : index
    %c4_203 = arith.constant 4 : index
    %613 = vector.load %arg4[%c0_200, %c0_201, %c6_202, %c4_203] : memref<2x2x22x22xf32, #tpu.memory_space<vmem>>, vector<2x2x16x16xf32>
    %c46 = arith.constant 46 : index
    %614 = memref.load %arg2[%c46] : memref<98xf32, #tpu.memory_space<smem>>
    %c95 = arith.constant 95 : index
    %615 = memref.load %arg2[%c95] : memref<98xf32, #tpu.memory_space<smem>>
    %616 = vector.extract_strided_slice %613 {offsets = [0, 0, 0, 0], sizes = [1, 2, 16, 16], strides = [1, 1, 1, 1]} : vector<2x2x16x16xf32> to vector<1x2x16x16xf32>
    %617 = vector.shape_cast %616 : vector<1x2x16x16xf32> to vector<2x16x16xf32>
    %618 = vector.broadcast %614 : f32 to vector<2x16x16xf32>
    %619 = arith.mulf %618, %617 : vector<2x16x16xf32>
    %620 = arith.addf %612, %619 : vector<2x16x16xf32>
    %621 = vector.extract_strided_slice %613 {offsets = [1, 0, 0, 0], sizes = [1, 2, 16, 16], strides = [1, 1, 1, 1]} : vector<2x2x16x16xf32> to vector<1x2x16x16xf32>
    %622 = vector.shape_cast %621 : vector<1x2x16x16xf32> to vector<2x16x16xf32>
    %623 = vector.broadcast %615 : f32 to vector<2x16x16xf32>
    %624 = arith.mulf %623, %622 : vector<2x16x16xf32>
    %625 = arith.addf %620, %624 : vector<2x16x16xf32>
    %c0_204 = arith.constant 0 : index
    %c0_205 = arith.constant 0 : index
    %c6_206 = arith.constant 6 : index
    %c5_207 = arith.constant 5 : index
    %626 = vector.load %arg4[%c0_204, %c0_205, %c6_206, %c5_207] : memref<2x2x22x22xf32, #tpu.memory_space<vmem>>, vector<2x2x16x16xf32>
    %c47 = arith.constant 47 : index
    %627 = memref.load %arg2[%c47] : memref<98xf32, #tpu.memory_space<smem>>
    %c96 = arith.constant 96 : index
    %628 = memref.load %arg2[%c96] : memref<98xf32, #tpu.memory_space<smem>>
    %629 = vector.extract_strided_slice %626 {offsets = [0, 0, 0, 0], sizes = [1, 2, 16, 16], strides = [1, 1, 1, 1]} : vector<2x2x16x16xf32> to vector<1x2x16x16xf32>
    %630 = vector.shape_cast %629 : vector<1x2x16x16xf32> to vector<2x16x16xf32>
    %631 = vector.broadcast %627 : f32 to vector<2x16x16xf32>
    %632 = arith.mulf %631, %630 : vector<2x16x16xf32>
    %633 = arith.addf %625, %632 : vector<2x16x16xf32>
    %634 = vector.extract_strided_slice %626 {offsets = [1, 0, 0, 0], sizes = [1, 2, 16, 16], strides = [1, 1, 1, 1]} : vector<2x2x16x16xf32> to vector<1x2x16x16xf32>
    %635 = vector.shape_cast %634 : vector<1x2x16x16xf32> to vector<2x16x16xf32>
    %636 = vector.broadcast %628 : f32 to vector<2x16x16xf32>
    %637 = arith.mulf %636, %635 : vector<2x16x16xf32>
    %638 = arith.addf %633, %637 : vector<2x16x16xf32>
    %c0_208 = arith.constant 0 : index
    %c0_209 = arith.constant 0 : index
    %c6_210 = arith.constant 6 : index
    %c6_211 = arith.constant 6 : index
    %639 = vector.load %arg4[%c0_208, %c0_209, %c6_210, %c6_211] : memref<2x2x22x22xf32, #tpu.memory_space<vmem>>, vector<2x2x16x16xf32>
    %c48 = arith.constant 48 : index
    %640 = memref.load %arg2[%c48] : memref<98xf32, #tpu.memory_space<smem>>
    %c97 = arith.constant 97 : index
    %641 = memref.load %arg2[%c97] : memref<98xf32, #tpu.memory_space<smem>>
    %642 = vector.extract_strided_slice %639 {offsets = [0, 0, 0, 0], sizes = [1, 2, 16, 16], strides = [1, 1, 1, 1]} : vector<2x2x16x16xf32> to vector<1x2x16x16xf32>
    %643 = vector.shape_cast %642 : vector<1x2x16x16xf32> to vector<2x16x16xf32>
    %644 = vector.broadcast %640 : f32 to vector<2x16x16xf32>
    %645 = arith.mulf %644, %643 : vector<2x16x16xf32>
    %646 = arith.addf %638, %645 : vector<2x16x16xf32>
    %647 = vector.extract_strided_slice %639 {offsets = [1, 0, 0, 0], sizes = [1, 2, 16, 16], strides = [1, 1, 1, 1]} : vector<2x2x16x16xf32> to vector<1x2x16x16xf32>
    %648 = vector.shape_cast %647 : vector<1x2x16x16xf32> to vector<2x16x16xf32>
    %649 = vector.broadcast %641 : f32 to vector<2x16x16xf32>
    %650 = arith.mulf %649, %648 : vector<2x16x16xf32>
    %651 = arith.addf %646, %650 : vector<2x16x16xf32>
    %cst_212 = arith.constant 0.000000e+00 : f32
    %652 = vector.broadcast %cst_212 : f32 to vector<2x16x16xf32>
    %653 = arith.subf %652, %651 : vector<2x16x16xf32>
    %654 = math.exp %653 : vector<2x16x16xf32>
    %cst_213 = arith.constant 1.000000e+00 : f32
    %655 = vector.broadcast %cst_213 : f32 to vector<2x16x16xf32>
    %656 = arith.addf %655, %654 : vector<2x16x16xf32>
    %657 = tpu.reciprocal %656 {approx = true} : vector<2x16x16xf32> -> vector<2x16x16xf32>
    %c0_214 = arith.constant 0 : index
    %c0_215 = arith.constant 0 : index
    %c0_216 = arith.constant 0 : index
    %658 = vector.load %arg3[%c0_214, %c0_215, %c0_216] : memref<2x16x16xf32, #tpu.memory_space<vmem>>, vector<2x16x16xf32>
    tpu.vector_store %arg3[%c0_214, %c0_215, %c0_216], %657 {strides = array<i32>} : memref<2x16x16xf32, #tpu.memory_space<vmem>>, vector<2x16x16xf32>,
    return
  }
  func.func @transform_0(%arg0: i32) -> (i32, i32, i32, i32) {
    %c0_i32 = arith.constant 0 : i32
    %c0_i32_0 = arith.constant 0 : i32
    %c0_i32_1 = arith.constant 0 : i32
    %c0_i32_2 = arith.constant 0 : i32
    return %arg0, %c0_i32, %c0_i32_0, %c0_i32_1 : i32, i32, i32, i32
  }
  func.func @transform_1(%arg0: i32) -> i32 {
    %c0_i32 = arith.constant 0 : i32
    %c0_i32_0 = arith.constant 0 : i32
    return %c0_i32 : i32
  }
  func.func @transform_2(%arg0: i32) -> (i32, i32, i32) {
    %c0_i32 = arith.constant 0 : i32
    %c0_i32_0 = arith.constant 0 : i32
    %c0_i32_1 = arith.constant 0 : i32
    return %arg0, %c0_i32, %c0_i32_0 : i32, i32, i32
  }
}

</mosaic_0001>

<bundles_post_ra>
// kernel: tpu_custom_call.1
= control target key start
LH: loop header
LB: loop body
LE: loop exit
PB: predicated region body
PF: predicated region fallthrough
CT: control target
= control target key end

     0   :  { %7 = vsyncpa [#allocation4], 0  ;;  %s4367_s0 = inlined_call_operand.hbm [shape: f32[2,4,16,16], index: 0, kind: input, shape index: {}]   ;;  %s4368_s1 = inlined_call_operand.vmem [shape: f32[98], index: 1, kind: input, shape index: {}]   ;;  %s4369_s2 = inlined_call_operand.hbm [shape: f32[2,16,16], index: 2, kind: output, shape index: {}]  }
   0x1   :  { %8 = vsyncpa [#allocation6], 0 }
   0x2   :  { %9 = vsyncpa [#allocation5], 0  ;;  %s2787_s9 = smov [#allocation3]   ;;  %s28_s13 = sshll.u32 %s4368_s1, 4  ;;  %s29_s13 = int_to_ptr.vmem [resolvable:$true] %s28_s13 }
   0x3   :  { %s15_s10 = sshll.u32 %s2787_s9, 4  ;;  %s2725_s16 = scalar_lea.hbm %s4367_s0, 2048  ;;  %s16_s10 = int_to_ptr.vmem [resolvable:$true] %s15_s10 }
   0x4   :  { %p2726_p0 = scmp.ne.s32.totalorder %s4367_s0, %s2725_s16  ;;  %p2729_p1 = scmp.lt.u32.totalorder %s2725_s16, %s4367_s0 }
   0x6   :  { %p2731_p2 = pnand %p2729_p1, %p2726_p0 }
   0x8   :  { %2734 = shalt.err (!%p2731_p2)
}
   0x9   :  { %s2735_s21 = scalar_lea.vmem %s16_s10, 2048  ;;  %p2740_p4 = scmp.lt.s32.totalorder %s16_s10, %s16_s10 }
   0xa   :  { %p2736_p3 = scmp.ne.s32.totalorder %s16_s10, %s2735_s21  ;;  %p2741_p5 = scmp.lt.s32.totalorder %s2735_s21, %s2735_s21 }
   0xc   :  { %p2742_p6 = por %p2741_p5, %p2740_p4 }
   0xe   :  { %p2743_p7 = pnand %p2742_p6, %p2736_p3 }
  0x10   :  { %2746 = shalt.err (!%p2743_p7)
}
  0x11   :  { %s2788_s1 = smov 128   ;;  %s2789_s22 = smov 8  }
  0x12   :  { %21 = dma.hbm_to_vmem [thread:$0]  %s4367_s0, 2048, %s16_s10, [#allocation4], %s2788_s1, %s2788_s1, %s2789_s22  }
  0x13   :  { %s2747_s25 = scalar_lea.vmem %s29_s13, 16  ;;  %p2752_p9 = scmp.lt.s32.totalorder %s29_s13, %s29_s13 }
  0x14   :  { %p2748_p8 = scmp.ne.s32.totalorder %s29_s13, %s2747_s25  ;;  %p2753_p10 = scmp.lt.s32.totalorder %s2747_s25, %s2747_s25 }
  0x16   :  { %p2754_p11 = por %p2753_p10, %p2752_p9 }
  0x18   :  { %p2755_p12 = pnand %p2754_p11, %p2748_p8 }
  0x1a   :  { %2758 = shalt.err (!%p2755_p12)
}
  0x1b   :  { %s2790_s26 = smov [#allocation7]  }
  0x1c   :  { %31 = dma.vmem_to_smem %s29_s13, 16, %s2790_s26, [#allocation6]  }
  0x1d   :  { %2781 = dma.done.wait [#allocation4], 2048  }
  0x1e   :  { %2782 = vsyncadd [#allocation4], 4294965248 }
  0x1f   :  { %2783 = dma.done.wait [#allocation6], 16  }
  0x20   :  { %2784 = vsyncadd [#allocation6], 4294967280 }
  0x21   :  { %38 = sfence }
  0x22   :  { %v58_v0 = vld [vmem:[#allocation3 + $0x8] sm:$0xff]  ;;  %v60_v1 = vld [vmem:[#allocation3 + $0x18] sm:$0xff]  ;;  %vm73_vm0 = vcmask 130048   ;;  %v57_v8 = vld [vmem:[#allocation3] sm:$0xff]  ;;  %s2791_s0 = smov 3   ;;  %vm43_vm1 = vcmask 179200  }
  0x23   :  { %v62_v2 = vld [vmem:[#allocation3 + $0x28] sm:$0xff]  ;;  %v64_v3 = vld [vmem:[#allocation3 + $0x38] sm:$0xff]  ;;  %v82_v4 = vsel %vm73_vm0, %v60_v1, 0.0  ;;  %v114_v6 = vsel %vm73_vm0, %v58_v0, -inf  ;;  %v115_v7 = vsel %vm73_vm0, %v60_v1, -inf  ;;  %v59_v13 = vld [vmem:[#allocation3 + $0x10] sm:$0xff] }
  0x24   :  { %v84_v5 = vsel %vm73_vm0, %v62_v2, 0.0  ;;  %v86_v9 = vsel %vm73_vm0, %v64_v3, 0.0  ;;  %v116_v10 = vmax.f32 %v114_v6, %v115_v7  ;;  %v117_v11 = vsel %vm73_vm0, %v62_v2, -inf  ;;  %v61_v14 = vld [vmem:[#allocation3 + $0x20] sm:$0xff]  ;;  %v63_v15 = vld [vmem:[#allocation3 + $0x30] sm:$0xff]  ;;  %v66_v28 = vld [vmem:[#allocation3 + $0x48] sm:$0xff] }
  0x25   :  { %v119_v12 = vsel %vm73_vm0, %v64_v3, -inf  ;;  %v81_v16 = vsel %vm73_vm0, %v58_v0, 0.0  ;;  %v75_v17 = vsel %vm73_vm0, %v59_v13, 0.0  ;;  %v77_v18 = vsel %vm73_vm0, %v61_v14, 0.0  ;;  %v65_v20 = vld [vmem:[#allocation3 + $0x40] sm:$0xff]  ;;  %v67_v21 = vld [vmem:[#allocation3 + $0x50] sm:$0xff] }
  0x26   :  { %v79_v19 = vsel %vm73_vm0, %v63_v15, 0.0  ;;  %v118_v22 = vmax.f32 %v116_v10, %v117_v11  ;;  %v107_v23 = vsel %vm73_vm0, %v57_v8, -inf  ;;  %v108_v24 = vsel %vm73_vm0, %v59_v13, -inf  ;;  %v69_v26 = vld [vmem:[#allocation3 + $0x60] sm:$0xff]  ;;  %v71_v27 = vld [vmem:[#allocation3 + $0x70] sm:$0xff]  ;;  %v68_v33 = vld [vmem:[#allocation3 + $0x58] sm:$0xff] }
  0x27   :  { %v110_v25 = vsel %vm73_vm0, %v61_v14, -inf  ;;  %v109_v29 = vmax.f32 %v107_v23, %v108_v24  ;;  %v112_v30 = vsel %vm73_vm0, %v63_v15, -inf  ;;  %v74_v31 = vsel %vm73_vm0, %v57_v8, 0.0  ;;  %v70_v34 = vld [vmem:[#allocation3 + $0x68] sm:$0xff]  ;;  %v72_v35 = vld [vmem:[#allocation3 + $0x78] sm:$0xff]  ;;  %s2601_s27 = sld [smem:[#allocation7 + $0x32]] }
  0x28   :  { %v88_v32 = vsel %vm73_vm0, %v65_v20, 0.0  ;;  %v120_v36 = vmax.f32 %v118_v22, %v119_v12  ;;  %v89_v37 = vsel %vm73_vm0, %v67_v21, 0.0  ;;  %v91_v38 = vsel %vm73_vm0, %v69_v26, 0.0  ;;  %s2599_s28 = sld [smem:[#allocation7 + $0x31]]  ;;  %s185_s29 = sld [smem:[#allocation7]] }
  0x29   :  { %v93_v39 = vsel %vm73_vm0, %v71_v27, 0.0  ;;  %v111_v40 = vmax.f32 %v109_v29, %v110_v25  ;;  %v90_v41 = vadd.f32 %v89_v37, %v88_v32  ;;  %v76_v42 = vadd.f32 %v75_v17, %v74_v31  ;;  %s2793_s30 = smov 127   ;;  %s2603_s3 = sld [smem:[#allocation7 + $0x33]] }
  0x2a   :  { %v95_v43 = vsel %vm73_vm0, %v66_v28, 0.0  ;;  %162 = vrot.lane.b32.xlu1 %v120_v36, %s2791_s0  ;;  %v96_v44 = vsel %vm73_vm0, %v68_v33, 0.0  ;;  %v98_v45 = vsel %vm73_vm0, %v70_v34, 0.0  ;;  %v100_v46 = vsel %vm73_vm0, %v72_v35, 0.0  ;;  %s2605_s4 = sld [smem:[#allocation7 + $0x34]]  ;;  %s2794_s5 = smov 126  }
  0x2b   :  { %v83_v47 = vadd.f32 %v82_v4, %v81_v16  ;;  %v113_v48 = vmax.f32 %v111_v40, %v112_v30  ;;  %v92_v49 = vadd.f32 %v91_v38, %v90_v41  ;;  %v78_v50 = vadd.f32 %v77_v18, %v76_v42  ;;  %s2607_s6 = sld [smem:[#allocation7 + $0x35]]  ;;  %s2795_s7 = smov 125  }
  0x2c   :  { %v97_v51 = vadd.f32 %v96_v44, %v95_v43  ;;  %v128_v53 = vsel %vm73_vm0, %v66_v28, -inf  ;;  %v129_v54 = vsel %vm73_vm0, %v68_v33, -inf  ;;  %v131_v55 = vsel %vm73_vm0, %v70_v34, -inf  ;;  %s2609_s8 = sld [smem:[#allocation7 + $0x36]]  ;;  %s2796_s9 = smov 124  }
  0x2d   :  { %v85_v52 = vadd.f32 %v84_v5, %v83_v47  ;;  %160 = vrot.lane.b32.xlu0 %v113_v48, %s2791_s0  ;;  %v94_v56 = vadd.f32 %v93_v39, %v92_v49  ;;  %v80_v57 = vadd.f32 %v79_v19, %v78_v50  ;;  %v130_v59 = vmax.f32 %v128_v53, %v129_v54  ;;  %s2611_s10 = sld [smem:[#allocation7 + $0x37]]  ;;  %s2797_s11 = smov 123  }
  0x2e   :  { %v99_v58 = vadd.f32 %v98_v45, %v97_v51  ;;  %v121_v61 = vsel %vm73_vm0, %v65_v20, -inf  ;;  %v122_v62 = vsel %vm73_vm0, %v67_v21, -inf  ;;  %v124_v4 = vsel %vm73_vm0, %v69_v26, -inf  ;;  %s2615_s12 = sld [smem:[#allocation7 + $0x39]]  ;;  %s2798_s13 = smov 122  }
  0x2f   :  { %v87_v60 = vadd.f32 %v86_v9, %v85_v52  ;;  %v105_v63 = vmul.f32 0.25, %v94_v56  ;;  %v103_v0 = vmul.f32 0.25, %v80_v57  ;;  %v132_v2 = vmax.f32 %v130_v59, %v131_v55  ;;  %s2600_s14 = sld [smem:[#allocation7 + $0x1]]  ;;  %s2602_s15 = sld [smem:[#allocation7 + $0x2]] }
  0x30   :  { %v101_v1 = vadd.f32 %v100_v46, %v99_v58  ;;  %v123_v3 = vmax.f32 %v121_v61, %v122_v62  ;;  %v133_v7 = vsel %vm73_vm0, %v72_v35, -inf  ;;  %v126_v9 = vsel %vm73_vm0, %v71_v27, -inf  ;;  %s2604_s16 = sld [smem:[#allocation7 + $0x3]]  ;;  %s2606_s17 = sld [smem:[#allocation7 + $0x4]] }
  0x31   :  { %143 = vrot.lane.b32.xlu1 %v105_v63, %s2791_s0  ;;  %139 = vrot.lane.b32.xlu0 %v103_v0, %s2791_s0  ;;  %v104_v6 = vmul.f32 0.25, %v87_v60  ;;  %vm46_vm2 = vcmask 177152   ;;  %v2792_v10 = vmov 0.0   ;;  %v134_v11 = vmax.f32 %v132_v2, %v133_v7  ;;  %s2608_s18 = sld [smem:[#allocation7 + $0x5]]  ;;  %s2610_s19 = sld [smem:[#allocation7 + $0x6]] }
  0x32   :  { %v106_v5 = vmul.f32 0.25, %v101_v1  ;;  %v125_v8 = vmax.f32 %v123_v3, %v124_v4  ;;  %52 = vst.msk [vmem:[#allocation2 + $0x38] sm:$0xff] %vm43_vm1, %v2792_v10  ;;  %44 = vst.msk [vmem:[#allocation2] sm:$0xff] %vm43_vm1, %v2792_v10  ;;  %vm151_vm3 = vcmask 154648   ;;  %v232_v17 = vstv %s2601_s27  ;;  %s2614_s20 = sld [smem:[#allocation7 + $0x8]]  ;;  %s2616_s21 = sld [smem:[#allocation7 + $0x9]] }
  0x33   :  { %45 = vst.msk [vmem:[#allocation2 + $0x8] sm:$0xff] %vm43_vm1, %v2792_v10  ;;  %48 = vst.msk [vmem:[#allocation2 + $0x18] sm:$0xff] %vm43_vm1, %v2792_v10  ;;  %v196_v24 = vstv %s2599_s28  ;;  %v187_v25 = vstv %s185_s29  ;;  %v284_v46 = vstv %s2603_s3  ;;  %v336_v53 = vstv %s2605_s4  ;;  %s2617_s23 = sld [smem:[#allocation7 + $0x3a]]  ;;  %s2619_s25 = sld [smem:[#allocation7 + $0x3b]] }
  0x34   :  { %49 = vst.msk [vmem:[#allocation2 + $0x20] sm:$0xff] %vm43_vm1, %v2792_v10  ;;  %51 = vst.msk [vmem:[#allocation2 + $0x30] sm:$0xff] %vm43_vm1, %v2792_v10  ;;  %v127_v12 = vmax.f32 %v125_v8, %v126_v9  ;;  %v388_v58 = vstv %s2607_s6  ;;  %v440_v63 = vstv %s2609_s8  ;;  %v492_v4 = vstv %s2611_s10  ;;  %s2618_s24 = sld [smem:[#allocation7 + $0xa]]  ;;  %s2620_s26 = sld [smem:[#allocation7 + $0xb]] }
  0x35   :  { %54 = vst.msk [vmem:[#allocation2 + $0x48] sm:$0xff] %vm43_vm1, %v2792_v10  ;;  %55 = vst.msk [vmem:[#allocation2 + $0x50] sm:$0xff] %vm43_vm1, %v2792_v10  ;;  %145 = vrot.lane.b32.xlu1 %v106_v5, %s2791_s0  ;;  %141 = vrot.lane.b32.xlu0 %v104_v6, %s2791_s0  ;;  %s2622_s27 = sld [smem:[#allocation7 + $0xc]]  ;;  %s2623_s28 = sld [smem:[#allocation7 + $0x3d]] }
  0x36   :  { %53 = vst.msk [vmem:[#allocation2 + $0x40] sm:$0x3f] %vm46_vm2, %v2792_v10  ;;  %47 = vst.msk [vmem:[#allocation2 + $0x10] sm:$0x3f] %vm46_vm2, %v2792_v10  ;;  %s2624_s29 = sld [smem:[#allocation7 + $0xd]]  ;;  %s2625_s3 = sld [smem:[#allocation7 + $0x3e]] }
  0x37   :  { %50 = vst.msk [vmem:[#allocation2 + $0x28] sm:$0x3f] %vm46_vm2, %v2792_v10  ;;  %56 = vst.msk [vmem:[#allocation2 + $0x58] sm:$0x3f] %vm46_vm2, %v2792_v10  ;;  %v572_v10 = vstv %s2615_s12  ;;  %s2628_s4 = sld [smem:[#allocation7 + $0xf]]  ;;  %s2629_s6 = sld [smem:[#allocation7 + $0x40]] }
  0x38   :  { %s3199_s8 = sld [smem:[#allocation7 + $0x10]]  ;;  %s2612_s10 = sld [smem:[#allocation7 + $0x7]] }
  0x39   :  { %166 = vrot.lane.b32.xlu1 %v134_v11, %s2791_s0  ;;  %164 = vrot.lane.b32.xlu0 %v127_v12, %s2791_s0  ;;  %s2621_s0 = sld [smem:[#allocation7 + $0x3c]]  ;;  %s2631_s12 = sld [smem:[#allocation7 + $0x41]] }
  0x9c   :  { %v163_v13 = vpop.permute.xlu1 %162 }
  0x9d   :  { %174 = vst.msk [vmem:[#allocation2 + $0x3b] sm:$0xff] %vm151_vm3, %v163_v13 }
  0x9f   :  { %v161_v14 = vpop.permute.xlu0 %160 }
  0xa0   :  { %173 = vst.msk [vmem:[#allocation2 + $0x33] sm:$0xff] %vm151_vm3, %v161_v14 }
  0xa3   :  { %v144_v15 = vpop.permute.xlu1 %143  ;;  %v140_v16 = vpop.permute.xlu0 %139 }
  0xa4   :  { %154 = vst.msk [vmem:[#allocation2 + $0x1b] sm:$0xff] %vm151_vm3, %v144_v15  ;;  %152 = vst.msk [vmem:[#allocation2 + $0x3] sm:$0xff] %vm151_vm3, %v140_v16 }
  0xa7   :  { %v2877_v18 = vld [vmem:[#allocation2 + $0x30] sm:$0xff]  ;;  %v2879_v19 = vld [vmem:[#allocation2 + $0x38] sm:$0xff]  ;;  %v146_v20 = vpop.permute.xlu1 %145  ;;  %v142_v21 = vpop.permute.xlu0 %141 }
  0xa8   :  { %155 = vst.msk [vmem:[#allocation2 + $0x23] sm:$0xff] %vm151_vm3, %v146_v20  ;;  %153 = vst.msk [vmem:[#allocation2 + $0xb] sm:$0xff] %vm151_vm3, %v142_v21  ;;  %v234_v22 = vmul.f32 %v232_v17, %v2879_v19  ;;  %v233_v23 = vmul.f32 %v232_v17, %v2877_v18  ;;  %v197_v29 = vmul.f32 %v196_v24, %v2877_v18  ;;  %v2949_v8 = vld [vmem:[#allocation2 + $0x39] sm:$0xff]  ;;  %v2952_v11 = vld [vmem:[#allocation2 + $0x31] sm:$0xff] }
  0xa9   :  { %v198_v34 = vmul.f32 %v196_v24, %v2879_v19  ;;  %v286_v49 = vmul.f32 %v284_v46, %v2879_v19  ;;  %v285_v50 = vmul.f32 %v284_v46, %v2877_v18  ;;  %v338_v54 = vmul.f32 %v336_v53, %v2879_v19 }
  0xaa   :  { %243 = vrot.lane.b32.xlu1 %v234_v22, %s2793_s30  ;;  %241 = vrot.lane.b32.xlu0 %v233_v23, %s2793_s30  ;;  %v337_v55 = vmul.f32 %v336_v53, %v2877_v18  ;;  %v390_v59 = vmul.f32 %v388_v58, %v2879_v19  ;;  %v389_v60 = vmul.f32 %v388_v58, %v2877_v18  ;;  %v259_v23 = vstv %s2602_s15  ;;  %s3232_s15 = sld [smem:[#allocation7 + $0x11]] }
  0xab   :  { %v167_v26 = vpop.permute.xlu1 %166  ;;  %v165_v27 = vpop.permute.xlu0 %164  ;;  %v2887_v28 = vld [vmem:[#allocation2] sm:$0xff]  ;;  %v2895_v32 = vld [vmem:[#allocation2 + $0x18] sm:$0xff]  ;;  %v442_v0 = vmul.f32 %v440_v63, %v2879_v19  ;;  %v441_v1 = vmul.f32 %v440_v63, %v2877_v18  ;;  %v494_v5 = vmul.f32 %v492_v4, %v2879_v19  ;;  %v493_v6 = vmul.f32 %v492_v4, %v2877_v18 }
  0xac   :  { %176 = vst.msk [vmem:[#allocation2 + $0x53] sm:$0xff] %vm151_vm3, %v167_v26  ;;  %175 = vst.msk [vmem:[#allocation2 + $0x4b] sm:$0xff] %vm151_vm3, %v165_v27  ;;  %v188_v30 = vmul.f32 %v187_v25, %v2887_v28  ;;  %v190_v37 = vmul.f32 %v187_v25, %v2895_v32  ;;  %v574_v12 = vmul.f32 %v572_v10, %v2949_v8  ;;  %v207_v18 = vstv %s2600_s14  ;;  %s2613_s14 = sld [smem:[#allocation7 + $0x38]] }
  0xad   :  { %v573_v14 = vmul.f32 %v572_v10, %v2952_v11  ;;  %v208_v20 = vmul.f32 %v207_v18, %v2887_v28  ;;  %v210_v22 = vmul.f32 %v207_v18, %v2895_v32  ;;  %v262_v27 = vmul.f32 %v259_v23, %v2895_v32 }
  0xae   :  { %v2893_v31 = vadd.f32 %v197_v29, %v188_v30  ;;  %v311_v29 = vstv %s2604_s16  ;;  %s2633_s16 = sld [smem:[#allocation7 + $0x42]] }
  0xaf   :  { %v2897_v33 = vld [vmem:[#allocation2 + $0x8] sm:$0xff]  ;;  %v2900_v35 = vld [vmem:[#allocation2 + $0x20] sm:$0xff] }
  0xb0   :  { %v189_v36 = vmul.f32 %v187_v25, %v2897_v33  ;;  %v191_v41 = vmul.f32 %v187_v25, %v2900_v35  ;;  %v209_v19 = vmul.f32 %v207_v18, %v2897_v33  ;;  %v211_v21 = vmul.f32 %v207_v18, %v2900_v35 }
  0xb1   :  { %v260_v25 = vmul.f32 %v259_v23, %v2887_v28  ;;  %v263_v26 = vmul.f32 %v259_v23, %v2900_v35  ;;  %v313_v30 = vmul.f32 %v311_v29, %v2897_v33 }
  0xb2   :  { %v2904_v38 = vadd.f32 %v198_v34, %v189_v36  ;;  %v312_v34 = vmul.f32 %v311_v29, %v2887_v28  ;;  %v315_v36 = vmul.f32 %v311_v29, %v2900_v35 }
  0xb3   :  { %v2906_v39 = vld [vmem:[#allocation2 + $0x48] sm:$0xff]  ;;  %v184_v40 = vld [vmem:[#allocation2 + $0x50] sm:$0xff] }
  0xb4   :  { %v199_v42 = vmul.f32 %v196_v24, %v2906_v39  ;;  %v200_v43 = vmul.f32 %v196_v24, %v184_v40  ;;  %v236_v44 = vmul.f32 %v232_v17, %v184_v40  ;;  %v235_v45 = vmul.f32 %v232_v17, %v2906_v39  ;;  %v2957_v13 = vld [vmem:[#allocation2 + $0x51] sm:$0xff]  ;;  %v2960_v15 = vld [vmem:[#allocation2 + $0x49] sm:$0xff] }
  0xb5   :  { %v288_v51 = vmul.f32 %v284_v46, %v184_v40  ;;  %v287_v52 = vmul.f32 %v284_v46, %v2906_v39  ;;  %v340_v56 = vmul.f32 %v336_v53, %v184_v40  ;;  %v339_v57 = vmul.f32 %v336_v53, %v2906_v39 }
  0xb6   :  { %v2911_v47 = vadd.f32 %v199_v42, %v190_v37  ;;  %v2913_v48 = vadd.f32 %v200_v43, %v191_v41  ;;  %247 = vrot.lane.b32.xlu1 %v236_v44, %s2793_s30  ;;  %245 = vrot.lane.b32.xlu0 %v235_v45, %s2793_s30  ;;  %v392_v61 = vmul.f32 %v388_v58, %v184_v40  ;;  %v415_v44 = vstv %s2608_s18  ;;  %s2635_s18 = sld [smem:[#allocation7 + $0x43]] }
  0xb7   :  { %v391_v62 = vmul.f32 %v388_v58, %v2906_v39  ;;  %v444_v2 = vmul.f32 %v440_v63, %v184_v40  ;;  %v443_v3 = vmul.f32 %v440_v63, %v2906_v39  ;;  %v496_v7 = vmul.f32 %v492_v4, %v184_v40 }
  0xb8   :  { %v495_v9 = vmul.f32 %v492_v4, %v2906_v39  ;;  %v576_v16 = vmul.f32 %v572_v10, %v2957_v13  ;;  %v575_v17 = vmul.f32 %v572_v10, %v2960_v15  ;;  %v261_v24 = vmul.f32 %v259_v23, %v2897_v33 }
  0xb9   :  { %v314_v37 = vmul.f32 %v311_v29, %v2895_v32  ;;  %v363_v39 = vstv %s2606_s17  ;;  %v417_v45 = vmul.f32 %v415_v44, %v2897_v33  ;;  %v416_v46 = vmul.f32 %v415_v44, %v2887_v28  ;;  %s2634_s17 = sld [smem:[#allocation7 + $0x12]] }
  0xba   :  { %295 = vrot.lane.b32.xlu1 %v286_v49, %s2794_s5  ;;  %293 = vrot.lane.b32.xlu0 %v285_v50, %s2794_s5  ;;  %v365_v40 = vmul.f32 %v363_v39, %v2897_v33  ;;  %v364_v41 = vmul.f32 %v363_v39, %v2887_v28  ;;  %v367_v42 = vmul.f32 %v363_v39, %v2900_v35  ;;  %v547_v58 = vstv %s2614_s20  ;;  %s2637_s20 = sld [smem:[#allocation7 + $0x44]] }
  0xbb   :  { %v366_v43 = vmul.f32 %v363_v39, %v2895_v32  ;;  %v419_v49 = vmul.f32 %v415_v44, %v2900_v35  ;;  %v418_v50 = vmul.f32 %v415_v44, %v2895_v32  ;;  %v624_v4 = vstv %s2617_s23  ;;  %s2639_s23 = sld [smem:[#allocation7 + $0x45]] }
  0xbe   :  { %299 = vrot.lane.b32.xlu1 %v288_v51, %s2794_s5  ;;  %297 = vrot.lane.b32.xlu0 %v287_v52, %s2794_s5  ;;  %v467_v51 = vstv %s2610_s19  ;;  %s2636_s19 = sld [smem:[#allocation7 + $0x13]] }
  0xbf   :  { %v469_v52 = vmul.f32 %v467_v51, %v2897_v33  ;;  %v468_v53 = vmul.f32 %v467_v51, %v2887_v28  ;;  %v3021_v33 = vld [vmem:[#allocation2 + $0x21] sm:$0xff] }
  0xc2   :  { %347 = vrot.lane.b32.xlu1 %v338_v54, %s2795_s7  ;;  %345 = vrot.lane.b32.xlu0 %v337_v55, %s2795_s7  ;;  %v471_v54 = vmul.f32 %v467_v51, %v2900_v35  ;;  %v3013_v55 = vld [vmem:[#allocation2 + $0x9] sm:$0xff] }
  0xc3   :  { %v549_v28 = vmul.f32 %v547_v58, %v3013_v55 }
  0xc6   :  { %351 = vrot.lane.b32.xlu1 %v340_v56, %s2795_s7  ;;  %349 = vrot.lane.b32.xlu0 %v339_v57, %s2795_s7  ;;  %v470_v56 = vmul.f32 %v467_v51, %v2895_v32  ;;  %v3016_v57 = vld [vmem:[#allocation2 + $0x1] sm:$0xff]  ;;  %v551_v32 = vmul.f32 %v547_v58, %v3021_v33 }
  0xca   :  { %399 = vrot.lane.b32.xlu1 %v390_v59, %s2796_s9  ;;  %397 = vrot.lane.b32.xlu0 %v389_v60, %s2796_s9  ;;  %v548_v59 = vmul.f32 %v547_v58, %v3016_v57  ;;  %v3024_v60 = vld [vmem:[#allocation2 + $0x19] sm:$0xff] }
  0xcb   :  { %v550_v35 = vmul.f32 %v547_v58, %v3024_v60 }
  0xce   :  { %403 = vrot.lane.b32.xlu1 %v392_v61, %s2796_s9  ;;  %401 = vrot.lane.b32.xlu0 %v391_v62, %s2796_s9  ;;  %v599_v61 = vstv %s2616_s21  ;;  %s2638_s21 = sld [smem:[#allocation7 + $0x14]] }
  0xcf   :  { %v601_v62 = vmul.f32 %v599_v61, %v3013_v55  ;;  %v600_v63 = vmul.f32 %v599_v61, %v3016_v57 }
  0xd2   :  { %451 = vrot.lane.b32.xlu1 %v442_v0, %s2797_s11  ;;  %449 = vrot.lane.b32.xlu0 %v441_v1, %s2797_s11  ;;  %v603_v1 = vmul.f32 %v599_v61, %v3021_v33 }
  0xd6   :  { %455 = vrot.lane.b32.xlu1 %v444_v2, %s2797_s11  ;;  %453 = vrot.lane.b32.xlu0 %v443_v3, %s2797_s11  ;;  %v602_v3 = vmul.f32 %v599_v61, %v3024_v60  ;;  %v755_v61 = vstv %s2622_s27  ;;  %s3452_s27 = sld [smem:[#allocation7 + $0x17]] }
  0xda   :  { %503 = vrot.lane.b32.xlu1 %v494_v5, %s2798_s13  ;;  %501 = vrot.lane.b32.xlu0 %v493_v6, %s2798_s13  ;;  %v626_v6 = vmul.f32 %v624_v4, %v2949_v8 }
  0xde   :  { %507 = vrot.lane.b32.xlu1 %v496_v7, %s2798_s13  ;;  %505 = vrot.lane.b32.xlu0 %v495_v9, %s2798_s13  ;;  %v625_v9 = vmul.f32 %v624_v4, %v2952_v11 }
  0xe2   :  { %583 = vrot.lane.b32.xlu1 %v574_v12, %s2793_s30  ;;  %581 = vrot.lane.b32.xlu0 %v573_v14, %s2793_s30  ;;  %v628_v12 = vmul.f32 %v624_v4, %v2957_v13 }
  0xe6   :  { %587 = vrot.lane.b32.xlu1 %v576_v16, %s2793_s30  ;;  %585 = vrot.lane.b32.xlu0 %v575_v17, %s2793_s30  ;;  %v627_v16 = vmul.f32 %v624_v4, %v2960_v15  ;;  %v651_v17 = vstv %s2618_s24  ;;  %s2642_s24 = sld [smem:[#allocation7 + $0x16]] }
  0xe7   :  { %v655_v23 = vmul.f32 %v651_v17, %v3021_v33 }
  0xea   :  { %218 = vrot.lane.b32.xlu1 %v209_v19, %s2793_s30  ;;  %216 = vrot.lane.b32.xlu0 %v208_v20, %s2793_s30  ;;  %v653_v19 = vmul.f32 %v651_v17, %v3013_v55 }
  0xee   :  { %222 = vrot.lane.b32.xlu1 %v211_v21, %s2793_s30  ;;  %220 = vrot.lane.b32.xlu0 %v210_v22, %s2793_s30  ;;  %v652_v21 = vmul.f32 %v651_v17, %v3016_v57 }
  0xf2   :  { %270 = vrot.lane.b32.xlu1 %v261_v24, %s2794_s5  ;;  %268 = vrot.lane.b32.xlu0 %v260_v25, %s2794_s5  ;;  %v654_v25 = vmul.f32 %v651_v17, %v3024_v60 }
  0xf6   :  { %274 = vrot.lane.b32.xlu1 %v263_v26, %s2794_s5  ;;  %272 = vrot.lane.b32.xlu0 %v262_v27, %s2794_s5  ;;  %v676_v26 = vstv %s2619_s25  ;;  %s3408_s25 = sld [smem:[#allocation7 + $0x47]] }
  0xf7   :  { %v678_v29 = vmul.f32 %v676_v26, %v2949_v8 }
  0xfa   :  { %322 = vrot.lane.b32.xlu1 %v313_v30, %s2795_s7  ;;  %320 = vrot.lane.b32.xlu0 %v312_v34, %s2795_s7  ;;  %v677_v34 = vmul.f32 %v676_v26, %v2952_v11 }
  0xfe   :  { %326 = vrot.lane.b32.xlu1 %v315_v36, %s2795_s7  ;;  %324 = vrot.lane.b32.xlu0 %v314_v37, %s2795_s7  ;;  %v680_v37 = vmul.f32 %v676_v26, %v2957_v13 }
 0x102   :  { %374 = vrot.lane.b32.xlu1 %v365_v40, %s2796_s9  ;;  %372 = vrot.lane.b32.xlu0 %v364_v41, %s2796_s9  ;;  %v679_v40 = vmul.f32 %v676_v26, %v2960_v15  ;;  %v703_v41 = vstv %s2620_s26  ;;  %s3431_s26 = sld [smem:[#allocation7 + $0xe]] }
 0x103   :  { %v706_v51 = vmul.f32 %v703_v41, %v3024_v60 }
 0x106   :  { %378 = vrot.lane.b32.xlu1 %v367_v42, %s2796_s9  ;;  %376 = vrot.lane.b32.xlu0 %v366_v43, %s2796_s9  ;;  %v705_v43 = vmul.f32 %v703_v41, %v3013_v55 }
 0x10a   :  { %426 = vrot.lane.b32.xlu1 %v417_v45, %s2797_s11  ;;  %424 = vrot.lane.b32.xlu0 %v416_v46, %s2797_s11  ;;  %v704_v45 = vmul.f32 %v703_v41, %v3016_v57 }
 0x10e   :  { %430 = vrot.lane.b32.xlu1 %v419_v49, %s2797_s11  ;;  %428 = vrot.lane.b32.xlu0 %v418_v50, %s2797_s11  ;;  %v707_v49 = vmul.f32 %v703_v41, %v3021_v33 }
 0x112   :  { %478 = vrot.lane.b32.xlu1 %v469_v52, %s2798_s13  ;;  %476 = vrot.lane.b32.xlu0 %v468_v53, %s2798_s13  ;;  %v728_v52 = vstv %s2621_s0  ;;  %s3436_s0 = sld [smem:[#allocation7 + $0x3f]] }
 0x113   :  { %v729_v58 = vmul.f32 %v728_v52, %v2952_v11 }
 0x116   :  { %482 = vrot.lane.b32.xlu1 %v471_v54, %s2798_s13  ;;  %480 = vrot.lane.b32.xlu0 %v470_v56, %s2798_s13  ;;  %v730_v54 = vmul.f32 %v728_v52, %v2949_v8 }
 0x11a   :  { %558 = vrot.lane.b32.xlu1 %v549_v28, %s2793_s30  ;;  %556 = vrot.lane.b32.xlu0 %v548_v59, %s2793_s30  ;;  %v732_v59 = vmul.f32 %v728_v52, %v2957_v13 }
 0x11c   :  { %v3036_v0 = vpop.permute.xlu1 %243  ;;  %v3039_v2 = vpop.permute.xlu0 %241 }
 0x11e   :  { %562 = vrot.lane.b32.xlu1 %v551_v32, %s2793_s30  ;;  %560 = vrot.lane.b32.xlu0 %v550_v35, %s2793_s30  ;;  %v731_v35 = vmul.f32 %v728_v52, %v2960_v15 }
 0x122   :  { %610 = vrot.lane.b32.xlu1 %v601_v62, %s2794_s5  ;;  %608 = vrot.lane.b32.xlu0 %v600_v63, %s2794_s5  ;;  %v757_v63 = vmul.f32 %v755_v61, %v3013_v55 }
 0x126   :  { %614 = vrot.lane.b32.xlu1 %v603_v1, %s2794_s5  ;;  %612 = vrot.lane.b32.xlu0 %v602_v3, %s2794_s5  ;;  %v756_v3 = vmul.f32 %v755_v61, %v3016_v57 }
 0x128   :  { %v3044_v5 = vpop.permute.xlu1 %247  ;;  %v3047_v7 = vpop.permute.xlu0 %245 }
 0x12a   :  { %635 = vrot.lane.b32.xlu1 %v626_v6, %s2794_s5  ;;  %633 = vrot.lane.b32.xlu0 %v625_v9, %s2794_s5  ;;  %v759_v6 = vmul.f32 %v755_v61, %v3021_v33 }
 0x12c   :  { %v3052_v10 = vpop.permute.xlu1 %295  ;;  %v3055_v14 = vpop.permute.xlu0 %293 }
 0x12e   :  { %639 = vrot.lane.b32.xlu1 %v628_v12, %s2794_s5  ;;  %637 = vrot.lane.b32.xlu0 %v627_v16, %s2794_s5  ;;  %v758_v12 = vmul.f32 %v755_v61, %v3024_v60  ;;  %v780_v16 = vstv %s2623_s28  ;;  %s3476_s28 = sld [smem:[#allocation7 + $0x48]] }
 0x12f   :  { %v784_v26 = vmul.f32 %v780_v16, %v2957_v13 }
 0x130   :  { %v3060_v18 = vpop.permute.xlu1 %299  ;;  %v3063_v20 = vpop.permute.xlu0 %297 }
 0x132   :  { %662 = vrot.lane.b32.xlu1 %v653_v19, %s2795_s7  ;;  %660 = vrot.lane.b32.xlu0 %v652_v21, %s2795_s7  ;;  %v782_v19 = vmul.f32 %v780_v16, %v2949_v8 }
 0x134   :  { %v3068_v22 = vpop.permute.xlu1 %347  ;;  %v3071_v24 = vpop.permute.xlu0 %345 }
 0x136   :  { %666 = vrot.lane.b32.xlu1 %v655_v23, %s2795_s7  ;;  %664 = vrot.lane.b32.xlu0 %v654_v25, %s2795_s7  ;;  %v781_v23 = vmul.f32 %v780_v16, %v2952_v11 }
 0x138   :  { %v3076_v27 = vpop.permute.xlu1 %351  ;;  %v3079_v30 = vpop.permute.xlu0 %349 }
 0x13a   :  { %687 = vrot.lane.b32.xlu1 %v678_v29, %s2795_s7  ;;  %685 = vrot.lane.b32.xlu0 %v677_v34, %s2795_s7  ;;  %v783_v34 = vmul.f32 %v780_v16, %v2960_v15 }
 0x13c   :  { %v3084_v36 = vpop.permute.xlu1 %399  ;;  %v3087_v39 = vpop.permute.xlu0 %397 }
 0x13e   :  { %691 = vrot.lane.b32.xlu1 %v680_v37, %s2795_s7  ;;  %689 = vrot.lane.b32.xlu0 %v679_v40, %s2795_s7  ;;  %v807_v37 = vstv %s2624_s29  ;;  %s2646_s29 = sld [smem:[#allocation7 + $0x18]] }
 0x13f   :  { %v809_v41 = vmul.f32 %v807_v37, %v3013_v55 }
 0x140   :  { %v3092_v42 = vpop.permute.xlu1 %403  ;;  %v3095_v44 = vpop.permute.xlu0 %401 }
 0x142   :  { %714 = vrot.lane.b32.xlu1 %v705_v43, %s2796_s9  ;;  %712 = vrot.lane.b32.xlu0 %v704_v45, %s2796_s9  ;;  %v808_v45 = vmul.f32 %v807_v37, %v3016_v57 }
 0x144   :  { %v3100_v46 = vpop.permute.xlu1 %451  ;;  %v3103_v50 = vpop.permute.xlu0 %449 }
 0x146   :  { %718 = vrot.lane.b32.xlu1 %v707_v49, %s2796_s9  ;;  %716 = vrot.lane.b32.xlu0 %v706_v51, %s2796_s9  ;;  %v811_v51 = vmul.f32 %v807_v37, %v3021_v33 }
 0x148   :  { %v3108_v53 = vpop.permute.xlu1 %455  ;;  %v3111_v56 = vpop.permute.xlu0 %453 }
 0x14a   :  { %739 = vrot.lane.b32.xlu1 %v730_v54, %s2796_s9  ;;  %737 = vrot.lane.b32.xlu0 %v729_v58, %s2796_s9  ;;  %v810_v54 = vmul.f32 %v807_v37, %v3024_v60  ;;  %v832_v58 = vstv %s2625_s3  ;;  %v3174_v37 = vld [vmem:[#allocation2 + $0x2] sm:$0xff]  ;;  %s2647_s3 = sld [smem:[#allocation7 + $0x49]] }
 0x14c   :  { %v3116_v28 = vpop.permute.xlu1 %503  ;;  %v3119_v32 = vpop.permute.xlu0 %501 }
 0x14e   :  { %743 = vrot.lane.b32.xlu1 %v732_v59, %s2796_s9  ;;  %741 = vrot.lane.b32.xlu0 %v731_v35, %s2796_s9 }
 0x150   :  { %v3124_v62 = vpop.permute.xlu1 %507  ;;  %v3127_v1 = vpop.permute.xlu0 %505 }
 0x152   :  { %766 = vrot.lane.b32.xlu1 %v757_v63, %s2797_s11  ;;  %764 = vrot.lane.b32.xlu0 %v756_v3, %s2797_s11  ;;  %v834_v63 = vmul.f32 %v832_v58, %v2949_v8 }
 0x154   :  { %v3132_v4 = vpop.permute.xlu1 %583  ;;  %v3135_v9 = vpop.permute.xlu0 %581 }
 0x156   :  { %770 = vrot.lane.b32.xlu1 %v759_v6, %s2797_s11  ;;  %768 = vrot.lane.b32.xlu0 %v758_v12, %s2797_s11  ;;  %v833_v6 = vmul.f32 %v832_v58, %v2952_v11 }
 0x158   :  { %v3140_v17 = vpop.permute.xlu1 %587  ;;  %v3143_v21 = vpop.permute.xlu0 %585 }
 0x15a   :  { %791 = vrot.lane.b32.xlu1 %v782_v19, %s2797_s11  ;;  %789 = vrot.lane.b32.xlu0 %v781_v23, %s2797_s11 }
 0x15c   :  { %v219_v25 = vpop.permute.xlu1 %218  ;;  %v217_v29 = vpop.permute.xlu0 %216 }
 0x15d   :  { %v229_v59 = vadd.f32 %v219_v25, %v2904_v38  ;;  %v228_v35 = vadd.f32 %v217_v29, %v2893_v31  ;;  %v836_v31 = vmul.f32 %v832_v58, %v2957_v13  ;;  %v3171_v25 = vld [vmem:[#allocation2 + $0xa] sm:$0xff] }
 0x15e   :  { %795 = vrot.lane.b32.xlu1 %v784_v26, %s2797_s11  ;;  %793 = vrot.lane.b32.xlu0 %v783_v34, %s2797_s11  ;;  %v835_v34 = vmul.f32 %v832_v58, %v2960_v15 }
 0x15f   :  { %v254_v12 = vadd.f32 %v3036_v0, %v229_v59  ;;  %v253_v38 = vadd.f32 %v3039_v2, %v228_v35 }
 0x160   :  { %v223_v40 = vpop.permute.xlu1 %222  ;;  %v221_v43 = vpop.permute.xlu0 %220 }
 0x161   :  { %v231_v16 = vadd.f32 %v223_v40, %v2913_v48  ;;  %v230_v19 = vadd.f32 %v221_v43, %v2911_v47  ;;  %v887_v48 = vstv %s2628_s4  ;;  %v3181_v43 = vld [vmem:[#allocation2 + $0x22] sm:$0xff]  ;;  %s2648_s4 = sld [smem:[#allocation7 + $0x19]] }
 0x162   :  { %818 = vrot.lane.b32.xlu1 %v809_v41, %s2798_s13  ;;  %816 = vrot.lane.b32.xlu0 %v808_v45, %s2798_s13  ;;  %v889_v41 = vmul.f32 %v887_v48, %v3171_v25 }
 0x163   :  { %v256_v2 = vadd.f32 %v3044_v5, %v231_v16  ;;  %v255_v47 = vadd.f32 %v3047_v7, %v230_v19  ;;  %v912_v16 = vstv %s2629_s6  ;;  %s2649_s6 = sld [smem:[#allocation7 + $0x4a]] }
 0x164   :  { %v271_v49 = vpop.permute.xlu1 %270  ;;  %v269_v52 = vpop.permute.xlu0 %268 }
 0x165   :  { %v281_v26 = vadd.f32 %v271_v49, %v254_v12  ;;  %v280_v0 = vadd.f32 %v269_v52, %v253_v38  ;;  %v888_v52 = vmul.f32 %v887_v48, %v3174_v37  ;;  %v3195_v38 = vld [vmem:[#allocation2 + $0x32] sm:$0xff] }
 0x166   :  { %822 = vrot.lane.b32.xlu1 %v811_v51, %s2798_s13  ;;  %820 = vrot.lane.b32.xlu0 %v810_v54, %s2798_s13  ;;  %v3185_v54 = vld [vmem:[#allocation2 + $0x1a] sm:$0xff] }
 0x167   :  { %v306_v45 = vadd.f32 %v3052_v10, %v281_v26  ;;  %v305_v58 = vadd.f32 %v3055_v14, %v280_v0  ;;  %v890_v12 = vmul.f32 %v887_v48, %v3185_v54 }
 0x168   :  { %v275_v61 = vpop.permute.xlu1 %274  ;;  %v273_v3 = vpop.permute.xlu0 %272 }
 0x169   :  { %v283_v49 = vadd.f32 %v275_v61, %v256_v2  ;;  %v282_v5 = vadd.f32 %v273_v3, %v255_v47 }
 0x16a   :  { %843 = vrot.lane.b32.xlu1 %v834_v63, %s2798_s13  ;;  %841 = vrot.lane.b32.xlu0 %v833_v6, %s2798_s13  ;;  %v891_v63 = vmul.f32 %v887_v48, %v3181_v43  ;;  %v3191_v6 = vld [vmem:[#allocation2 + $0x3a] sm:$0xff]  ;;  %v3208_v48 = vld [vmem:[#allocation2 + $0x4a] sm:$0xff] }
 0x16b   :  { %v308_v10 = vadd.f32 %v3060_v18, %v283_v49  ;;  %v307_v14 = vadd.f32 %v3063_v20, %v282_v5  ;;  %v914_v26 = vmul.f32 %v912_v16, %v3191_v6  ;;  %v913_v20 = vmul.f32 %v912_v16, %v3195_v38 }
 0x16c   :  { %v323_v23 = vpop.permute.xlu1 %322  ;;  %v321_v29 = vpop.permute.xlu0 %320 }
 0x16d   :  { %v333_v59 = vadd.f32 %v323_v23, %v306_v45  ;;  %v332_v7 = vadd.f32 %v321_v29, %v305_v58  ;;  %v3205_v29 = vld [vmem:[#allocation2 + $0x52] sm:$0xff] }
 0x16e   :  { %847 = vrot.lane.b32.xlu1 %v836_v31, %s2798_s13  ;;  %845 = vrot.lane.b32.xlu0 %v835_v34, %s2798_s13 }
 0x16f   :  { %v358_v3 = vadd.f32 %v3068_v22, %v333_v59  ;;  %v357_v23 = vadd.f32 %v3071_v24, %v332_v7 }
 0x170   :  { %v327_v40 = vpop.permute.xlu1 %326  ;;  %v325_v51 = vpop.permute.xlu0 %324 }
 0x171   :  { %v335_v19 = vadd.f32 %v327_v40, %v308_v10  ;;  %v334_v18 = vadd.f32 %v325_v51, %v307_v14  ;;  %v916_v40 = vmul.f32 %v912_v16, %v3205_v29  ;;  %v915_v51 = vmul.f32 %v912_v16, %v3208_v48 }
 0x172   :  { %898 = vrot.lane.b32.xlu1 %v889_v41, %s2793_s30  ;;  %896 = vrot.lane.b32.xlu0 %v888_v52, %s2793_s30 }
 0x173   :  { %v360_v22 = vadd.f32 %v3076_v27, %v335_v19  ;;  %v359_v24 = vadd.f32 %v3079_v30, %v334_v18  ;;  %v939_v27 = vstv %s3199_s8  ;;  %v527_v19 = vstv %s2612_s10  ;;  %s2650_s8 = sld [smem:[#allocation7 + $0x1a]]  ;;  %s2651_s10 = sld [smem:[#allocation7 + $0x4b]] }
 0x174   :  { %v375_v35 = vpop.permute.xlu1 %374  ;;  %v373_v61 = vpop.permute.xlu0 %372  ;;  %v941_v7 = vmul.f32 %v939_v27, %v3171_v25  ;;  %v942_v18 = vmul.f32 %v939_v27, %v3185_v54 }
 0x175   :  { %v385_v34 = vadd.f32 %v375_v35, %v358_v3  ;;  %v384_v2 = vadd.f32 %v373_v61, %v357_v23  ;;  %v943_v3 = vmul.f32 %v939_v27, %v3181_v43 }
 0x176   :  { %902 = vrot.lane.b32.xlu1 %v891_v63, %s2793_s30  ;;  %900 = vrot.lane.b32.xlu0 %v890_v12, %s2793_s30  ;;  %v940_v63 = vmul.f32 %v939_v27, %v3174_v37 }
 0x177   :  { %v410_v41 = vadd.f32 %v3084_v36, %v385_v34  ;;  %v409_v52 = vadd.f32 %v3087_v39, %v384_v2 }
 0x178   :  { %v379_v31 = vpop.permute.xlu1 %378  ;;  %v377_v0 = vpop.permute.xlu0 %376 }
 0x179   :  { %v387_v45 = vadd.f32 %v379_v31, %v360_v22  ;;  %v386_v58 = vadd.f32 %v377_v0, %v359_v24  ;;  %v964_v31 = vstv %s2631_s12  ;;  %v528_v0 = vmul.f32 %v527_v19, %v3016_v57  ;;  %s2652_s12 = sld [smem:[#allocation7 + $0x1b]] }
 0x17a   :  { %923 = vrot.lane.b32.xlu1 %v914_v26, %s2793_s30  ;;  %921 = vrot.lane.b32.xlu0 %v913_v20, %s2793_s30  ;;  %v966_v24 = vmul.f32 %v964_v31, %v3191_v6  ;;  %v531_v57 = vmul.f32 %v527_v19, %v3021_v33 }
 0x17b   :  { %v412_v36 = vadd.f32 %v3092_v42, %v387_v45  ;;  %v411_v10 = vadd.f32 %v3095_v44, %v386_v58  ;;  %v536_v44 = vstv %s2613_s14  ;;  %v968_v58 = vmul.f32 %v964_v31, %v3205_v29  ;;  %s2653_s14 = sld [smem:[#allocation7 + $0x4c]] }
 0x17c   :  { %v427_v47 = vpop.permute.xlu1 %426  ;;  %v425_v49 = vpop.permute.xlu0 %424  ;;  %v540_v27 = vmul.f32 %v536_v44, %v2957_v13 }
 0x17d   :  { %v437_v5 = vadd.f32 %v427_v47, %v410_v41  ;;  %v436_v30 = vadd.f32 %v425_v49, %v409_v52  ;;  %v538_v47 = vmul.f32 %v536_v44, %v2949_v8  ;;  %v530_v8 = vmul.f32 %v527_v19, %v3024_v60 }
 0x17e   :  { %927 = vrot.lane.b32.xlu1 %v916_v40, %s2793_s30  ;;  %925 = vrot.lane.b32.xlu0 %v915_v51, %s2793_s30  ;;  %v991_v60 = vstv %s3232_s15  ;;  %s2656_s15 = sld [smem:[#allocation7 + $0x1d]] }
 0x17f   :  { %v462_v39 = vadd.f32 %v3100_v46, %v437_v5  ;;  %v461_v12 = vadd.f32 %v3103_v50, %v436_v30  ;;  %v529_v46 = vmul.f32 %v527_v19, %v3013_v55  ;;  %v967_v30 = vmul.f32 %v964_v31, %v3208_v48 }
 0x180   :  { %v431_v59 = vpop.permute.xlu1 %430  ;;  %v429_v35 = vpop.permute.xlu0 %428  ;;  %v993_v13 = vmul.f32 %v991_v60, %v3171_v25 }
 0x181   :  { %v439_v61 = vadd.f32 %v431_v59, %v412_v36  ;;  %v438_v16 = vadd.f32 %v429_v35, %v411_v10  ;;  %v995_v10 = vmul.f32 %v991_v60, %v3181_v43 }
 0x182   :  { %950 = vrot.lane.b32.xlu1 %v941_v7, %s2794_s5  ;;  %948 = vrot.lane.b32.xlu0 %v940_v63, %s2794_s5  ;;  %v992_v63 = vmul.f32 %v991_v60, %v3174_v37 }
 0x183   :  { %v464_v50 = vadd.f32 %v3108_v53, %v439_v61  ;;  %v463_v20 = vadd.f32 %v3111_v56, %v438_v16  ;;  %v965_v53 = vmul.f32 %v964_v31, %v3195_v38  ;;  %v994_v61 = vmul.f32 %v991_v60, %v3185_v54 }
 0x184   :  { %v479_v14 = vpop.permute.xlu1 %478  ;;  %v477_v23 = vpop.permute.xlu0 %476 }
 0x185   :  { %v489_v42 = vadd.f32 %v479_v14, %v462_v39  ;;  %v488_v26 = vadd.f32 %v477_v23, %v461_v12  ;;  %v1016_v12 = vstv %s2633_s16  ;;  %s3663_s16 = sld [smem:[#allocation7 + $0x4e]] }
 0x186   :  { %954 = vrot.lane.b32.xlu1 %v943_v3, %s2794_s5  ;;  %952 = vrot.lane.b32.xlu0 %v942_v18, %s2794_s5  ;;  %v1018_v14 = vmul.f32 %v1016_v12, %v3191_v6  ;;  %v1017_v19 = vmul.f32 %v1016_v12, %v3195_v38  ;;  %v1020_v23 = vmul.f32 %v1016_v12, %v3205_v29 }
 0x187   :  { %v514_v34 = vadd.f32 %v3116_v28, %v489_v42  ;;  %v513_v2 = vadd.f32 %v3119_v32, %v488_v26  ;;  %v537_v28 = vmul.f32 %v536_v44, %v2952_v11  ;;  %v1019_v31 = vmul.f32 %v1016_v12, %v3208_v48 }
 0x188   :  { %v483_v22 = vpop.permute.xlu1 %482  ;;  %v481_v55 = vpop.permute.xlu0 %480 }
 0x189   :  { %v533_v40 = vadd.f32 %v529_v46, %v514_v34  ;;  %v491_v41 = vadd.f32 %v483_v22, %v464_v50  ;;  %v532_v45 = vadd.f32 %v528_v0, %v513_v2  ;;  %v490_v49 = vadd.f32 %v481_v55, %v463_v20 }
 0x18a   :  { %975 = vrot.lane.b32.xlu1 %v966_v24, %s2794_s5  ;;  %973 = vrot.lane.b32.xlu0 %v965_v53, %s2794_s5  ;;  %v1068_v24 = vstv %s2635_s18  ;;  %s3691_s18 = sld [smem:[#allocation7 + $0x46]] }
 0x18b   :  { %v3247_v56 = vadd.f32 %v538_v47, %v533_v40  ;;  %v516_v32 = vadd.f32 %v3124_v62, %v491_v41  ;;  %v3252_v51 = vadd.f32 %v537_v28, %v532_v45  ;;  %v515_v52 = vadd.f32 %v3127_v1, %v490_v49 }
 0x18c   :  { %v3255_v11 = vpop.permute.xlu1 %558  ;;  %v3259_v5 = vpop.permute.xlu0 %556  ;;  %v539_v62 = vmul.f32 %v536_v44, %v2960_v15  ;;  %v1043_v44 = vstv %s2634_s17  ;;  %v1070_v40 = vmul.f32 %v1068_v24, %v3191_v6  ;;  %v1069_v55 = vmul.f32 %v1068_v24, %v3195_v38  ;;  %s3686_s17 = sld [smem:[#allocation7 + $0x15]] }
 0x18d   :  { %v535_v33 = vadd.f32 %v531_v57, %v516_v32  ;;  %v534_v59 = vadd.f32 %v530_v8, %v515_v52  ;;  %v1045_v46 = vmul.f32 %v1043_v44, %v3171_v25  ;;  %v1044_v34 = vmul.f32 %v1043_v44, %v3174_v37 }
 0x18e   :  { %979 = vrot.lane.b32.xlu1 %v968_v58, %s2794_s5  ;;  %977 = vrot.lane.b32.xlu0 %v967_v30, %s2794_s5  ;;  %v1047_v20 = vmul.f32 %v1043_v44, %v3181_v43  ;;  %v1046_v22 = vmul.f32 %v1043_v44, %v3185_v54  ;;  %v1072_v28 = vmul.f32 %v1068_v24, %v3205_v29  ;;  %v1095_v57 = vstv %s2636_s19  ;;  %s3696_s19 = sld [smem:[#allocation7 + $0x1e]] }
 0x18f   :  { %v3265_v7 = vadd.f32 %v540_v27, %v535_v33  ;;  %v3268_v1 = vadd.f32 %v539_v62, %v534_v59  ;;  %v1071_v49 = vmul.f32 %v1068_v24, %v3208_v48  ;;  %v1097_v8 = vmul.f32 %v1095_v57, %v3171_v25 }
 0x190   :  { %v3270_v36 = vpop.permute.xlu1 %562  ;;  %v3273_v35 = vpop.permute.xlu0 %560  ;;  %v1096_v58 = vmul.f32 %v1095_v57, %v3174_v37  ;;  %v1099_v33 = vmul.f32 %v1095_v57, %v3181_v43  ;;  %v1098_v62 = vmul.f32 %v1095_v57, %v3185_v54  ;;  %v1120_v59 = vstv %s2637_s20  ;;  %s3732_s20 = sld [smem:[#allocation7 + $0x4f]] }
 0x191   :  { %v1124_v12 = vmul.f32 %v1120_v59, %v3205_v29  ;;  %v569_v24 = vadd.f32 %v3255_v11, %v3247_v56  ;;  %v571_v56 = vadd.f32 %v3270_v36, %v3265_v7  ;;  %v3403_v36 = vld [vmem:[#allocation2 + $0xb] sm:$0xff] }
 0x192   :  { %1002 = vrot.lane.b32.xlu1 %v993_v13, %s2795_s7  ;;  %1000 = vrot.lane.b32.xlu0 %v992_v63, %s2795_s7  ;;  %v1122_v13 = vmul.f32 %v1120_v59, %v3191_v6 }
 0x194   :  { %v3278_v15 = vpop.permute.xlu1 %610  ;;  %v3281_v39 = vpop.permute.xlu0 %608 }
 0x196   :  { %1006 = vrot.lane.b32.xlu1 %v995_v10, %s2795_s7  ;;  %1004 = vrot.lane.b32.xlu0 %v994_v61, %s2795_s7  ;;  %v1121_v10 = vmul.f32 %v1120_v59, %v3195_v38 }
 0x198   :  { %v3286_v16 = vpop.permute.xlu1 %614  ;;  %v3289_v3 = vpop.permute.xlu0 %612 }
 0x19a   :  { %1027 = vrot.lane.b32.xlu1 %v1018_v14, %s2795_s7  ;;  %1025 = vrot.lane.b32.xlu0 %v1017_v19, %s2795_s7  ;;  %v1123_v19 = vmul.f32 %v1120_v59, %v3208_v48 }
 0x19c   :  { %v3294_v42 = vpop.permute.xlu1 %635  ;;  %v3297_v18 = vpop.permute.xlu0 %633 }
 0x19e   :  { %1031 = vrot.lane.b32.xlu1 %v1020_v23, %s2795_s7  ;;  %1029 = vrot.lane.b32.xlu0 %v1019_v31, %s2795_s7  ;;  %v1147_v23 = vstv %s2638_s21  ;;  %s2660_s21 = sld [smem:[#allocation7 + $0x1f]] }
 0x19f   :  { %v1149_v44 = vmul.f32 %v1147_v23, %v3171_v25 }
 0x1a0   :  { %v3302_v26 = vpop.permute.xlu1 %639  ;;  %v3305_v50 = vpop.permute.xlu0 %637 }
 0x1a2   :  { %1054 = vrot.lane.b32.xlu1 %v1045_v46, %s2796_s9  ;;  %1052 = vrot.lane.b32.xlu0 %v1044_v34, %s2796_s9  ;;  %v1148_v34 = vmul.f32 %v1147_v23, %v3174_v37 }
 0x1a4   :  { %v3310_v0 = vpop.permute.xlu1 %662  ;;  %v3313_v2 = vpop.permute.xlu0 %660 }
 0x1a6   :  { %1058 = vrot.lane.b32.xlu1 %v1047_v20, %s2796_s9  ;;  %1056 = vrot.lane.b32.xlu0 %v1046_v22, %s2796_s9  ;;  %v1151_v22 = vmul.f32 %v1147_v23, %v3181_v43 }
 0x1a8   :  { %v3318_v47 = vpop.permute.xlu1 %666  ;;  %v3321_v41 = vpop.permute.xlu0 %664 }
 0x1aa   :  { %1079 = vrot.lane.b32.xlu1 %v1070_v40, %s2796_s9  ;;  %1077 = vrot.lane.b32.xlu0 %v1069_v55, %s2796_s9  ;;  %v1150_v55 = vmul.f32 %v1147_v23, %v3185_v54 }
 0x1ac   :  { %v3326_v53 = vpop.permute.xlu1 %687  ;;  %v3329_v45 = vpop.permute.xlu0 %685 }
 0x1ae   :  { %1083 = vrot.lane.b32.xlu1 %v1072_v28, %s2796_s9  ;;  %1081 = vrot.lane.b32.xlu0 %v1071_v49, %s2796_s9  ;;  %v1172_v28 = vstv %s2639_s23  ;;  %v568_v49 = vadd.f32 %v3259_v5, %v3252_v51  ;;  %v570_v5 = vadd.f32 %v3273_v35, %v3268_v1  ;;  %v3410_v35 = vld [vmem:[#allocation2 + $0x3] sm:$0xff]  ;;  %s2661_s23 = sld [smem:[#allocation7 + $0x50]] }
 0x1af   :  { %v1176_v7 = vmul.f32 %v1172_v28, %v3205_v29  ;;  %v1175_v1 = vmul.f32 %v1172_v28, %v3208_v48 }
 0x1b0   :  { %v3334_v32 = vpop.permute.xlu1 %691  ;;  %v3337_v52 = vpop.permute.xlu0 %689  ;;  %v593_v51 = vadd.f32 %v3135_v9, %v568_v49 }
 0x1b2   :  { %1106 = vrot.lane.b32.xlu1 %v1097_v8, %s2797_s11  ;;  %1104 = vrot.lane.b32.xlu0 %v1096_v58, %s2797_s11  ;;  %v1174_v8 = vmul.f32 %v1172_v28, %v3191_v6  ;;  %v594_v58 = vadd.f32 %v3132_v4, %v569_v24  ;;  %v620_v4 = vadd.f32 %v3281_v39, %v593_v51 }
 0x1b4   :  { %v3342_v27 = vpop.permute.xlu1 %714  ;;  %v3345_v30 = vpop.permute.xlu0 %712  ;;  %v645_v39 = vadd.f32 %v3297_v18, %v620_v4 }
 0x1b6   :  { %1110 = vrot.lane.b32.xlu1 %v1099_v33, %s2797_s11  ;;  %1108 = vrot.lane.b32.xlu0 %v1098_v62, %s2797_s11  ;;  %v1173_v33 = vmul.f32 %v1172_v28, %v3195_v38  ;;  %v621_v62 = vadd.f32 %v3278_v15, %v594_v58  ;;  %v595_v15 = vadd.f32 %v3143_v21, %v570_v5 }
 0x1b7   :  { %v672_v23 = vadd.f32 %v3313_v2, %v645_v39 }
 0x1b8   :  { %v3350_v60 = vpop.permute.xlu1 %718  ;;  %v3353_v63 = vpop.permute.xlu0 %716  ;;  %v646_v9 = vadd.f32 %v3294_v42, %v621_v62  ;;  %v622_v42 = vadd.f32 %v3289_v3, %v595_v15 }
 0x1b9   :  { %v697_v3 = vadd.f32 %v3329_v45, %v672_v23 }
 0x1ba   :  { %1131 = vrot.lane.b32.xlu1 %v1122_v13, %s2797_s11  ;;  %1129 = vrot.lane.b32.xlu0 %v1121_v10, %s2797_s11  ;;  %v596_v13 = vadd.f32 %v3140_v17, %v571_v56  ;;  %v673_v17 = vadd.f32 %v3310_v0, %v646_v9  ;;  %v647_v0 = vadd.f32 %v3305_v50, %v622_v42  ;;  %v3444_v56 = vld [vmem:[#allocation2 + $0x3b] sm:$0xff] }
 0x1bb   :  { %v724_v28 = vadd.f32 %v3345_v30, %v697_v3 }
 0x1bc   :  { %v3358_v61 = vpop.permute.xlu1 %739  ;;  %v3361_v14 = vpop.permute.xlu0 %737  ;;  %v698_v18 = vadd.f32 %v3326_v53, %v673_v17  ;;  %v674_v53 = vadd.f32 %v3321_v41, %v647_v0  ;;  %v3450_v41 = vld [vmem:[#allocation2 + $0x33] sm:$0xff] }
 0x1bd   :  { %v749_v51 = vadd.f32 %v3361_v14, %v724_v28 }
 0x1be   :  { %1135 = vrot.lane.b32.xlu1 %v1124_v12, %s2797_s11  ;;  %1133 = vrot.lane.b32.xlu0 %v1123_v19, %s2797_s11  ;;  %v1227_v12 = vstv %s2642_s24  ;;  %v623_v19 = vadd.f32 %v3286_v16, %v596_v13  ;;  %s2662_s24 = sld [smem:[#allocation7 + $0x20]] }
 0x1bf   :  { %v1228_v16 = vmul.f32 %v1227_v12, %v3410_v35 }
 0x1c0   :  { %v3366_v31 = vpop.permute.xlu1 %743  ;;  %v3369_v46 = vpop.permute.xlu0 %741  ;;  %v648_v21 = vadd.f32 %v3302_v26, %v623_v19  ;;  %v725_v26 = vadd.f32 %v3342_v27, %v698_v18  ;;  %v1252_v27 = vstv %s3408_s25  ;;  %s2663_s25 = sld [smem:[#allocation7 + $0x51]] }
 0x1c1   :  { %v1254_v14 = vmul.f32 %v1252_v27, %v3444_v56  ;;  %v1253_v13 = vmul.f32 %v1252_v27, %v3450_v41 }
 0x1c2   :  { %1158 = vrot.lane.b32.xlu1 %v1149_v44, %s2798_s13  ;;  %1156 = vrot.lane.b32.xlu0 %v1148_v34, %s2798_s13  ;;  %v1229_v34 = vmul.f32 %v1227_v12, %v3403_v36  ;;  %v675_v2 = vadd.f32 %v3318_v47, %v648_v21 }
 0x1c4   :  { %v3374_v20 = vpop.permute.xlu1 %766  ;;  %v3379_v40 = vpop.permute.xlu0 %764  ;;  %v700_v49 = vadd.f32 %v3334_v32, %v675_v2 }
 0x1c5   :  { %v776_v5 = vadd.f32 %v3379_v40, %v749_v51  ;;  %v867_v40 = vstv %s3431_s26  ;;  %s2664_s26 = sld [smem:[#allocation7 + $0x21]] }
 0x1c6   :  { %1162 = vrot.lane.b32.xlu1 %v1151_v22, %s2798_s13  ;;  %1160 = vrot.lane.b32.xlu0 %v1150_v55, %s2798_s13  ;;  %v3421_v22 = vld [vmem:[#allocation2 + $0x23] sm:$0xff]  ;;  %v3426_v55 = vld [vmem:[#allocation2 + $0x1b] sm:$0xff]  ;;  %v727_v32 = vadd.f32 %v3350_v60, %v700_v49  ;;  %v3462_v60 = vld [vmem:[#allocation2 + $0x53] sm:$0xff] }
 0x1c7   :  { %v1231_v45 = vmul.f32 %v1227_v12, %v3421_v22  ;;  %v1230_v47 = vmul.f32 %v1227_v12, %v3426_v55  ;;  %v1256_v19 = vmul.f32 %v1252_v27, %v3462_v60 }
 0x1c8   :  { %v3386_v57 = vpop.permute.xlu1 %770  ;;  %v3392_v11 = vpop.permute.xlu0 %768  ;;  %v752_v62 = vadd.f32 %v3366_v31, %v727_v32  ;;  %v876_v31 = vstv %s3436_s0  ;;  %v1304_v32 = vstv %s3476_s28  ;;  %s2665_s0 = sld [smem:[#allocation7 + $0x52]]  ;;  %s2667_s28 = sld [smem:[#allocation7 + $0x53]] }
 0x1c9   :  { %v878_v18 = vmul.f32 %v876_v31, %v3191_v6 }
 0x1ca   :  { %1183 = vrot.lane.b32.xlu1 %v1174_v8, %s2798_s13  ;;  %1181 = vrot.lane.b32.xlu0 %v1173_v33, %s2798_s13  ;;  %v750_v8 = vadd.f32 %v3358_v61, %v725_v26  ;;  %v699_v33 = vadd.f32 %v3337_v52, %v674_v53 }
 0x1cc   :  { %v792_v59 = vpop.permute.xlu1 %791  ;;  %v790_v10 = vpop.permute.xlu0 %789  ;;  %v777_v30 = vadd.f32 %v3374_v20, %v750_v8  ;;  %v726_v61 = vadd.f32 %v3353_v63, %v699_v33  ;;  %v3466_v63 = vld [vmem:[#allocation2 + $0x4b] sm:$0xff] }
 0x1cd   :  { %v801_v9 = vadd.f32 %v790_v10, %v776_v5  ;;  %v1255_v23 = vmul.f32 %v1252_v27, %v3466_v63  ;;  %v1305_v5 = vmul.f32 %v1304_v32, %v3450_v41 }
 0x1ce   :  { %1187 = vrot.lane.b32.xlu1 %v1176_v7, %s2798_s13  ;;  %1185 = vrot.lane.b32.xlu0 %v1175_v1, %s2798_s13  ;;  %v802_v4 = vadd.f32 %v792_v59, %v777_v30  ;;  %v751_v20 = vadd.f32 %v3369_v46, %v726_v61  ;;  %v779_v1 = vadd.f32 %v3386_v57, %v752_v62 }
 0x1cf   :  { %v869_v46 = vmul.f32 %v867_v40, %v3171_v25  ;;  %v868_v57 = vmul.f32 %v867_v40, %v3174_v37  ;;  %v877_v25 = vmul.f32 %v876_v31, %v3195_v38  ;;  %v871_v37 = vmul.f32 %v867_v40, %v3181_v43 }
 0x1d0   :  { %v796_v44 = vpop.permute.xlu1 %795  ;;  %v794_v24 = vpop.permute.xlu0 %793  ;;  %v778_v59 = vadd.f32 %v3392_v11, %v751_v20  ;;  %v1279_v11 = vstv %s3452_s27  ;;  %v880_v38 = vmul.f32 %v876_v31, %v3205_v29  ;;  %v879_v43 = vmul.f32 %v876_v31, %v3208_v48  ;;  %s2666_s27 = sld [smem:[#allocation7 + $0x22]] }
 0x1d1   :  { %v804_v10 = vadd.f32 %v796_v44, %v779_v1  ;;  %v1281_v26 = vmul.f32 %v1279_v11, %v3403_v36  ;;  %v1280_v6 = vmul.f32 %v1279_v11, %v3410_v35  ;;  %v1283_v27 = vmul.f32 %v1279_v11, %v3421_v22 }
 0x1d2   :  { %1238 = vrot.lane.b32.xlu1 %v1229_v34, %s2793_s30  ;;  %1236 = vrot.lane.b32.xlu0 %v1228_v16, %s2793_s30  ;;  %v803_v34 = vadd.f32 %v794_v24, %v778_v59  ;;  %v1282_v51 = vmul.f32 %v1279_v11, %v3426_v55  ;;  %v1306_v48 = vmul.f32 %v1304_v32, %v3444_v56 }
 0x1d4   :  { %v819_v50 = vpop.permute.xlu1 %818  ;;  %v817_v58 = vpop.permute.xlu0 %816 }
 0x1d5   :  { %v829_v15 = vadd.f32 %v819_v50, %v802_v4  ;;  %v828_v39 = vadd.f32 %v817_v58, %v801_v9  ;;  %v870_v50 = vmul.f32 %v867_v40, %v3185_v54  ;;  %v1307_v4 = vmul.f32 %v1304_v32, %v3466_v63 }
 0x1d6   :  { %1242 = vrot.lane.b32.xlu1 %v1231_v45, %s2793_s30  ;;  %1240 = vrot.lane.b32.xlu0 %v1230_v47, %s2793_s30 }
 0x1d8   :  { %v823_v52 = vpop.permute.xlu1 %822  ;;  %v821_v7 = vpop.permute.xlu0 %820 }
 0x1d9   :  { %v831_v16 = vadd.f32 %v823_v52, %v804_v10  ;;  %v830_v44 = vadd.f32 %v821_v7, %v803_v34  ;;  %v1331_v7 = vstv %s2646_s29  ;;  %v1383_v34 = vstv %s2648_s4  ;;  %s2670_s29 = sld [smem:[#allocation7 + $0x24]] }
 0x1da   :  { %1263 = vrot.lane.b32.xlu1 %v1254_v14, %s2793_s30  ;;  %1261 = vrot.lane.b32.xlu0 %v1253_v13, %s2793_s30  ;;  %v1308_v14 = vmul.f32 %v1304_v32, %v3462_v60  ;;  %v1333_v20 = vmul.f32 %v1331_v7, %v3403_v36  ;;  %v1332_v40 = vmul.f32 %v1331_v7, %v3410_v35  ;;  %s3941_s4 = sld [smem:[#allocation7 + $0x1c]] }
 0x1db   :  { %v1334_v59 = vmul.f32 %v1331_v7, %v3426_v55  ;;  %v1385_v11 = vmul.f32 %v1383_v34, %v3403_v36 }
 0x1dc   :  { %v844_v12 = vpop.permute.xlu1 %843  ;;  %v842_v42 = vpop.permute.xlu0 %841 }
 0x1dd   :  { %v854_v17 = vadd.f32 %v844_v12, %v829_v15  ;;  %v853_v21 = vadd.f32 %v842_v42, %v828_v39  ;;  %v1335_v15 = vmul.f32 %v1331_v7, %v3421_v22  ;;  %v1356_v39 = vstv %s2647_s3  ;;  %s3918_s3 = sld [smem:[#allocation7 + $0x55]] }
 0x1de   :  { %1267 = vrot.lane.b32.xlu1 %v1256_v19, %s2793_s30  ;;  %1265 = vrot.lane.b32.xlu0 %v1255_v23, %s2793_s30  ;;  %v1358_v19 = vmul.f32 %v1356_v39, %v3444_v56  ;;  %v1357_v10 = vmul.f32 %v1356_v39, %v3450_v41  ;;  %v1360_v42 = vmul.f32 %v1356_v39, %v3462_v60 }
 0x1df   :  { %v873_v0 = vadd.f32 %v869_v46, %v854_v17  ;;  %v872_v3 = vadd.f32 %v868_v57, %v853_v21  ;;  %v1359_v57 = vmul.f32 %v1356_v39, %v3466_v63 }
 0x1e0   :  { %v848_v2 = vpop.permute.xlu1 %847  ;;  %v846_v28 = vpop.permute.xlu0 %845 }
 0x1e1   :  { %v3486_v24 = vadd.f32 %v878_v18, %v873_v0  ;;  %v856_v53 = vadd.f32 %v848_v2, %v831_v16  ;;  %v3490_v45 = vadd.f32 %v877_v25, %v872_v3  ;;  %v855_v49 = vadd.f32 %v846_v28, %v830_v44 }
 0x1e2   :  { %1290 = vrot.lane.b32.xlu1 %v1281_v26, %s2794_s5  ;;  %1288 = vrot.lane.b32.xlu0 %v1280_v6, %s2794_s5  ;;  %v1384_v16 = vmul.f32 %v1383_v34, %v3410_v35  ;;  %v1387_v25 = vmul.f32 %v1383_v34, %v3421_v22  ;;  %v1386_v3 = vmul.f32 %v1383_v34, %v3426_v55  ;;  %v1408_v2 = vstv %s2649_s6  ;;  %s3946_s6 = sld [smem:[#allocation7 + $0x4d]] }
 0x1e3   :  { %v875_v8 = vadd.f32 %v871_v37, %v856_v53  ;;  %v874_v58 = vadd.f32 %v870_v50, %v855_v49  ;;  %v1410_v37 = vmul.f32 %v1408_v2, %v3444_v56  ;;  %v1409_v28 = vmul.f32 %v1408_v2, %v3450_v41 }
 0x1e4   :  { %v3496_v47 = vpop.permute.xlu1 %898  ;;  %v3501_v54 = vpop.permute.xlu0 %896  ;;  %v1412_v50 = vmul.f32 %v1408_v2, %v3462_v60 }
 0x1e5   :  { %v3499_v33 = vadd.f32 %v880_v38, %v875_v8  ;;  %v3505_v30 = vadd.f32 %v879_v43, %v874_v58  ;;  %v1411_v38 = vmul.f32 %v1408_v2, %v3466_v63  ;;  %v1435_v8 = vstv %s2650_s8  ;;  %s3951_s8 = sld [smem:[#allocation7 + $0x25]] }
 0x1e6   :  { %1294 = vrot.lane.b32.xlu1 %v1283_v27, %s2794_s5  ;;  %1292 = vrot.lane.b32.xlu0 %v1282_v51, %s2794_s5  ;;  %v1437_v58 = vmul.f32 %v1435_v8, %v3403_v36  ;;  %v1436_v51 = vmul.f32 %v1435_v8, %v3410_v35 }
 0x1e8   :  { %v3509_v29 = vpop.permute.xlu1 %902  ;;  %v3512_v61 = vpop.permute.xlu0 %900 }
 0x1ea   :  { %1315 = vrot.lane.b32.xlu1 %v1306_v48, %s2794_s5  ;;  %1313 = vrot.lane.b32.xlu0 %v1305_v5, %s2794_s5  ;;  %v1439_v48 = vmul.f32 %v1435_v8, %v3421_v22 }
 0x1ec   :  { %v3517_v52 = vpop.permute.xlu1 %923  ;;  %v3520_v62 = vpop.permute.xlu0 %921 }
 0x1ee   :  { %1319 = vrot.lane.b32.xlu1 %v1308_v14, %s2794_s5  ;;  %1317 = vrot.lane.b32.xlu0 %v1307_v4, %s2794_s5  ;;  %v1438_v14 = vmul.f32 %v1435_v8, %v3426_v55  ;;  %v1460_v4 = vstv %s2651_s10  ;;  %s3989_s10 = sld [smem:[#allocation7 + $0x56]] }
 0x1ef   :  { %v1464_v39 = vmul.f32 %v1460_v4, %v3462_v60 }
 0x1f0   :  { %v3525_v13 = vpop.permute.xlu1 %927  ;;  %v3528_v9 = vpop.permute.xlu0 %925 }
 0x1f2   :  { %1342 = vrot.lane.b32.xlu1 %v1333_v20, %s2795_s7  ;;  %1340 = vrot.lane.b32.xlu0 %v1332_v40, %s2795_s7  ;;  %v1462_v20 = vmul.f32 %v1460_v4, %v3444_v56 }
 0x1f4   :  { %v3533_v1 = vpop.permute.xlu1 %950  ;;  %v3536_v31 = vpop.permute.xlu0 %948 }
 0x1f6   :  { %1346 = vrot.lane.b32.xlu1 %v1335_v15, %s2795_s7  ;;  %1344 = vrot.lane.b32.xlu0 %v1334_v59, %s2795_s7  ;;  %v1461_v15 = vmul.f32 %v1460_v4, %v3450_v41 }
 0x1f8   :  { %v3541_v12 = vpop.permute.xlu1 %954  ;;  %v3544_v46 = vpop.permute.xlu0 %952 }
 0x1fa   :  { %1367 = vrot.lane.b32.xlu1 %v1358_v19, %s2795_s7  ;;  %1365 = vrot.lane.b32.xlu0 %v1357_v10, %s2795_s7  ;;  %v1463_v10 = vmul.f32 %v1460_v4, %v3466_v63 }
 0x1fc   :  { %v3549_v17 = vpop.permute.xlu1 %975  ;;  %v3552_v23 = vpop.permute.xlu0 %973 }
 0x1fe   :  { %1371 = vrot.lane.b32.xlu1 %v1360_v42, %s2795_s7  ;;  %1369 = vrot.lane.b32.xlu0 %v1359_v57, %s2795_s7  ;;  %v1487_v42 = vstv %s2652_s12  ;;  %s2674_s12 = sld [smem:[#allocation7 + $0x26]] }
 0x1ff   :  { %v1489_v34 = vmul.f32 %v1487_v42, %v3403_v36 }
 0x200   :  { %v3557_v21 = vpop.permute.xlu1 %979  ;;  %v3560_v18 = vpop.permute.xlu0 %977 }
 0x202   :  { %1394 = vrot.lane.b32.xlu1 %v1385_v11, %s2796_s9  ;;  %1392 = vrot.lane.b32.xlu0 %v1384_v16, %s2796_s9  ;;  %v1488_v16 = vmul.f32 %v1487_v42, %v3410_v35 }
 0x204   :  { %v3565_v0 = vpop.permute.xlu1 %1002  ;;  %v3568_v44 = vpop.permute.xlu0 %1000 }
 0x206   :  { %1398 = vrot.lane.b32.xlu1 %v1387_v25, %s2796_s9  ;;  %1396 = vrot.lane.b32.xlu0 %v1386_v3, %s2796_s9  ;;  %v1491_v3 = vmul.f32 %v1487_v42, %v3421_v22 }
 0x208   :  { %v3573_v26 = vpop.permute.xlu1 %1006  ;;  %v3576_v53 = vpop.permute.xlu0 %1004 }
 0x20a   :  { %1419 = vrot.lane.b32.xlu1 %v1410_v37, %s2796_s9  ;;  %1417 = vrot.lane.b32.xlu0 %v1409_v28, %s2796_s9  ;;  %v1490_v37 = vmul.f32 %v1487_v42, %v3426_v55  ;;  %v1512_v28 = vstv %s2653_s14  ;;  %s2675_s14 = sld [smem:[#allocation7 + $0x57]] }
 0x20c   :  { %v3581_v6 = vpop.permute.xlu1 %1027  ;;  %v3584_v49 = vpop.permute.xlu0 %1025 }
 0x20e   :  { %1423 = vrot.lane.b32.xlu1 %v1412_v50, %s2796_s9  ;;  %1421 = vrot.lane.b32.xlu0 %v1411_v38, %s2796_s9  ;;  %v909_v50 = vadd.f32 %v3496_v47, %v3486_v24  ;;  %v908_v38 = vadd.f32 %v3501_v54, %v3490_v45  ;;  %v911_v24 = vadd.f32 %v3509_v29, %v3499_v33  ;;  %v3661_v33 = vld [vmem:[#allocation2 + $0xc] sm:$0xff]  ;;  %v1567_v29 = vstv %s2656_s15  ;;  %s2676_s15 = sld [smem:[#allocation7 + $0x27]] }
 0x20f   :  { %v910_v45 = vadd.f32 %v3512_v61, %v3505_v30  ;;  %v3668_v61 = vld [vmem:[#allocation2 + $0x4] sm:$0xff] }
 0x210   :  { %v3589_v43 = vpop.permute.xlu1 %1031  ;;  %v3592_v27 = vpop.permute.xlu0 %1029  ;;  %v933_v4 = vadd.f32 %v3520_v62, %v908_v38 }
 0x212   :  { %1446 = vrot.lane.b32.xlu1 %v1437_v58, %s2797_s11  ;;  %1444 = vrot.lane.b32.xlu0 %v1436_v51, %s2797_s11  ;;  %v1514_v58 = vmul.f32 %v1512_v28, %v3444_v56  ;;  %v934_v51 = vadd.f32 %v3517_v52, %v909_v50  ;;  %v960_v54 = vadd.f32 %v3536_v31, %v933_v4 }
 0x214   :  { %v3597_v32 = vpop.permute.xlu1 %1054  ;;  %v3600_v5 = vpop.permute.xlu0 %1052  ;;  %v961_v47 = vadd.f32 %v3533_v1, %v934_v51  ;;  %v935_v1 = vadd.f32 %v3528_v9, %v910_v45  ;;  %v985_v30 = vadd.f32 %v3552_v23, %v960_v54  ;;  %v3701_v51 = vld [vmem:[#allocation2 + $0x3c] sm:$0xff] }
 0x216   :  { %1450 = vrot.lane.b32.xlu1 %v1439_v48, %s2797_s11  ;;  %1448 = vrot.lane.b32.xlu0 %v1438_v14, %s2797_s11  ;;  %v1513_v14 = vmul.f32 %v1512_v28, %v3450_v41  ;;  %v986_v62 = vadd.f32 %v3549_v17, %v961_v47  ;;  %v962_v17 = vadd.f32 %v3544_v46, %v935_v1  ;;  %v3684_v46 = vld [vmem:[#allocation2 + $0x1c] sm:$0xff] }
 0x217   :  { %v1012_v42 = vadd.f32 %v3568_v44, %v985_v30 }
 0x218   :  { %v3605_v7 = vpop.permute.xlu1 %1058  ;;  %v3608_v40 = vpop.permute.xlu0 %1056  ;;  %v1013_v31 = vadd.f32 %v3565_v0, %v986_v62 }
 0x219   :  { %v1037_v0 = vadd.f32 %v3584_v49, %v1012_v42 }
 0x21a   :  { %1471 = vrot.lane.b32.xlu1 %v1462_v20, %s2797_s11  ;;  %1469 = vrot.lane.b32.xlu0 %v1461_v15, %s2797_s11  ;;  %v1516_v20 = vmul.f32 %v1512_v28, %v3462_v60  ;;  %v936_v15 = vadd.f32 %v3525_v13, %v911_v24  ;;  %v1038_v23 = vadd.f32 %v3581_v6, %v1013_v31  ;;  %v1619_v31 = vstv %s3696_s19  ;;  %s2680_s19 = sld [smem:[#allocation7 + $0x29]] }
 0x21c   :  { %v3613_v59 = vpop.permute.xlu1 %1079  ;;  %v3616_v19 = vpop.permute.xlu0 %1077  ;;  %v963_v13 = vadd.f32 %v3541_v12, %v936_v15  ;;  %v987_v12 = vadd.f32 %v3560_v18, %v962_v17  ;;  %v1065_v44 = vadd.f32 %v3597_v32, %v1038_v23  ;;  %v1064_v18 = vadd.f32 %v3600_v5, %v1037_v0  ;;  %v3707_v5 = vld [vmem:[#allocation2 + $0x34] sm:$0xff] }
 0x21d   :  { %v1570_v32 = vmul.f32 %v1567_v29, %v3684_v46  ;;  %v3717_v15 = vld [vmem:[#allocation2 + $0x54] sm:$0xff] }
 0x21e   :  { %1475 = vrot.lane.b32.xlu1 %v1464_v39, %s2797_s11  ;;  %1473 = vrot.lane.b32.xlu0 %v1463_v10, %s2797_s11  ;;  %v1515_v10 = vmul.f32 %v1512_v28, %v3466_v63  ;;  %v988_v9 = vadd.f32 %v3557_v21, %v963_v13  ;;  %v3679_v28 = vld [vmem:[#allocation2 + $0x24] sm:$0xff]  ;;  %v1014_v6 = vadd.f32 %v3576_v53, %v987_v12 }
 0x21f   :  { %v1571_v50 = vmul.f32 %v1567_v29, %v3679_v28  ;;  %v1089_v53 = vadd.f32 %v3616_v19, %v1064_v18 }
 0x220   :  { %v3621_v57 = vpop.permute.xlu1 %1083  ;;  %v3624_v11 = vpop.permute.xlu0 %1081  ;;  %v1015_v21 = vadd.f32 %v3573_v26, %v988_v9  ;;  %v1039_v4 = vadd.f32 %v3592_v27, %v1014_v6 }
 0x222   :  { %1498 = vrot.lane.b32.xlu1 %v1489_v34, %s2798_s13  ;;  %1496 = vrot.lane.b32.xlu0 %v1488_v16, %s2798_s13  ;;  %v1569_v16 = vmul.f32 %v1567_v29, %v3661_v33  ;;  %v1040_v38 = vadd.f32 %v3589_v43, %v1015_v21 }
 0x224   :  { %v3629_v25 = vpop.permute.xlu1 %1106  ;;  %v3632_v2 = vpop.permute.xlu0 %1104  ;;  %v1067_v24 = vadd.f32 %v3605_v7, %v1040_v38 }
 0x225   :  { %v1116_v47 = vadd.f32 %v3632_v2, %v1089_v53  ;;  %v1207_v2 = vstv %s3686_s17  ;;  %v1622_v53 = vmul.f32 %v1619_v31, %v3684_v46  ;;  %s2678_s17 = sld [smem:[#allocation7 + $0x28]] }
 0x226   :  { %1502 = vrot.lane.b32.xlu1 %v1491_v3, %s2798_s13  ;;  %1500 = vrot.lane.b32.xlu0 %v1490_v37, %s2798_s13  ;;  %v1568_v37 = vmul.f32 %v1567_v29, %v3668_v61  ;;  %v1092_v19 = vadd.f32 %v3621_v57, %v1067_v24  ;;  %v1216_v57 = vstv %s3691_s18  ;;  %v1211_v6 = vmul.f32 %v1207_v2, %v3421_v22  ;;  %s2679_s18 = sld [smem:[#allocation7 + $0x59]] }
 0x227   :  { %v1219_v22 = vmul.f32 %v1216_v57, %v3466_v63  ;;  %v1644_v24 = vstv %s3732_s20  ;;  %s2681_s20 = sld [smem:[#allocation7 + $0x5a]] }
 0x228   :  { %v3641_v8 = vpop.permute.xlu1 %1110  ;;  %v3645_v48 = vpop.permute.xlu0 %1108  ;;  %v1646_v63 = vmul.f32 %v1644_v24, %v3701_v51 }
 0x22a   :  { %1523 = vrot.lane.b32.xlu1 %v1514_v58, %s2798_s13  ;;  %1521 = vrot.lane.b32.xlu0 %v1513_v14, %s2798_s13  ;;  %v1090_v58 = vadd.f32 %v3613_v59, %v1065_v44  ;;  %v1592_v14 = vstv %s3663_s16  ;;  %v1066_v59 = vadd.f32 %v3608_v40, %v1039_v4  ;;  %v3721_v40 = vld [vmem:[#allocation2 + $0x4c] sm:$0xff]  ;;  %v1621_v44 = vmul.f32 %v1619_v31, %v3661_v33  ;;  %s2677_s16 = sld [smem:[#allocation7 + $0x58]] }
 0x22b   :  { %v1594_v27 = vmul.f32 %v1592_v14, %v3701_v51  ;;  %v1593_v7 = vmul.f32 %v1592_v14, %v3707_v5  ;;  %v1596_v13 = vmul.f32 %v1592_v14, %v3717_v15 }
 0x22c   :  { %v1132_v52 = vpop.permute.xlu1 %1131  ;;  %v1130_v39 = vpop.permute.xlu0 %1129  ;;  %v1117_v43 = vadd.f32 %v3629_v25, %v1090_v58  ;;  %v1091_v25 = vadd.f32 %v3624_v11, %v1066_v59  ;;  %v1209_v11 = vmul.f32 %v1207_v2, %v3403_v36 }
 0x22d   :  { %v1141_v62 = vadd.f32 %v1130_v39, %v1116_v47  ;;  %v1645_v47 = vmul.f32 %v1644_v24, %v3707_v5 }
 0x22e   :  { %1527 = vrot.lane.b32.xlu1 %v1516_v20, %s2798_s13  ;;  %1525 = vrot.lane.b32.xlu0 %v1515_v10, %s2798_s13  ;;  %v1142_v54 = vadd.f32 %v1132_v52, %v1117_v43  ;;  %v1119_v10 = vadd.f32 %v3641_v8, %v1092_v19  ;;  %v1118_v52 = vadd.f32 %v3645_v48, %v1091_v25 }
 0x22f   :  { %v1208_v8 = vmul.f32 %v1207_v2, %v3410_v35 }
 0x230   :  { %v1136_v34 = vpop.permute.xlu1 %1135  ;;  %v1134_v3 = vpop.permute.xlu0 %1133 }
 0x231   :  { %v1144_v39 = vadd.f32 %v1136_v34, %v1119_v10  ;;  %v1143_v9 = vadd.f32 %v1134_v3, %v1118_v52  ;;  %v1217_v34 = vmul.f32 %v1216_v57, %v3450_v41  ;;  %v1220_v41 = vmul.f32 %v1216_v57, %v3462_v60 }
 0x232   :  { %1578 = vrot.lane.b32.xlu1 %v1569_v16, %s2793_s30  ;;  %1576 = vrot.lane.b32.xlu0 %v1568_v37, %s2793_s30  ;;  %v1595_v16 = vmul.f32 %v1592_v14, %v3721_v40  ;;  %v1218_v37 = vmul.f32 %v1216_v57, %v3444_v56  ;;  %v1210_v56 = vmul.f32 %v1207_v2, %v3426_v55 }
 0x233   :  { %v1623_v14 = vmul.f32 %v1619_v31, %v3679_v28 }
 0x234   :  { %v1159_v49 = vpop.permute.xlu1 %1158  ;;  %v1157_v26 = vpop.permute.xlu0 %1156 }
 0x235   :  { %v1169_v29 = vadd.f32 %v1159_v49, %v1142_v54  ;;  %v1168_v1 = vadd.f32 %v1157_v26, %v1141_v62  ;;  %v1620_v49 = vmul.f32 %v1619_v31, %v3668_v61  ;;  %v1647_v54 = vmul.f32 %v1644_v24, %v3721_v40 }
 0x236   :  { %1582 = vrot.lane.b32.xlu1 %v1571_v50, %s2793_s30  ;;  %1580 = vrot.lane.b32.xlu0 %v1570_v32, %s2793_s30 }
 0x238   :  { %v1163_v45 = vpop.permute.xlu1 %1162  ;;  %v1161_v20 = vpop.permute.xlu0 %1160 }
 0x239   :  { %v1171_v48 = vadd.f32 %v1163_v45, %v1144_v39  ;;  %v1170_v36 = vadd.f32 %v1161_v20, %v1143_v9  ;;  %v1671_v20 = vstv %s2660_s21  ;;  %s2684_s21 = sld [smem:[#allocation7 + $0x2b]] }
 0x23a   :  { %1603 = vrot.lane.b32.xlu1 %v1594_v27, %s2793_s30  ;;  %1601 = vrot.lane.b32.xlu0 %v1593_v7, %s2793_s30  ;;  %v1648_v27 = vmul.f32 %v1644_v24, %v3717_v15  ;;  %v1673_v25 = vmul.f32 %v1671_v20, %v3661_v33  ;;  %v1672_v2 = vmul.f32 %v1671_v20, %v3668_v61 }
 0x23b   :  { %v1674_v52 = vmul.f32 %v1671_v20, %v3684_v46 }
 0x23c   :  { %v1184_v30 = vpop.permute.xlu1 %1183  ;;  %v1182_v42 = vpop.permute.xlu0 %1181 }
 0x23d   :  { %v1194_v17 = vadd.f32 %v1184_v30, %v1169_v29  ;;  %v1193_v23 = vadd.f32 %v1182_v42, %v1168_v1  ;;  %v1675_v29 = vmul.f32 %v1671_v20, %v3679_v28  ;;  %v1696_v1 = vstv %s2661_s23  ;;  %s4179_s23 = sld [smem:[#allocation7 + $0x5c]] }
 0x23e   :  { %1607 = vrot.lane.b32.xlu1 %v1596_v13, %s2793_s30  ;;  %1605 = vrot.lane.b32.xlu0 %v1595_v16, %s2793_s30  ;;  %v1698_v13 = vmul.f32 %v1696_v1, %v3701_v51  ;;  %v1699_v16 = vmul.f32 %v1696_v1, %v3721_v40 }
 0x23f   :  { %v1213_v12 = vadd.f32 %v1209_v11, %v1194_v17  ;;  %v1212_v0 = vadd.f32 %v1208_v8, %v1193_v23  ;;  %v1697_v11 = vmul.f32 %v1696_v1, %v3707_v5  ;;  %v1700_v17 = vmul.f32 %v1696_v1, %v3717_v15 }
 0x240   :  { %v1188_v21 = vpop.permute.xlu1 %1187  ;;  %v1186_v18 = vpop.permute.xlu0 %1185  ;;  %v1723_v8 = vstv %s2662_s24  ;;  %s4202_s24 = sld [smem:[#allocation7 + $0x23]] }
 0x241   :  { %v3741_v35 = vadd.f32 %v1218_v37, %v1213_v12  ;;  %v1196_v3 = vadd.f32 %v1188_v21, %v1171_v48  ;;  %v3745_v50 = vadd.f32 %v1217_v34, %v1212_v0  ;;  %v1195_v38 = vadd.f32 %v1186_v18, %v1170_v36 }
 0x242   :  { %1630 = vrot.lane.b32.xlu1 %v1621_v44, %s2794_s5  ;;  %1628 = vrot.lane.b32.xlu0 %v1620_v49, %s2794_s5  ;;  %v1725_v23 = vmul.f32 %v1723_v8, %v3661_v33  ;;  %v1724_v37 = vmul.f32 %v1723_v8, %v3668_v61  ;;  %v1727_v36 = vmul.f32 %v1723_v8, %v3679_v28  ;;  %v1748_v21 = vstv %s2663_s25  ;;  %s4207_s25 = sld [smem:[#allocation7 + $0x54]] }
 0x243   :  { %v1215_v58 = vadd.f32 %v1211_v6, %v1196_v3  ;;  %v1214_v26 = vadd.f32 %v1210_v56, %v1195_v38  ;;  %v1726_v0 = vmul.f32 %v1723_v8, %v3684_v46  ;;  %v1750_v6 = vmul.f32 %v1748_v21, %v3701_v51 }
 0x244   :  { %v3751_v32 = vpop.permute.xlu1 %1238  ;;  %v3756_v55 = vpop.permute.xlu0 %1236  ;;  %v1749_v18 = vmul.f32 %v1748_v21, %v3707_v5  ;;  %v1752_v56 = vmul.f32 %v1748_v21, %v3717_v15 }
 0x245   :  { %v3754_v4 = vadd.f32 %v1220_v41, %v1215_v58  ;;  %v3760_v43 = vadd.f32 %v1219_v22, %v1214_v26  ;;  %v1751_v41 = vmul.f32 %v1748_v21, %v3721_v40  ;;  %v1775_v58 = vstv %s2664_s26  ;;  %s4212_s26 = sld [smem:[#allocation7 + $0x2c]] }
 0x246   :  { %1634 = vrot.lane.b32.xlu1 %v1623_v14, %s2794_s5  ;;  %1632 = vrot.lane.b32.xlu0 %v1622_v53, %s2794_s5  ;;  %v1777_v26 = vmul.f32 %v1775_v58, %v3661_v33  ;;  %v1776_v53 = vmul.f32 %v1775_v58, %v3668_v61 }
 0x248   :  { %v3764_v60 = vpop.permute.xlu1 %1242  ;;  %v3767_v59 = vpop.permute.xlu0 %1240 }
 0x24a   :  { %1655 = vrot.lane.b32.xlu1 %v1646_v63, %s2794_s5  ;;  %1653 = vrot.lane.b32.xlu0 %v1645_v47, %s2794_s5  ;;  %v1779_v63 = vmul.f32 %v1775_v58, %v3679_v28 }
 0x24c   :  { %v3772_v45 = vpop.permute.xlu1 %1263  ;;  %v3775_v19 = vpop.permute.xlu0 %1261 }
 0x24e   :  { %1659 = vrot.lane.b32.xlu1 %v1648_v27, %s2794_s5  ;;  %1657 = vrot.lane.b32.xlu0 %v1647_v54, %s2794_s5  ;;  %v1778_v27 = vmul.f32 %v1775_v58, %v3684_v46  ;;  %v1800_v54 = vstv %s2665_s0  ;;  %s4248_s0 = sld [smem:[#allocation7 + $0x5d]] }
 0x24f   :  { %v1804_v1 = vmul.f32 %v1800_v54, %v3717_v15 }
 0x250   :  { %v3780_v7 = vpop.permute.xlu1 %1267  ;;  %v3783_v62 = vpop.permute.xlu0 %1265 }
 0x252   :  { %1682 = vrot.lane.b32.xlu1 %v1673_v25, %s2795_s7  ;;  %1680 = vrot.lane.b32.xlu0 %v1672_v2, %s2795_s7  ;;  %v1802_v25 = vmul.f32 %v1800_v54, %v3701_v51 }
 0x254   :  { %v3788_v10 = vpop.permute.xlu1 %1290  ;;  %v3791_v57 = vpop.permute.xlu0 %1288 }
 0x256   :  { %1686 = vrot.lane.b32.xlu1 %v1675_v29, %s2795_s7  ;;  %1684 = vrot.lane.b32.xlu0 %v1674_v52, %s2795_s7  ;;  %v1801_v29 = vmul.f32 %v1800_v54, %v3707_v5 }
 0x258   :  { %v3796_v30 = vpop.permute.xlu1 %1294  ;;  %v3799_v31 = vpop.permute.xlu0 %1292 }
 0x25a   :  { %1707 = vrot.lane.b32.xlu1 %v1698_v13, %s2795_s7  ;;  %1705 = vrot.lane.b32.xlu0 %v1697_v11, %s2795_s7  ;;  %v1803_v11 = vmul.f32 %v1800_v54, %v3721_v40 }
 0x25c   :  { %v3804_v39 = vpop.permute.xlu1 %1315  ;;  %v3807_v42 = vpop.permute.xlu0 %1313 }
 0x25e   :  { %1711 = vrot.lane.b32.xlu1 %v1700_v17, %s2795_s7  ;;  %1709 = vrot.lane.b32.xlu0 %v1699_v16, %s2795_s7  ;;  %v1827_v17 = vstv %s2666_s27  ;;  %s2689_s27 = sld [smem:[#allocation7 + $0x5e]] }
 0x25f   :  { %v1829_v8 = vmul.f32 %v1827_v17, %v3661_v33 }
 0x260   :  { %v3812_v9 = vpop.permute.xlu1 %1319  ;;  %v3815_v48 = vpop.permute.xlu0 %1317 }
 0x262   :  { %1734 = vrot.lane.b32.xlu1 %v1725_v23, %s2796_s9  ;;  %1732 = vrot.lane.b32.xlu0 %v1724_v37, %s2796_s9  ;;  %v1828_v37 = vmul.f32 %v1827_v17, %v3668_v61 }
 0x264   :  { %v3820_v12 = vpop.permute.xlu1 %1342  ;;  %v3823_v34 = vpop.permute.xlu0 %1340 }
 0x266   :  { %1738 = vrot.lane.b32.xlu1 %v1727_v36, %s2796_s9  ;;  %1736 = vrot.lane.b32.xlu0 %v1726_v0, %s2796_s9  ;;  %v1831_v0 = vmul.f32 %v1827_v17, %v3679_v28 }
 0x268   :  { %v3828_v44 = vpop.permute.xlu1 %1346  ;;  %v3831_v3 = vpop.permute.xlu0 %1344 }
 0x26a   :  { %1759 = vrot.lane.b32.xlu1 %v1750_v6, %s2796_s9  ;;  %1757 = vrot.lane.b32.xlu0 %v1749_v18, %s2796_s9  ;;  %v1830_v6 = vmul.f32 %v1827_v17, %v3684_v46  ;;  %v1852_v18 = vstv %s2667_s28  ;;  %s2691_s28 = sld [smem:[#allocation7 + $0x5f]] }
 0x26c   :  { %v3836_v49 = vpop.permute.xlu1 %1367  ;;  %v3839_v38 = vpop.permute.xlu0 %1365 }
 0x26e   :  { %1763 = vrot.lane.b32.xlu1 %v1752_v56, %s2796_s9  ;;  %1761 = vrot.lane.b32.xlu0 %v1751_v41, %s2796_s9  ;;  %v1249_v56 = vadd.f32 %v3751_v32, %v3741_v35  ;;  %v1248_v41 = vadd.f32 %v3756_v55, %v3745_v50  ;;  %v1251_v35 = vadd.f32 %v3764_v60, %v3754_v4  ;;  %v3916_v4 = vld [vmem:[#allocation2 + $0xd] sm:$0xff]  ;;  %v1907_v60 = vstv %s2670_s29  ;;  %s2693_s29 = sld [smem:[#allocation7 + $0x60]] }
 0x26f   :  { %v1250_v50 = vadd.f32 %v3767_v59, %v3760_v43  ;;  %v3923_v59 = vld [vmem:[#allocation2 + $0x5] sm:$0xff] }
 0x270   :  { %v3844_v22 = vpop.permute.xlu1 %1371  ;;  %v3847_v14 = vpop.permute.xlu0 %1369  ;;  %v1273_v54 = vadd.f32 %v3775_v19, %v1248_v41 }
 0x272   :  { %1786 = vrot.lane.b32.xlu1 %v1777_v26, %s2797_s11  ;;  %1784 = vrot.lane.b32.xlu0 %v1776_v53, %s2797_s11  ;;  %v1854_v26 = vmul.f32 %v1852_v18, %v3701_v51  ;;  %v1274_v53 = vadd.f32 %v3772_v45, %v1249_v56  ;;  %v1300_v55 = vadd.f32 %v3791_v57, %v1273_v54 }
 0x274   :  { %v3852_v24 = vpop.permute.xlu1 %1394  ;;  %v3855_v47 = vpop.permute.xlu0 %1392  ;;  %v1301_v32 = vadd.f32 %v3788_v10, %v1274_v53  ;;  %v1275_v10 = vadd.f32 %v3783_v62, %v1250_v50  ;;  %v1325_v43 = vadd.f32 %v3807_v42, %v1300_v55  ;;  %v3956_v53 = vld [vmem:[#allocation2 + $0x3d] sm:$0xff] }
 0x276   :  { %1790 = vrot.lane.b32.xlu1 %v1779_v63, %s2797_s11  ;;  %1788 = vrot.lane.b32.xlu0 %v1778_v27, %s2797_s11  ;;  %v1853_v27 = vmul.f32 %v1852_v18, %v3707_v5  ;;  %v1326_v19 = vadd.f32 %v3804_v39, %v1301_v32  ;;  %v1302_v39 = vadd.f32 %v3799_v31, %v1275_v10  ;;  %v3939_v31 = vld [vmem:[#allocation2 + $0x1d] sm:$0xff] }
 0x277   :  { %v1352_v17 = vadd.f32 %v3823_v34, %v1325_v43 }
 0x278   :  { %v3860_v20 = vpop.permute.xlu1 %1398  ;;  %v3863_v2 = vpop.permute.xlu0 %1396  ;;  %v1353_v57 = vadd.f32 %v3820_v12, %v1326_v19 }
 0x279   :  { %v1377_v12 = vadd.f32 %v3839_v38, %v1352_v17 }
 0x27a   :  { %1811 = vrot.lane.b32.xlu1 %v1802_v25, %s2797_s11  ;;  %1809 = vrot.lane.b32.xlu0 %v1801_v29, %s2797_s11  ;;  %v1856_v25 = vmul.f32 %v1852_v18, %v3717_v15  ;;  %v1276_v29 = vadd.f32 %v3780_v7, %v1251_v35  ;;  %v1378_v42 = vadd.f32 %v3836_v49, %v1353_v57 }
 0x27c   :  { %v3868_v52 = vpop.permute.xlu1 %1419  ;;  %v3871_v13 = vpop.permute.xlu0 %1417  ;;  %v1303_v7 = vadd.f32 %v3796_v30, %v1276_v29  ;;  %v1327_v30 = vadd.f32 %v3815_v48, %v1302_v39  ;;  %v1405_v34 = vadd.f32 %v3852_v24, %v1378_v42  ;;  %v1404_v48 = vadd.f32 %v3855_v47, %v1377_v12  ;;  %v3962_v47 = vld [vmem:[#allocation2 + $0x35] sm:$0xff] }
 0x27d   :  { %v1910_v24 = vmul.f32 %v1907_v60, %v3939_v31 }
 0x27e   :  { %1815 = vrot.lane.b32.xlu1 %v1804_v1, %s2797_s11  ;;  %1813 = vrot.lane.b32.xlu0 %v1803_v11, %s2797_s11  ;;  %v1855_v11 = vmul.f32 %v1852_v18, %v3721_v40  ;;  %v1328_v62 = vadd.f32 %v3812_v9, %v1303_v7  ;;  %v3934_v18 = vld [vmem:[#allocation2 + $0x25] sm:$0xff]  ;;  %v1354_v49 = vadd.f32 %v3831_v3, %v1327_v30 }
 0x27f   :  { %v1911_v56 = vmul.f32 %v1907_v60, %v3934_v18  ;;  %v1429_v3 = vadd.f32 %v3871_v13, %v1404_v48 }
 0x280   :  { %v3876_v16 = vpop.permute.xlu1 %1423  ;;  %v3879_v23 = vpop.permute.xlu0 %1421  ;;  %v1355_v9 = vadd.f32 %v3828_v44, %v1328_v62  ;;  %v1379_v54 = vadd.f32 %v3847_v14, %v1354_v49 }
 0x282   :  { %1838 = vrot.lane.b32.xlu1 %v1829_v8, %s2798_s13  ;;  %1836 = vrot.lane.b32.xlu0 %v1828_v37, %s2798_s13  ;;  %v1909_v37 = vmul.f32 %v1907_v60, %v3916_v4  ;;  %v1380_v41 = vadd.f32 %v3844_v22, %v1355_v9 }
 0x284   :  { %v3884_v36 = vpop.permute.xlu1 %1446  ;;  %v3887_v21 = vpop.permute.xlu0 %1444  ;;  %v1407_v35 = vadd.f32 %v3860_v20, %v1380_v41  ;;  %v3972_v20 = vld [vmem:[#allocation2 + $0x55] sm:$0xff] }
 0x285   :  { %v1456_v32 = vadd.f32 %v3887_v21, %v1429_v3  ;;  %v3977_v21 = vld [vmem:[#allocation2 + $0x4d] sm:$0xff]  ;;  %v1984_v3 = vstv %s3989_s10 }
 0x286   :  { %1842 = vrot.lane.b32.xlu1 %v1831_v0, %s2798_s13  ;;  %1840 = vrot.lane.b32.xlu0 %v1830_v6, %s2798_s13  ;;  %v1908_v6 = vmul.f32 %v1907_v60, %v3923_v59  ;;  %v1432_v13 = vadd.f32 %v3876_v16, %v1407_v35  ;;  %v3982_v16 = vstv %s3946_s6  ;;  %v1986_v35 = vmul.f32 %v1984_v3, %v3956_v53 }
 0x288   :  { %v3896_v58 = vpop.permute.xlu1 %1450  ;;  %v3900_v63 = vpop.permute.xlu0 %1448 }
 0x28a   :  { %1863 = vrot.lane.b32.xlu1 %v1854_v26, %s2798_s13  ;;  %1861 = vrot.lane.b32.xlu0 %v1853_v27, %s2798_s13  ;;  %v1430_v26 = vadd.f32 %v3868_v52, %v1405_v34  ;;  %v1932_v27 = vstv %s3918_s3  ;;  %v1406_v52 = vadd.f32 %v3863_v2, %v1379_v54  ;;  %v1547_v2 = vstv %s3941_s4  ;;  %s2695_s3 = sld [smem:[#allocation7 + $0x61]]  ;;  %s2683_s4 = sld [smem:[#allocation7 + $0x5b]] }
 0x28b   :  { %v1934_v14 = vmul.f32 %v1932_v27, %v3956_v53  ;;  %v1933_v29 = vmul.f32 %v1932_v27, %v3962_v47  ;;  %v1936_v7 = vmul.f32 %v1932_v27, %v3972_v20  ;;  %v1549_v57 = vmul.f32 %v1547_v2, %v3661_v33 }
 0x28c   :  { %v1472_v45 = vpop.permute.xlu1 %1471  ;;  %v1470_v1 = vpop.permute.xlu0 %1469  ;;  %v1457_v22 = vadd.f32 %v3884_v36, %v1430_v26  ;;  %v1431_v36 = vadd.f32 %v3879_v23, %v1406_v52  ;;  %v1959_v23 = vstv %s3951_s8  ;;  %v1548_v62 = vmul.f32 %v1547_v2, %v3668_v61 }
 0x28d   :  { %v1481_v19 = vadd.f32 %v1470_v1, %v1456_v32  ;;  %v1557_v33 = vmul.f32 %v3982_v16, %v3707_v5  ;;  %v1961_v9 = vmul.f32 %v1959_v23, %v3916_v4  ;;  %v1960_v49 = vmul.f32 %v1959_v23, %v3923_v59 }
 0x28e   :  { %1867 = vrot.lane.b32.xlu1 %v1856_v25, %s2798_s13  ;;  %1865 = vrot.lane.b32.xlu0 %v1855_v11, %s2798_s13  ;;  %v1482_v55 = vadd.f32 %v1472_v45, %v1457_v22  ;;  %v1459_v11 = vadd.f32 %v3896_v58, %v1432_v13  ;;  %v1458_v45 = vadd.f32 %v3900_v63, %v1431_v36 }
 0x28f   :  { %v1560_v5 = vmul.f32 %v3982_v16, %v3717_v15  ;;  %v1962_v54 = vmul.f32 %v1959_v23, %v3939_v31  ;;  %v1985_v52 = vmul.f32 %v1984_v3, %v3962_v47  ;;  %v1987_v13 = vmul.f32 %v1984_v3, %v3977_v21 }
 0x290   :  { %v1476_v8 = vpop.permute.xlu1 %1475  ;;  %v1474_v0 = vpop.permute.xlu0 %1473 }
 0x291   :  { %v1484_v1 = vadd.f32 %v1476_v8, %v1459_v11  ;;  %v1483_v58 = vadd.f32 %v1474_v0, %v1458_v45  ;;  %v1551_v0 = vmul.f32 %v1547_v2, %v3679_v28  ;;  %v1559_v28 = vmul.f32 %v3982_v16, %v3721_v40 }
 0x292   :  { %1918 = vrot.lane.b32.xlu1 %v1909_v37, %s2793_s30  ;;  %1916 = vrot.lane.b32.xlu0 %v1908_v6, %s2793_s30  ;;  %v1935_v37 = vmul.f32 %v1932_v27, %v3977_v21 }
 0x294   :  { %v1499_v38 = vpop.permute.xlu1 %1498  ;;  %v1497_v44 = vpop.permute.xlu0 %1496 }
 0x295   :  { %v1509_v60 = vadd.f32 %v1499_v38, %v1482_v55  ;;  %v1508_v10 = vadd.f32 %v1497_v44, %v1481_v19  ;;  %v1550_v38 = vmul.f32 %v1547_v2, %v3684_v46  ;;  %v2011_v55 = vstv %s2674_s12 }
 0x296   :  { %1922 = vrot.lane.b32.xlu1 %v1911_v56, %s2793_s30  ;;  %1920 = vrot.lane.b32.xlu0 %v1910_v24, %s2793_s30  ;;  %v1963_v24 = vmul.f32 %v1959_v23, %v3934_v18  ;;  %v2012_v19 = vmul.f32 %v2011_v55, %v3923_v59  ;;  %v2015_v11 = vmul.f32 %v2011_v55, %v3934_v18 }
 0x297   :  { %v2014_v45 = vmul.f32 %v2011_v55, %v3939_v31 }
 0x298   :  { %v1503_v50 = vpop.permute.xlu1 %1502  ;;  %v1501_v25 = vpop.permute.xlu0 %1500 }
 0x299   :  { %v1511_v63 = vadd.f32 %v1503_v50, %v1484_v1  ;;  %v1510_v8 = vadd.f32 %v1501_v25, %v1483_v58  ;;  %v1988_v50 = vmul.f32 %v1984_v3, %v3972_v20  ;;  %v2063_v58 = vstv %s2676_s15 }
 0x29a   :  { %1943 = vrot.lane.b32.xlu1 %v1934_v14, %s2793_s30  ;;  %1941 = vrot.lane.b32.xlu0 %v1933_v29, %s2793_s30  ;;  %v2013_v29 = vmul.f32 %v2011_v55, %v3916_v4 }
 0x29c   :  { %v1524_v43 = vpop.permute.xlu1 %1523  ;;  %v1522_v17 = vpop.permute.xlu0 %1521 }
 0x29d   :  { %v1534_v39 = vadd.f32 %v1524_v43, %v1509_v60  ;;  %v1533_v42 = vadd.f32 %v1522_v17, %v1508_v10  ;;  %v2036_v10 = vstv %s2675_s14 }
 0x29e   :  { %1947 = vrot.lane.b32.xlu1 %v1936_v7, %s2793_s30  ;;  %1945 = vrot.lane.b32.xlu0 %v1935_v37, %s2793_s30  ;;  %v2038_v7 = vmul.f32 %v2036_v10, %v3956_v53  ;;  %v2037_v1 = vmul.f32 %v2036_v10, %v3962_v47  ;;  %v2039_v37 = vmul.f32 %v2036_v10, %v3977_v21 }
 0x29f   :  { %v3993_v6 = vadd.f32 %v1549_v57, %v1534_v39  ;;  %v1552_v30 = vadd.f32 %v1548_v62, %v1533_v42  ;;  %v2040_v39 = vmul.f32 %v2036_v10, %v3972_v20  ;;  %v2065_v42 = vmul.f32 %v2063_v58, %v3916_v4 }
 0x2a0   :  { %v1528_v12 = vpop.permute.xlu1 %1527  ;;  %v1526_v61 = vpop.permute.xlu0 %1525 }
 0x2a1   :  { %v1536_v34 = vadd.f32 %v1528_v12, %v1511_v63  ;;  %v4001_v48 = vadd.f32 %v1557_v33, %v1552_v30  ;;  %v1535_v56 = vadd.f32 %v1526_v61, %v1510_v8  ;;  %v2064_v8 = vmul.f32 %v2063_v58, %v3923_v59 }
 0x2a2   :  { %1970 = vrot.lane.b32.xlu1 %v1961_v9, %s2794_s5  ;;  %1968 = vrot.lane.b32.xlu0 %v1960_v49, %s2794_s5  ;;  %v2067_v30 = vmul.f32 %v2063_v58, %v3934_v18  ;;  %v2066_v9 = vmul.f32 %v2063_v58, %v3939_v31  ;;  %v2167_v58 = vstv %s2680_s19 }
 0x2a3   :  { %v1555_v41 = vadd.f32 %v1551_v0, %v1536_v34  ;;  %v1554_v26 = vadd.f32 %v1550_v38, %v1535_v56  ;;  %v2088_v0 = vstv %s2677_s16 }
 0x2a4   :  { %v4010_v44 = vpop.permute.xlu1 %1578  ;;  %v4015_v46 = vpop.permute.xlu0 %1576  ;;  %v2090_v61 = vmul.f32 %v2088_v0, %v3956_v53  ;;  %v2089_v38 = vmul.f32 %v2088_v0, %v3962_v47 }
 0x2a5   :  { %v4013_v27 = vadd.f32 %v1560_v5, %v1555_v41  ;;  %v4019_v15 = vadd.f32 %v1559_v28, %v1554_v26  ;;  %v2092_v5 = vmul.f32 %v2088_v0, %v3972_v20  ;;  %v2091_v28 = vmul.f32 %v2088_v0, %v3977_v21 }
 0x2a6   :  { %1974 = vrot.lane.b32.xlu1 %v1963_v24, %s2794_s5  ;;  %1972 = vrot.lane.b32.xlu0 %v1962_v54, %s2794_s5  ;;  %v2115_v26 = vstv %s2678_s17  ;;  %v1558_v0 = vmul.f32 %v3982_v16, %v3701_v51  ;;  %v1588_v51 = vadd.f32 %v4015_v46, %v4001_v48 }
 0x2a7   :  { %v2117_v54 = vmul.f32 %v2115_v26, %v3916_v4  ;;  %v2118_v55 = vmul.f32 %v2115_v26, %v3939_v31 }
 0x2a8   :  { %v4023_v40 = vpop.permute.xlu1 %1582  ;;  %v4026_v22 = vpop.permute.xlu0 %1580 }
 0x2a9   :  { %v1590_v48 = vadd.f32 %v4026_v22, %v4019_v15  ;;  %v4184_v22 = vld [vmem:[#allocation2 + $0x6] sm:$0xff] }
 0x2aa   :  { %1995 = vrot.lane.b32.xlu1 %v1986_v35, %s2794_s5  ;;  %1993 = vrot.lane.b32.xlu0 %v1985_v52, %s2794_s5  ;;  %v2116_v35 = vmul.f32 %v2115_v26, %v3923_v59 }
 0x2ac   :  { %v4031_v32 = vpop.permute.xlu1 %1603  ;;  %v4034_v14 = vpop.permute.xlu0 %1601 }
 0x2ae   :  { %1999 = vrot.lane.b32.xlu1 %v1988_v50, %s2794_s5  ;;  %1997 = vrot.lane.b32.xlu0 %v1987_v13, %s2794_s5  ;;  %v2119_v50 = vmul.f32 %v2115_v26, %v3934_v18  ;;  %v2170_v26 = vmul.f32 %v2167_v58, %v3939_v31 }
 0x2b0   :  { %v4039_v25 = vpop.permute.xlu1 %1607  ;;  %v4042_v36 = vpop.permute.xlu0 %1605 }
 0x2b2   :  { %2022 = vrot.lane.b32.xlu1 %v2013_v29, %s2795_s7  ;;  %2020 = vrot.lane.b32.xlu0 %v2012_v19, %s2795_s7  ;;  %v2140_v29 = vstv %s2679_s18 }
 0x2b3   :  { %v2141_v10 = vmul.f32 %v2140_v29, %v3962_v47 }
 0x2b4   :  { %v4047_v2 = vpop.permute.xlu1 %1630  ;;  %v4050_v60 = vpop.permute.xlu0 %1628 }
 0x2b6   :  { %2026 = vrot.lane.b32.xlu1 %v2015_v11, %s2795_s7  ;;  %2024 = vrot.lane.b32.xlu0 %v2014_v45, %s2795_s7  ;;  %v2142_v11 = vmul.f32 %v2140_v29, %v3956_v53 }
 0x2b8   :  { %v4055_v43 = vpop.permute.xlu1 %1634  ;;  %v4058_v23 = vpop.permute.xlu0 %1632 }
 0x2ba   :  { %2047 = vrot.lane.b32.xlu1 %v2038_v7, %s2795_s7  ;;  %2045 = vrot.lane.b32.xlu0 %v2037_v1, %s2795_s7  ;;  %v2144_v1 = vmul.f32 %v2140_v29, %v3972_v20 }
 0x2bc   :  { %v4063_v57 = vpop.permute.xlu1 %1655  ;;  %v4066_v17 = vpop.permute.xlu0 %1653 }
 0x2be   :  { %2051 = vrot.lane.b32.xlu1 %v2040_v39, %s2795_s7  ;;  %2049 = vrot.lane.b32.xlu0 %v2039_v37, %s2795_s7  ;;  %v2143_v37 = vmul.f32 %v2140_v29, %v3977_v21 }
 0x2c0   :  { %v4071_v62 = vpop.permute.xlu1 %1659  ;;  %v4074_v63 = vpop.permute.xlu0 %1657 }
 0x2c2   :  { %2074 = vrot.lane.b32.xlu1 %v2065_v42, %s2796_s9  ;;  %2072 = vrot.lane.b32.xlu0 %v2064_v8, %s2796_s9  ;;  %v2169_v8 = vmul.f32 %v2167_v58, %v3916_v4 }
 0x2c4   :  { %v4079_v33 = vpop.permute.xlu1 %1682  ;;  %v4082_v12 = vpop.permute.xlu0 %1680 }
 0x2c6   :  { %2078 = vrot.lane.b32.xlu1 %v2067_v30, %s2796_s9  ;;  %2076 = vrot.lane.b32.xlu0 %v2066_v9, %s2796_s9  ;;  %v2168_v9 = vmul.f32 %v2167_v58, %v3923_v59 }
 0x2c8   :  { %v4087_v34 = vpop.permute.xlu1 %1686  ;;  %v4090_v49 = vpop.permute.xlu0 %1684 }
 0x2ca   :  { %2099 = vrot.lane.b32.xlu1 %v2090_v61, %s2796_s9  ;;  %2097 = vrot.lane.b32.xlu0 %v2089_v38, %s2796_s9  ;;  %v2171_v38 = vmul.f32 %v2167_v58, %v3934_v18 }
 0x2cc   :  { %v4095_v56 = vpop.permute.xlu1 %1707  ;;  %v4098_v41 = vpop.permute.xlu0 %1705 }
 0x2ce   :  { %2103 = vrot.lane.b32.xlu1 %v2092_v5, %s2796_s9  ;;  %2101 = vrot.lane.b32.xlu0 %v2091_v28, %s2796_s9  ;;  %v1562_v5 = vadd.f32 %v1558_v0, %v3993_v6 }
 0x2d0   :  { %v4103_v24 = vpop.permute.xlu1 %1711  ;;  %v4106_v3 = vpop.permute.xlu0 %1709 }
 0x2d2   :  { %2126 = vrot.lane.b32.xlu1 %v2117_v54, %s2797_s11  ;;  %2124 = vrot.lane.b32.xlu0 %v2116_v35, %s2797_s11  ;;  %v2192_v54 = vstv %s2681_s20  ;;  %v1589_v35 = vadd.f32 %v4010_v44, %v1562_v5  ;;  %v1591_v44 = vadd.f32 %v4023_v40, %v4013_v27  ;;  %v4177_v27 = vld [vmem:[#allocation2 + $0xe] sm:$0xff]  ;;  %v2247_v40 = vstv %s2684_s21 }
 0x2d3   :  { %v2193_v29 = vmul.f32 %v2192_v54, %v3962_v47 }
 0x2d4   :  { %v4111_v52 = vpop.permute.xlu1 %1734  ;;  %v4114_v13 = vpop.permute.xlu0 %1732  ;;  %v1614_v6 = vadd.f32 %v4031_v32, %v1589_v35 }
 0x2d6   :  { %2130 = vrot.lane.b32.xlu1 %v2119_v50, %s2797_s11  ;;  %2128 = vrot.lane.b32.xlu0 %v2118_v55, %s2797_s11  ;;  %v2194_v50 = vmul.f32 %v2192_v54, %v3956_v53 }
 0x2d8   :  { %v4119_v19 = vpop.permute.xlu1 %1738  ;;  %v4122_v45 = vpop.permute.xlu0 %1736 }
 0x2da   :  { %2151 = vrot.lane.b32.xlu1 %v2142_v11, %s2797_s11  ;;  %2149 = vrot.lane.b32.xlu0 %v2141_v10, %s2797_s11  ;;  %v1613_v11 = vadd.f32 %v4034_v14, %v1588_v51  ;;  %v1641_v10 = vadd.f32 %v4047_v2, %v1614_v6  ;;  %v1615_v2 = vadd.f32 %v4042_v36, %v1590_v48  ;;  %v4217_v6 = vld [vmem:[#allocation2 + $0x3e] sm:$0xff] }
 0x2dc   :  { %v4127_v7 = vpop.permute.xlu1 %1759  ;;  %v4130_v39 = vpop.permute.xlu0 %1757  ;;  %v1640_v46 = vadd.f32 %v4050_v60, %v1613_v11  ;;  %v1666_v14 = vadd.f32 %v4063_v57, %v1641_v10  ;;  %v1642_v57 = vadd.f32 %v4058_v23, %v1615_v2  ;;  %v4200_v23 = vld [vmem:[#allocation2 + $0x1e] sm:$0xff] }
 0x2de   :  { %2155 = vrot.lane.b32.xlu1 %v2144_v1, %s2797_s11  ;;  %2153 = vrot.lane.b32.xlu0 %v2143_v37, %s2797_s11  ;;  %v2196_v1 = vmul.f32 %v2192_v54, %v3972_v20  ;;  %v1616_v37 = vadd.f32 %v4039_v25, %v1591_v44  ;;  %v1665_v15 = vadd.f32 %v4066_v17, %v1640_v46 }
 0x2df   :  { %v1693_v60 = vadd.f32 %v4079_v33, %v1666_v14 }
 0x2e0   :  { %v4135_v42 = vpop.permute.xlu1 %1763  ;;  %v4138_v30 = vpop.permute.xlu0 %1761  ;;  %v1643_v25 = vadd.f32 %v4055_v43, %v1616_v37  ;;  %v1667_v43 = vadd.f32 %v4074_v63, %v1642_v57 }
 0x2e1   :  { %v1718_v17 = vadd.f32 %v4095_v56, %v1693_v60  ;;  %v2299_v60 = vstv %s4212_s26 }
 0x2e2   :  { %2178 = vrot.lane.b32.xlu1 %v2169_v8, %s2798_s13  ;;  %2176 = vrot.lane.b32.xlu0 %v2168_v9, %s2798_s13  ;;  %v2195_v8 = vmul.f32 %v2192_v54, %v3977_v21  ;;  %v1692_v9 = vadd.f32 %v4082_v12, %v1665_v15  ;;  %v1668_v36 = vadd.f32 %v4071_v62, %v1643_v25  ;;  %v4195_v54 = vld [vmem:[#allocation2 + $0x26] sm:$0xff] }
 0x2e3   :  { %v1745_v12 = vadd.f32 %v4111_v52, %v1718_v17  ;;  %v1694_v56 = vadd.f32 %v4090_v49, %v1667_v43  ;;  %v2251_v35 = vmul.f32 %v2247_v40, %v4195_v54  ;;  %v2250_v52 = vmul.f32 %v2247_v40, %v4200_v23 }
 0x2e4   :  { %v4145_v61 = vpop.permute.xlu1 %1786  ;;  %v4149_v28 = vpop.permute.xlu0 %1784  ;;  %v1717_v33 = vadd.f32 %v4098_v41, %v1692_v9  ;;  %v1695_v62 = vadd.f32 %v4087_v34, %v1668_v36 }
 0x2e5   :  { %v1719_v11 = vadd.f32 %v4106_v3, %v1694_v56 }
 0x2e6   :  { %2182 = vrot.lane.b32.xlu1 %v2171_v38, %s2798_s13  ;;  %2180 = vrot.lane.b32.xlu0 %v2170_v26, %s2798_s13  ;;  %v2249_v38 = vmul.f32 %v2247_v40, %v4177_v27  ;;  %v2248_v26 = vmul.f32 %v2247_v40, %v4184_v22  ;;  %v1744_v63 = vadd.f32 %v4114_v13, %v1717_v33  ;;  %v4223_v13 = vld [vmem:[#allocation2 + $0x36] sm:$0xff] }
 0x2e7   :  { %v1720_v51 = vadd.f32 %v4103_v24, %v1695_v62  ;;  %v2301_v62 = vmul.f32 %v2299_v60, %v4177_v27 }
 0x2e8   :  { %v4157_v16 = vpop.permute.xlu1 %1790  ;;  %v4161_v55 = vpop.permute.xlu0 %1788  ;;  %v1769_v49 = vadd.f32 %v4130_v39, %v1744_v63  ;;  %v2300_v63 = vmul.f32 %v2299_v60, %v4184_v22 }
 0x2e9   :  { %v1747_v44 = vadd.f32 %v4119_v19, %v1720_v51  ;;  %v4233_v19 = vld [vmem:[#allocation2 + $0x56] sm:$0xff] }
 0x2ea   :  { %2203 = vrot.lane.b32.xlu1 %v2194_v50, %s2798_s13  ;;  %2201 = vrot.lane.b32.xlu0 %v2193_v29, %s2798_s13  ;;  %v1770_v50 = vadd.f32 %v4127_v7, %v1745_v12  ;;  %v2272_v29 = vstv %s4179_s23  ;;  %v1746_v7 = vadd.f32 %v4122_v45, %v1719_v11  ;;  %v1796_v10 = vadd.f32 %v4149_v28, %v1769_v49  ;;  %v4238_v28 = vld [vmem:[#allocation2 + $0x4e] sm:$0xff] }
 0x2eb   :  { %v2274_v3 = vmul.f32 %v2272_v29, %v4217_v6  ;;  %v1772_v39 = vadd.f32 %v4135_v42, %v1747_v44  ;;  %v2273_v37 = vmul.f32 %v2272_v29, %v4223_v13  ;;  %v1887_v45 = vstv %s4202_s24 }
 0x2ec   :  { %v1812_v32 = vpop.permute.xlu1 %1811  ;;  %v1810_v58 = vpop.permute.xlu0 %1809  ;;  %v1797_v24 = vadd.f32 %v4145_v61, %v1770_v50  ;;  %v1771_v61 = vadd.f32 %v4138_v30, %v1746_v7  ;;  %v1896_v42 = vstv %s4207_s25  ;;  %v2276_v25 = vmul.f32 %v2272_v29, %v4233_v19 }
 0x2ed   :  { %v1821_v14 = vadd.f32 %v1810_v58, %v1796_v10  ;;  %v1889_v58 = vmul.f32 %v1887_v45, %v3916_v4  ;;  %v1888_v36 = vmul.f32 %v1887_v45, %v3923_v59  ;;  %v1897_v12 = vmul.f32 %v1896_v42, %v3962_v47 }
 0x2ee   :  { %2207 = vrot.lane.b32.xlu1 %v2196_v1, %s2798_s13  ;;  %2205 = vrot.lane.b32.xlu0 %v2195_v8, %s2798_s13  ;;  %v1822_v46 = vadd.f32 %v1812_v32, %v1797_v24  ;;  %v1799_v8 = vadd.f32 %v4157_v16, %v1772_v39  ;;  %v1798_v32 = vadd.f32 %v4161_v55, %v1771_v61  ;;  %v2324_v24 = vstv %s4248_s0 }
 0x2ef   :  { %v2302_v44 = vmul.f32 %v2299_v60, %v4200_v23 }
 0x2f0   :  { %v1816_v0 = vpop.permute.xlu1 %1815  ;;  %v1814_v5 = vpop.permute.xlu0 %1813 }
 0x2f1   :  { %v1824_v30 = vadd.f32 %v1816_v0, %v1799_v8  ;;  %v1823_v16 = vadd.f32 %v1814_v5, %v1798_v32  ;;  %v1898_v0 = vmul.f32 %v1896_v42, %v3956_v53  ;;  %v1891_v5 = vmul.f32 %v1887_v45, %v3934_v18 }
 0x2f2   :  { %2258 = vrot.lane.b32.xlu1 %v2249_v38, %s2793_s30  ;;  %2256 = vrot.lane.b32.xlu0 %v2248_v26, %s2793_s30  ;;  %v2275_v38 = vmul.f32 %v2272_v29, %v4238_v28  ;;  %v2303_v18 = vmul.f32 %v2299_v60, %v4195_v54  ;;  %v1899_v29 = vmul.f32 %v1896_v42, %v3977_v21 }
 0x2f3   :  { %v2325_v21 = vmul.f32 %v2324_v24, %v4223_v13 }
 0x2f4   :  { %v1839_v41 = vpop.permute.xlu1 %1838  ;;  %v1837_v34 = vpop.permute.xlu0 %1836 }
 0x2f5   :  { %v1849_v40 = vadd.f32 %v1839_v41, %v1822_v46  ;;  %v1848_v2 = vadd.f32 %v1837_v34, %v1821_v14  ;;  %v1900_v34 = vmul.f32 %v1896_v42, %v3972_v20 }
 0x2f6   :  { %2262 = vrot.lane.b32.xlu1 %v2251_v35, %s2793_s30  ;;  %2260 = vrot.lane.b32.xlu0 %v2250_v52, %s2793_s30  ;;  %v1890_v35 = vmul.f32 %v1887_v45, %v3939_v31  ;;  %v2327_v45 = vmul.f32 %v2324_v24, %v4238_v28 }
 0x2f8   :  { %v1843_v48 = vpop.permute.xlu1 %1842  ;;  %v1841_v1 = vpop.permute.xlu0 %1840 }
 0x2f9   :  { %v1851_v55 = vadd.f32 %v1843_v48, %v1824_v30  ;;  %v1850_v43 = vadd.f32 %v1841_v1, %v1823_v16  ;;  %v2326_v48 = vmul.f32 %v2324_v24, %v4217_v6  ;;  %v2376_v16 = vstv %s2689_s27 }
 0x2fa   :  { %2283 = vrot.lane.b32.xlu1 %v2274_v3, %s2793_s30  ;;  %2281 = vrot.lane.b32.xlu0 %v2273_v37, %s2793_s30  ;;  %v2328_v37 = vmul.f32 %v2324_v24, %v4233_v19 }
 0x2fc   :  { %v1864_v15 = vpop.permute.xlu1 %1863  ;;  %v1862_v9 = vpop.permute.xlu0 %1861 }
 0x2fd   :  { %v1874_v57 = vadd.f32 %v1864_v15, %v1849_v40  ;;  %v1873_v17 = vadd.f32 %v1862_v9, %v1848_v2 }
 0x2fe   :  { %2287 = vrot.lane.b32.xlu1 %v2276_v25, %s2793_s30  ;;  %2285 = vrot.lane.b32.xlu0 %v2275_v38, %s2793_s30  ;;  %s2688_s30 = sld [smem:[#allocation7 + $0x2d]] }
 0x2ff   :  { %v1893_v26 = vadd.f32 %v1889_v58, %v1874_v57  ;;  %v1892_v4 = vadd.f32 %v1888_v36, %v1873_v17 }
 0x300   :  { %v1868_v33 = vpop.permute.xlu1 %1867  ;;  %v1866_v59 = vpop.permute.xlu0 %1865 }
 0x301   :  { %v1876_v56 = vadd.f32 %v1868_v33, %v1851_v55  ;;  %v1902_v41 = vadd.f32 %v1898_v0, %v1893_v26  ;;  %v1875_v51 = vadd.f32 %v1866_v59, %v1850_v43  ;;  %v1901_v53 = vadd.f32 %v1897_v12, %v1892_v4 }
 0x302   :  { %2310 = vrot.lane.b32.xlu1 %v2301_v62, %s2794_s5  ;;  %2308 = vrot.lane.b32.xlu0 %v2300_v63, %s2794_s5  ;;  %v2378_v55 = vmul.f32 %v2376_v16, %v4217_v6  ;;  %v2377_v43 = vmul.f32 %v2376_v16, %v4223_v13  ;;  %v2380_v62 = vmul.f32 %v2376_v16, %v4233_v19 }
 0x303   :  { %v1895_v50 = vadd.f32 %v1891_v5, %v1876_v56  ;;  %v1894_v47 = vadd.f32 %v1890_v35, %v1875_v51  ;;  %v2379_v56 = vmul.f32 %v2376_v16, %v4238_v28 }
 0x304   :  { %v1919_v52 = vpop.permute.xlu1 %1918  ;;  %v1917_v49 = vpop.permute.xlu0 %1916  ;;  %v2351_v8 = vstv %s2688_s30 }
 0x305   :  { %v1929_v11 = vadd.f32 %v1919_v52, %v1902_v41  ;;  %v1904_v31 = vadd.f32 %v1900_v34, %v1895_v50  ;;  %v1928_v7 = vadd.f32 %v1917_v49, %v1901_v53  ;;  %v1903_v10 = vadd.f32 %v1899_v29, %v1894_v47 }
 0x306   :  { %2314 = vrot.lane.b32.xlu1 %v2303_v18, %s2794_s5  ;;  %2312 = vrot.lane.b32.xlu0 %v2302_v44, %s2794_s5  ;;  %v2353_v32 = vmul.f32 %v2351_v8, %v4177_v27  ;;  %v2352_v25 = vmul.f32 %v2351_v8, %v4184_v22  ;;  %v2355_v58 = vmul.f32 %v2351_v8, %v4195_v54  ;;  %v2428_v49 = vstv %s2691_s28 }
 0x307   :  { %v2354_v38 = vmul.f32 %v2351_v8, %v4200_v23  ;;  %v2430_v24 = vmul.f32 %v2428_v49, %v4217_v6 }
 0x308   :  { %v1923_v20 = vpop.permute.xlu1 %1922  ;;  %v1921_v39 = vpop.permute.xlu0 %1920 }
 0x309   :  { %v1931_v3 = vadd.f32 %v1923_v20, %v1904_v31  ;;  %v1930_v46 = vadd.f32 %v1921_v39, %v1903_v10  ;;  %v2429_v20 = vmul.f32 %v2428_v49, %v4223_v13  ;;  %v2432_v39 = vmul.f32 %v2428_v49, %v4233_v19 }
 0x30a   :  { %2335 = vrot.lane.b32.xlu1 %v2326_v48, %s2794_s5  ;;  %2333 = vrot.lane.b32.xlu0 %v2325_v21, %s2794_s5 }
 0x30c   :  { %v1944_v1 = vpop.permute.xlu1 %1943  ;;  %v1942_v14 = vpop.permute.xlu0 %1941 }
 0x30d   :  { %v1954_v61 = vadd.f32 %v1944_v1, %v1929_v11  ;;  %v1953_v40 = vadd.f32 %v1942_v14, %v1928_v7  ;;  %v2431_v1 = vmul.f32 %v2428_v49, %v4238_v28 }
 0x30e   :  { %2339 = vrot.lane.b32.xlu1 %v2328_v37, %s2794_s5  ;;  %2337 = vrot.lane.b32.xlu0 %v2327_v45, %s2794_s5  ;;  %s2690_s5 = sld [smem:[#allocation7 + $0x2e]] }
 0x310   :  { %v1948_v42 = vpop.permute.xlu1 %1947  ;;  %v1946_v15 = vpop.permute.xlu0 %1945 }
 0x311   :  { %v1956_v2 = vadd.f32 %v1948_v42, %v1931_v3  ;;  %v1955_v60 = vadd.f32 %v1946_v15, %v1930_v46 }
 0x312   :  { %2362 = vrot.lane.b32.xlu1 %v2353_v32, %s2795_s7  ;;  %2360 = vrot.lane.b32.xlu0 %v2352_v25, %s2795_s7 }
 0x314   :  { %v1971_v30 = vpop.permute.xlu1 %1970  ;;  %v1969_v9 = vpop.permute.xlu0 %1968  ;;  %v2403_v59 = vstv %s2690_s5 }
 0x315   :  { %v1981_v57 = vadd.f32 %v1971_v30, %v1954_v61  ;;  %v1980_v36 = vadd.f32 %v1969_v9, %v1953_v40  ;;  %v2405_v35 = vmul.f32 %v2403_v59, %v4177_v27  ;;  %v2404_v50 = vmul.f32 %v2403_v59, %v4184_v22 }
 0x316   :  { %2366 = vrot.lane.b32.xlu1 %v2355_v58, %s2795_s7  ;;  %2364 = vrot.lane.b32.xlu0 %v2354_v38, %s2795_s7  ;;  %v2407_v52 = vmul.f32 %v2403_v59, %v4195_v54  ;;  %v2406_v11 = vmul.f32 %v2403_v59, %v4200_v23  ;;  %v2480_v58 = vstv %s2693_s29 }
 0x317   :  { %v2482_v38 = vmul.f32 %v2480_v58, %v4217_v6 }
 0x318   :  { %v1975_v17 = vpop.permute.xlu1 %1974  ;;  %v1973_v0 = vpop.permute.xlu0 %1972 }
 0x319   :  { %v1983_v26 = vadd.f32 %v1975_v17, %v1956_v2  ;;  %v1982_v4 = vadd.f32 %v1973_v0, %v1955_v60  ;;  %v2481_v17 = vmul.f32 %v2480_v58, %v4223_v13  ;;  %v2484_v0 = vmul.f32 %v2480_v58, %v4233_v19 }
 0x31a   :  { %2387 = vrot.lane.b32.xlu1 %v2378_v55, %s2795_s7  ;;  %2385 = vrot.lane.b32.xlu0 %v2377_v43, %s2795_s7 }
 0x31c   :  { %v1996_v33 = vpop.permute.xlu1 %1995  ;;  %v1994_v5 = vpop.permute.xlu0 %1993 }
 0x31d   :  { %v2006_v12 = vadd.f32 %v1996_v33, %v1981_v57  ;;  %v2005_v63 = vadd.f32 %v1994_v5, %v1980_v36  ;;  %v2483_v33 = vmul.f32 %v2480_v58, %v4238_v28 }
 0x31e   :  { %2391 = vrot.lane.b32.xlu1 %v2380_v62, %s2795_s7  ;;  %2389 = vrot.lane.b32.xlu0 %v2379_v56, %s2795_s7  ;;  %s2692_s7 = sld [smem:[#allocation7 + $0x2f]] }
 0x320   :  { %v2000_v41 = vpop.permute.xlu1 %1999  ;;  %v1998_v53 = vpop.permute.xlu0 %1997 }
 0x321   :  { %v2008_v51 = vadd.f32 %v2000_v41, %v1983_v26  ;;  %v2007_v34 = vadd.f32 %v1998_v53, %v1982_v4 }
 0x322   :  { %2414 = vrot.lane.b32.xlu1 %v2405_v35, %s2796_s9  ;;  %2412 = vrot.lane.b32.xlu0 %v2404_v50, %s2796_s9 }
 0x324   :  { %v2023_v47 = vpop.permute.xlu1 %2022  ;;  %v2021_v29 = vpop.permute.xlu0 %2020  ;;  %v2455_v37 = vstv %s2692_s7 }
 0x325   :  { %v2033_v18 = vadd.f32 %v2023_v47, %v2006_v12  ;;  %v2032_v44 = vadd.f32 %v2021_v29, %v2005_v63  ;;  %v2457_v45 = vmul.f32 %v2455_v37, %v4177_v27  ;;  %v2456_v42 = vmul.f32 %v2455_v37, %v4184_v22 }
 0x326   :  { %2418 = vrot.lane.b32.xlu1 %v2407_v52, %s2796_s9  ;;  %2416 = vrot.lane.b32.xlu0 %v2406_v11, %s2796_s9  ;;  %v2459_v15 = vmul.f32 %v2455_v37, %v4195_v54  ;;  %v2458_v30 = vmul.f32 %v2455_v37, %v4200_v23  ;;  %v2532_v52 = vstv %s2695_s3 }
 0x327   :  { %v2534_v11 = vmul.f32 %v2532_v52, %v4217_v6 }
 0x328   :  { %v2027_v31 = vpop.permute.xlu1 %2026  ;;  %v2025_v10 = vpop.permute.xlu0 %2024 }
 0x329   :  { %v2035_v7 = vadd.f32 %v2027_v31, %v2008_v51  ;;  %v2034_v48 = vadd.f32 %v2025_v10, %v2007_v34  ;;  %v2533_v31 = vmul.f32 %v2532_v52, %v4223_v13  ;;  %v2536_v10 = vmul.f32 %v2532_v52, %v4233_v19 }
 0x32a   :  { %2439 = vrot.lane.b32.xlu1 %v2430_v24, %s2796_s9  ;;  %2437 = vrot.lane.b32.xlu0 %v2429_v20, %s2796_s9 }
 0x32c   :  { %v2048_v3 = vpop.permute.xlu1 %2047  ;;  %v2046_v46 = vpop.permute.xlu0 %2045 }
 0x32d   :  { %v2058_v21 = vadd.f32 %v2048_v3, %v2033_v18  ;;  %v2057_v61 = vadd.f32 %v2046_v46, %v2032_v44  ;;  %v2535_v3 = vmul.f32 %v2532_v52, %v4238_v28 }
 0x32e   :  { %2443 = vrot.lane.b32.xlu1 %v2432_v39, %s2796_s9  ;;  %2441 = vrot.lane.b32.xlu0 %v2431_v1, %s2796_s9  ;;  %s2694_s9 = sld [smem:[#allocation7 + $0x30]] }
 0x330   :  { %v2052_v14 = vpop.permute.xlu1 %2051  ;;  %v2050_v40 = vpop.permute.xlu0 %2049 }
 0x331   :  { %v2060_v8 = vadd.f32 %v2052_v14, %v2035_v7  ;;  %v2059_v32 = vadd.f32 %v2050_v40, %v2034_v48 }
 0x332   :  { %2466 = vrot.lane.b32.xlu1 %v2457_v45, %s2797_s11  ;;  %2464 = vrot.lane.b32.xlu0 %v2456_v42, %s2797_s11 }
 0x334   :  { %v2075_v2 = vpop.permute.xlu1 %2074  ;;  %v2073_v60 = vpop.permute.xlu0 %2072  ;;  %v2507_v62 = vstv %s2694_s9 }
 0x335   :  { %v2085_v25 = vadd.f32 %v2075_v2, %v2058_v21  ;;  %v2084_v57 = vadd.f32 %v2073_v60, %v2057_v61  ;;  %v2509_v56 = vmul.f32 %v2507_v62, %v4177_v27  ;;  %v2508_v41 = vmul.f32 %v2507_v62, %v4184_v22 }
 0x336   :  { %2470 = vrot.lane.b32.xlu1 %v2459_v15, %s2797_s11  ;;  %2468 = vrot.lane.b32.xlu0 %v2458_v30, %s2797_s11  ;;  %v2511_v53 = vmul.f32 %v2507_v62, %v4195_v54  ;;  %v2510_v47 = vmul.f32 %v2507_v62, %v4200_v23  ;;  %v2236_v60 = vstv %s2683_s4 }
 0x338   :  { %v2079_v9 = vpop.permute.xlu1 %2078  ;;  %v2077_v36 = vpop.permute.xlu0 %2076 }
 0x339   :  { %v2087_v16 = vadd.f32 %v2079_v9, %v2060_v8  ;;  %v2086_v55 = vadd.f32 %v2077_v36, %v2059_v32  ;;  %v2238_v36 = vmul.f32 %v2236_v60, %v4217_v6  ;;  %v2239_v6 = vmul.f32 %v2236_v60, %v4238_v28 }
 0x33a   :  { %2491 = vrot.lane.b32.xlu1 %v2482_v38, %s2797_s11  ;;  %2489 = vrot.lane.b32.xlu0 %v2481_v17, %s2797_s11 }
 0x33c   :  { %v2100_v26 = vpop.permute.xlu1 %2099  ;;  %v2098_v4 = vpop.permute.xlu0 %2097 }
 0x33d   :  { %v2110_v43 = vadd.f32 %v2100_v26, %v2085_v25  ;;  %v2109_v12 = vadd.f32 %v2098_v4, %v2084_v57  ;;  %v2237_v26 = vmul.f32 %v2236_v60, %v4223_v13 }
 0x33e   :  { %2495 = vrot.lane.b32.xlu1 %v2484_v0, %s2797_s11  ;;  %2493 = vrot.lane.b32.xlu0 %v2483_v33, %s2797_s11  ;;  %s2682_s11 = sld [smem:[#allocation7 + $0x2a]] }
 0x340   :  { %v2104_v5 = vpop.permute.xlu1 %2103  ;;  %v2102_v63 = vpop.permute.xlu0 %2101 }
 0x341   :  { %v2112_v59 = vadd.f32 %v2104_v5, %v2087_v16  ;;  %v2111_v35 = vadd.f32 %v2102_v63, %v2086_v55 }
 0x342   :  { %2518 = vrot.lane.b32.xlu1 %v2509_v56, %s2798_s13  ;;  %2516 = vrot.lane.b32.xlu0 %v2508_v41, %s2798_s13 }
 0x344   :  { %v2127_v51 = vpop.permute.xlu1 %2126  ;;  %v2125_v34 = vpop.permute.xlu0 %2124  ;;  %v2227_v15 = vstv %s2682_s11 }
 0x345   :  { %v2137_v50 = vadd.f32 %v2127_v51, %v2110_v43  ;;  %v2136_v18 = vadd.f32 %v2125_v34, %v2109_v12  ;;  %v2229_v30 = vmul.f32 %v2227_v15, %v4177_v27  ;;  %v2228_v9 = vmul.f32 %v2227_v15, %v4184_v22 }
 0x346   :  { %2522 = vrot.lane.b32.xlu1 %v2511_v53, %s2798_s13  ;;  %2520 = vrot.lane.b32.xlu0 %v2510_v47, %s2798_s13  ;;  %v2231_v0 = vmul.f32 %v2227_v15, %v4195_v54  ;;  %v2230_v62 = vmul.f32 %v2227_v15, %v4200_v23  ;;  %v2240_v22 = vmul.f32 %v2236_v60, %v4233_v19 }
 0x348   :  { %v2131_v29 = vpop.permute.xlu1 %2130  ;;  %v2129_v44 = vpop.permute.xlu0 %2128 }
 0x349   :  { %v2139_v49 = vadd.f32 %v2131_v29, %v2112_v59  ;;  %v2138_v24 = vadd.f32 %v2129_v44, %v2111_v35 }
 0x34a   :  { %2543 = vrot.lane.b32.xlu1 %v2534_v11, %s2798_s13  ;;  %2541 = vrot.lane.b32.xlu0 %v2533_v31, %s2798_s13 }
 0x34c   :  { %v2152_v7 = vpop.permute.xlu1 %2151  ;;  %v2150_v48 = vpop.permute.xlu0 %2149 }
 0x34d   :  { %v2162_v20 = vadd.f32 %v2152_v7, %v2137_v50  ;;  %v2161_v39 = vadd.f32 %v2150_v48, %v2136_v18 }
 0x34e   :  { %2547 = vrot.lane.b32.xlu1 %v2536_v10, %s2798_s13  ;;  %2545 = vrot.lane.b32.xlu0 %v2535_v3, %s2798_s13  ;;  %s2799_s13 = smov [#allocation8]  }
 0x34f   :  { %s2586_s6 = sshll.u32 %s2799_s13, 4  ;;  %s2587_s6 = int_to_ptr.vmem [resolvable:$true] %s2586_s6 }
 0x350   :  { %v2156_v21 = vpop.permute.xlu1 %2155  ;;  %v2154_v1 = vpop.permute.xlu0 %2153  ;;  %s2759_s8 = scalar_lea.vmem %s2587_s6, 512  ;;  %p2764_p0 = scmp.lt.s32.totalorder %s2587_s6, %s2587_s6 }
 0x351   :  { %v2164_v46 = vadd.f32 %v2156_v21, %v2139_v49  ;;  %v2163_v37 = vadd.f32 %v2154_v1, %v2138_v24  ;;  %p2760_p13 = scmp.ne.s32.totalorder %s2587_s6, %s2759_s8  ;;  %p2765_p1 = scmp.lt.s32.totalorder %s2759_s8, %s2759_s8 }
 0x353   :  { %p2766_p2 = por %p2765_p1, %p2764_p0 }
 0x354   :  { %v2179_v61 = vpop.permute.xlu1 %2178  ;;  %v2177_v45 = vpop.permute.xlu0 %2176 }
 0x355   :  { %v2189_v14 = vadd.f32 %v2179_v61, %v2162_v20  ;;  %v2188_v8 = vadd.f32 %v2177_v45, %v2161_v39  ;;  %p2767_p3 = pnand %p2766_p2, %p2760_p13 }
 0x358   :  { %v2183_v40 = vpop.permute.xlu1 %2182  ;;  %v2181_v32 = vpop.permute.xlu0 %2180 }
 0x359   :  { %v2191_v42 = vadd.f32 %v2183_v40, %v2164_v46  ;;  %v2190_v2 = vadd.f32 %v2181_v32, %v2163_v37 }
 0x35c   :  { %v2204_v25 = vpop.permute.xlu1 %2203  ;;  %v2202_v57 = vpop.permute.xlu0 %2201 }
 0x35d   :  { %v2214_v58 = vadd.f32 %v2204_v25, %v2189_v14  ;;  %v2213_v38 = vadd.f32 %v2202_v57, %v2188_v8 }
 0x35f   :  { %v2233_v16 = vadd.f32 %v2229_v30, %v2214_v58  ;;  %v2232_v17 = vadd.f32 %v2228_v9, %v2213_v38 }
 0x360   :  { %v2208_v55 = vpop.permute.xlu1 %2207  ;;  %v2206_v4 = vpop.permute.xlu0 %2205 }
 0x361   :  { %v2216_v43 = vadd.f32 %v2208_v55, %v2191_v42  ;;  %v2242_v33 = vadd.f32 %v2238_v36, %v2233_v16  ;;  %v2215_v27 = vadd.f32 %v2206_v4, %v2190_v2  ;;  %v2241_v12 = vadd.f32 %v2237_v26, %v2232_v17 }
 0x363   :  { %v2235_v5 = vadd.f32 %v2231_v0, %v2216_v43  ;;  %v2234_v56 = vadd.f32 %v2230_v62, %v2215_v27 }
 0x364   :  { %v2259_v59 = vpop.permute.xlu1 %2258  ;;  %v2257_v41 = vpop.permute.xlu0 %2256 }
 0x365   :  { %v2269_v63 = vadd.f32 %v2259_v59, %v2242_v33  ;;  %v2244_v35 = vadd.f32 %v2240_v22, %v2235_v5  ;;  %v2268_v13 = vadd.f32 %v2257_v41, %v2241_v12  ;;  %v2243_v51 = vadd.f32 %v2239_v6, %v2234_v56 }
 0x368   :  { %v2263_v54 = vpop.permute.xlu1 %2262  ;;  %v2261_v50 = vpop.permute.xlu0 %2260 }
 0x369   :  { %v2271_v53 = vadd.f32 %v2263_v54, %v2244_v35  ;;  %v2270_v34 = vadd.f32 %v2261_v50, %v2243_v51 }
 0x36c   :  { %v2284_v47 = vpop.permute.xlu1 %2283  ;;  %v2282_v23 = vpop.permute.xlu0 %2281 }
 0x36d   :  { %v2294_v25 = vadd.f32 %v2284_v47, %v2269_v63  ;;  %v2293_v30 = vadd.f32 %v2282_v23, %v2268_v13 }
 0x370   :  { %v2288_v52 = vpop.permute.xlu1 %2287  ;;  %v2286_v18 = vpop.permute.xlu0 %2285 }
 0x371   :  { %v2296_v38 = vadd.f32 %v2288_v52, %v2271_v53  ;;  %v2295_v17 = vadd.f32 %v2286_v18, %v2270_v34 }
 0x374   :  { %v2311_v29 = vpop.permute.xlu1 %2310  ;;  %v2309_v11 = vpop.permute.xlu0 %2308 }
 0x375   :  { %v2321_v58 = vadd.f32 %v2311_v29, %v2294_v25  ;;  %v2320_v57 = vadd.f32 %v2309_v11, %v2293_v30 }
 0x378   :  { %v2315_v19 = vpop.permute.xlu1 %2314  ;;  %v2313_v49 = vpop.permute.xlu0 %2312 }
 0x379   :  { %v2323_v26 = vadd.f32 %v2315_v19, %v2296_v38  ;;  %v2322_v43 = vadd.f32 %v2313_v49, %v2295_v17 }
 0x37c   :  { %v2336_v44 = vpop.permute.xlu1 %2335  ;;  %v2334_v31 = vpop.permute.xlu0 %2333 }
 0x37d   :  { %v2346_v16 = vadd.f32 %v2336_v44, %v2321_v58  ;;  %v2345_v55 = vadd.f32 %v2334_v31, %v2320_v57 }
 0x380   :  { %v2340_v28 = vpop.permute.xlu1 %2339  ;;  %v2338_v24 = vpop.permute.xlu0 %2337 }
 0x381   :  { %v2348_v62 = vadd.f32 %v2340_v28, %v2323_v26  ;;  %v2347_v5 = vadd.f32 %v2338_v24, %v2322_v43 }
 0x384   :  { %v2363_v7 = vpop.permute.xlu1 %2362  ;;  %v2361_v10 = vpop.permute.xlu0 %2360 }
 0x385   :  { %v2373_v0 = vadd.f32 %v2363_v7, %v2346_v16  ;;  %v2372_v4 = vadd.f32 %v2361_v10, %v2345_v55 }
 0x388   :  { %v2367_v20 = vpop.permute.xlu1 %2366  ;;  %v2365_v48 = vpop.permute.xlu0 %2364 }
 0x389   :  { %v2375_v56 = vadd.f32 %v2367_v20, %v2348_v62  ;;  %v2374_v6 = vadd.f32 %v2365_v48, %v2347_v5 }
 0x38c   :  { %v2388_v3 = vpop.permute.xlu1 %2387  ;;  %v2386_v39 = vpop.permute.xlu0 %2385 }
 0x38d   :  { %v2398_v27 = vadd.f32 %v2388_v3, %v2373_v0  ;;  %v2397_v22 = vadd.f32 %v2386_v39, %v2372_v4 }
 0x390   :  { %v2392_v21 = vpop.permute.xlu1 %2391  ;;  %v2390_v46 = vpop.permute.xlu0 %2389 }
 0x391   :  { %v2400_v35 = vadd.f32 %v2392_v21, %v2375_v56  ;;  %v2399_v54 = vadd.f32 %v2390_v46, %v2374_v6 }
 0x394   :  { %v2415_v1 = vpop.permute.xlu1 %2414  ;;  %v2413_v37 = vpop.permute.xlu0 %2412 }
 0x395   :  { %v2425_v59 = vadd.f32 %v2415_v1, %v2398_v27  ;;  %v2424_v63 = vadd.f32 %v2413_v37, %v2397_v22 }
 0x398   :  { %v2419_v61 = vpop.permute.xlu1 %2418  ;;  %v2417_v14 = vpop.permute.xlu0 %2416 }
 0x399   :  { %v2427_v50 = vadd.f32 %v2419_v61, %v2400_v35  ;;  %v2426_v47 = vadd.f32 %v2417_v14, %v2399_v54 }
 0x39c   :  { %v2440_v45 = vpop.permute.xlu1 %2439  ;;  %v2438_v8 = vpop.permute.xlu0 %2437 }
 0x39d   :  { %v2450_v13 = vadd.f32 %v2440_v45, %v2425_v59  ;;  %v2449_v53 = vadd.f32 %v2438_v8, %v2424_v63 }
 0x3a0   :  { %v2444_v40 = vpop.permute.xlu1 %2443  ;;  %v2442_v42 = vpop.permute.xlu0 %2441 }
 0x3a1   :  { %v2452_v18 = vadd.f32 %v2444_v40, %v2427_v50  ;;  %v2451_v19 = vadd.f32 %v2442_v42, %v2426_v47 }
 0x3a4   :  { %v2467_v32 = vpop.permute.xlu1 %2466  ;;  %v2465_v2 = vpop.permute.xlu0 %2464 }
 0x3a5   :  { %v2477_v34 = vadd.f32 %v2467_v32, %v2450_v13  ;;  %v2476_v23 = vadd.f32 %v2465_v2, %v2449_v53 }
 0x3a8   :  { %v2471_v15 = vpop.permute.xlu1 %2470  ;;  %v2469_v60 = vpop.permute.xlu0 %2468 }
 0x3a9   :  { %v2479_v44 = vadd.f32 %v2471_v15, %v2452_v18  ;;  %v2478_v28 = vadd.f32 %v2469_v60, %v2451_v19 }
 0x3ac   :  { %v2492_v9 = vpop.permute.xlu1 %2491  ;;  %v2490_v36 = vpop.permute.xlu0 %2489 }
 0x3ad   :  { %v2502_v29 = vadd.f32 %v2492_v9, %v2477_v34  ;;  %v2501_v49 = vadd.f32 %v2490_v36, %v2476_v23 }
 0x3b0   :  { %v2496_v33 = vpop.permute.xlu1 %2495  ;;  %v2494_v12 = vpop.permute.xlu0 %2493 }
 0x3b1   :  { %v2504_v10 = vadd.f32 %v2496_v33, %v2479_v44  ;;  %v2503_v3 = vadd.f32 %v2494_v12, %v2478_v28 }
 0x3b4   :  { %v2519_v41 = vpop.permute.xlu1 %2518  ;;  %v2517_v51 = vpop.permute.xlu0 %2516 }
 0x3b5   :  { %v2529_v31 = vadd.f32 %v2519_v41, %v2502_v29  ;;  %v2528_v24 = vadd.f32 %v2517_v51, %v2501_v49 }
 0x3b8   :  { %v2523_v52 = vpop.permute.xlu1 %2522  ;;  %v2521_v11 = vpop.permute.xlu0 %2520 }
 0x3b9   :  { %v2531_v21 = vadd.f32 %v2523_v52, %v2504_v10  ;;  %v2530_v1 = vadd.f32 %v2521_v11, %v2503_v3 }
 0x3bc   :  { %v2544_v7 = vpop.permute.xlu1 %2543  ;;  %v2542_v48 = vpop.permute.xlu0 %2541 }
 0x3bd   :  { %v2554_v20 = vadd.f32 %v2544_v7, %v2529_v31  ;;  %v2553_v39 = vadd.f32 %v2542_v48, %v2528_v24 }
 0x3bf   :  { %v2558_v46 = vsub.f32 0.0, %v2554_v20  ;;  %v2557_v37 = vsub.f32 0.0, %v2553_v39 }
 0x3c0   :  { %v2548_v61 = vpop.permute.xlu1 %2547  ;;  %v2546_v8 = vpop.permute.xlu0 %2545 }
 0x3c1   :  { %v2563_v14 = vmul.f32 1.442695, %v2558_v46  ;;  %v2556_v45 = vadd.f32 %v2548_v61, %v2531_v21  ;;  %v2561_v40 = vmul.f32 1.442695, %v2557_v37  ;;  %v2555_v42 = vadd.f32 %v2546_v8, %v2530_v1 }
 0x3c3   :  { %2709 = vpow2.f32 %v2563_v14  ;;  %v2560_v32 = vsub.f32 0.0, %v2556_v45  ;;  %v2559_v2 = vsub.f32 0.0, %v2555_v42 }
 0x3c4   :  { %2711 = vpow2.f32 %v2561_v40 }
 0x3c5   :  { %v2567_v15 = vmul.f32 1.442695, %v2560_v32  ;;  %v2565_v25 = vmul.f32 1.442695, %v2559_v2 }
 0x3c7   :  { %2713 = vpow2.f32 %v2567_v15 }
 0x3c8   :  { %2715 = vpow2.f32 %v2565_v25 }
 0x3cd   :  { %v2710_v60 = vpop.eup %2709 }
 0x3ce   :  { %v2712_v30 = vpop.eup %2711  ;;  %v2570_v58 = vadd.f32 1.0, %v2710_v60 }
 0x3cf   :  { %v2569_v57 = vadd.f32 1.0, %v2712_v30 }
 0x3d0   :  { %2717 = vrcp.f32 %v2570_v58 }
 0x3d1   :  { %v2714_v9 = vpop.eup %2713  ;;  %2719 = vrcp.f32 %v2569_v57 }
 0x3d2   :  { %v2716_v38 = vpop.eup %2715  ;;  %v2572_v16 = vadd.f32 1.0, %v2714_v9 }
 0x3d3   :  { %v2571_v36 = vadd.f32 1.0, %v2716_v38 }
 0x3d4   :  { %2721 = vrcp.f32 %v2572_v16 }
 0x3d5   :  { %2723 = vrcp.f32 %v2571_v36 }
 0x3da   :  { %v2718_v17 = vpop.eup %2717 }
 0x3db   :  { %v2720_v55 = vpop.eup %2719  ;;  %2578 = vst.msk [vmem:[#allocation8 + $0x8] sm:$0xff] %vm73_vm0, %v2718_v17 }
 0x3dc   :  { %2577 = vst.msk [vmem:[#allocation8] sm:$0xff] %vm73_vm0, %v2720_v55 }
 0x3de   :  { %v2722_v26 = vpop.eup %2721 }
 0x3df   :  { %v2724_v0 = vpop.eup %2723  ;;  %2580 = vst.msk [vmem:[#allocation8 + $0x18] sm:$0xff] %vm73_vm0, %v2722_v26 }
 0x3e0   :  { %2579 = vst.msk [vmem:[#allocation8 + $0x10] sm:$0xff] %vm73_vm0, %v2724_v0 }
 0x3e1   :  { %2770 = shalt.err (!%p2767_p3)
}
 0x3e2   :  { %s2771_s14 = scalar_lea.hbm %s4369_s2, 512 }
 0x3e3   :  { %p2772_p4 = scmp.ne.s32.totalorder %s4369_s2, %s2771_s14  ;;  %p2775_p5 = scmp.lt.u32.totalorder %s2771_s14, %s4369_s2 }
 0x3e5   :  { %p2777_p6 = pnand %p2775_p5, %p2772_p4 }
 0x3e7   :  { %2780 = shalt.err (!%p2777_p6)
}
 0x3e8   :  { %2592 = dma.vmem_to_hbm [thread:$0]  %s2587_s6, 512, %s4369_s2, [#allocation5], %s2788_s1, %s2788_s1, %s2789_s22  }
 0x3e9   :  { %2785 = dma.done.wait [#allocation5], 512  }
 0x3ea   :  { %2786 = vsyncadd [#allocation5], 4294966784 }
 0x3eb   :  { %2596 = vsyncpa [#allocation4], 1 }
 0x3ec   :  { %2597 = vsyncpa [#allocation5], 1 }
 0x3ed   :  { %2598 = vsyncpa [#allocation6], 1 }

</bundles_post_ra>
